<compile_context>
chip_gen: v7x
topology: tpu7x:2x2x1
jax: 0.10.0
libtpu: 0.0.40
codegen_flags: <defaults>
</compile_context>

<pallas_src>
import functools

import jax
import jax.numpy as jnp
from jax import lax
from jax.experimental import pallas as pl
from jax.experimental.pallas import tpu as pltpu


# ----------------------------------------------------------------------------
# small helpers
# ----------------------------------------------------------------------------
def _make_divisible(v, divisor=8):
    return max(divisor, int(v + divisor / 2) // divisor * divisor)


def fold_bn(bn, eps=1e-5):
    gamma, beta, mean, var = bn
    scale = gamma / jnp.sqrt(var + eps)
    bias = beta - mean * scale
    return scale, bias


def _pick_tm(m, cap=256):
    """Largest row tile <= cap that divides m exactly (no pad / no tail slice)."""
    if m <= cap:
        return m
    for t in range(cap, 7, -8):
        if m % t == 0:
            return t
    return m


# ----------------------------------------------------------------------------
# Pallas kernels
# ----------------------------------------------------------------------------
def _mm_bn_act_kernel(x_ref, w_ref, s_ref, b_ref, *rest, act, has_res):
    """o = act((x @ w) * scale + bias) [+ residual]."""
    if has_res:
        r_ref, o_ref = rest
    else:
        (o_ref,) = rest
    y = jnp.dot(x_ref[...], w_ref[...], preferred_element_type=jnp.float32)
    y = y * s_ref[...] + b_ref[...]
    if act == "relu":
        y = jnp.maximum(y, 0.0)
    if has_res:
        y = y + r_ref[...]
    o_ref[...] = y.astype(o_ref.dtype)


def matmul_bn_act(x, w, scale, bias, *, act="linear", residual=None):
    """Fused 1x1-conv style matmul: act((x @ w) * scale + bias) [+ residual]."""
    m, k = x.shape
    n = w.shape[1]
    tm = _pick_tm(m)
    inputs = [x, w, scale.reshape(1, n), bias.reshape(1, n)]
    in_specs = [
        pl.BlockSpec((tm, k), lambda i: (i, 0)),
        pl.BlockSpec((k, n), lambda i: (0, 0)),
        pl.BlockSpec((1, n), lambda i: (0, 0)),
        pl.BlockSpec((1, n), lambda i: (0, 0)),
    ]
    if residual is not None:
        inputs.append(residual)
        in_specs.append(pl.BlockSpec((tm, n), lambda i: (i, 0)))
    return pl.pallas_call(
        functools.partial(_mm_bn_act_kernel, act=act, has_res=residual is not None),
        out_shape=jax.ShapeDtypeStruct((m, n), x.dtype),
        grid_spec=pltpu.PrefetchScalarGridSpec(
            num_scalar_prefetch=0,
            grid=(m // tm,),
            in_specs=in_specs,
            out_specs=pl.BlockSpec((tm, n), lambda i: (i, 0)),
        ),
        compiler_params=pltpu.CompilerParams(dimension_semantics=("parallel",)),
    )(*inputs)


def _pw_exp_kernel(x_ref, w1_ref, s1_ref, b1_ref, w2_ref, s2_ref, b2_ref,
                   o1_ref, o2_ref):
    """Chained 1x1 convs: o1 = (x@w1)*s1+b1 (linear), o2 = relu((o1@w2)*s2+b2)."""
    y1 = jnp.dot(x_ref[...], w1_ref[...], preferred_element_type=jnp.float32)
    y1 = y1 * s1_ref[...] + b1_ref[...]
    o1_ref[...] = y1.astype(o1_ref.dtype)
    y2 = jnp.dot(y1, w2_ref[...], preferred_element_type=jnp.float32)
    y2 = jnp.maximum(y2 * s2_ref[...] + b2_ref[...], 0.0)
    o2_ref[...] = y2.astype(o2_ref.dtype)


def pw_then_exp(x2d, pw_w, pw_bn, exp_w, exp_bn):
    """Stage-k pw-linear projection fused with stage-(k+1) 1x1 expansion."""
    m, k = x2d.shape
    n1 = pw_w.shape[-1]
    n2 = exp_w.shape[-1]
    s1, b1 = fold_bn(pw_bn)
    s2, b2 = fold_bn(exp_bn)
    tm = _pick_tm(m)
    out1, out2 = pl.pallas_call(
        _pw_exp_kernel,
        out_shape=(jax.ShapeDtypeStruct((m, n1), x2d.dtype),
                   jax.ShapeDtypeStruct((m, n2), x2d.dtype)),
        grid_spec=pltpu.PrefetchScalarGridSpec(
            num_scalar_prefetch=0,
            grid=(m // tm,),
            in_specs=[
                pl.BlockSpec((tm, k), lambda i: (i, 0)),
                pl.BlockSpec((k, n1), lambda i: (0, 0)),
                pl.BlockSpec((1, n1), lambda i: (0, 0)),
                pl.BlockSpec((1, n1), lambda i: (0, 0)),
                pl.BlockSpec((n1, n2), lambda i: (0, 0)),
                pl.BlockSpec((1, n2), lambda i: (0, 0)),
                pl.BlockSpec((1, n2), lambda i: (0, 0)),
            ],
            out_specs=[pl.BlockSpec((tm, n1), lambda i: (i, 0)),
                       pl.BlockSpec((tm, n2), lambda i: (i, 0))],
        ),
        compiler_params=pltpu.CompilerParams(dimension_semantics=("parallel",)),
    )(x2d, pw_w.reshape(k, n1), s1.reshape(1, n1), b1.reshape(1, n1),
      exp_w.reshape(n1, n2), s2.reshape(1, n2), b2.reshape(1, n2))
    return out1, out2


def _dw_bn_act_se_kernel(ph_ref, w_ref, s_ref, b_ref, *rest,
                         stride, kh, kw, out_h, out_w, has_se):
    """Depthwise 3x3 (tap sum over phase windows) + BN + ReLU + optional SE gate."""
    if has_se:
        w1_ref, b1_ref, w2_ref, b2_ref, o_ref = rest
    else:
        (o_ref,) = rest

    acc = None
    for di in range(kh):
        for dj in range(kw):
            p = (di % stride) * stride + (dj % stride)
            oi, oj = di // stride, dj // stride
            tap = ph_ref[p, oi:oi + out_h, oj:oj + out_w, :]     # (Ho, Wo, C)
            term = tap * w_ref[di * kw + dj]                     # bcast (1, C)
            acc = term if acc is None else acc + term

    y = acc * s_ref[...] + b_ref[...]
    y = jnp.maximum(y, 0.0)

    if has_se:
        # squeeze (spatial mean) -> FC -> ReLU -> FC -> sigmoid -> gate, all in VMEM
        m = jnp.sum(jnp.sum(y, axis=0), axis=0, keepdims=True)   # (1, C)
        m = m * (1.0 / (out_h * out_w))
        h = jnp.dot(m, w1_ref[...], preferred_element_type=jnp.float32) + b1_ref[...]
        h = jnp.maximum(h, 0.0)
        g = jax.nn.sigmoid(
            jnp.dot(h, w2_ref[...], preferred_element_type=jnp.float32) + b2_ref[...])
        y = y * g

    o_ref[0] = y.astype(o_ref.dtype)


def _pad_phase_split(x, stride, pad):
    """Zero-pad spatially then split into stride*stride interleaved phase grids.

    Returns (N * P, Hp//stride, Wp//stride, C) with P = stride*stride; tap
    (di, dj) of the depthwise conv becomes a unit-stride window of phase
    (di % stride, dj % stride) -- no 9x im2col materialization in HBM.
    """
    n, _, _, c = x.shape
    xp = jnp.pad(x, ((0, 0), (pad, pad), (pad, pad), (0, 0)))
    if stride == 1:
        ph = xp[:, None]
    else:
        hp, wp = xp.shape[1], xp.shape[2]
        eh, ew = (-hp) % stride, (-wp) % stride
        if eh or ew:
            xp = jnp.pad(xp, ((0, 0), (0, eh), (0, ew), (0, 0)))
        ph = jnp.stack([xp[:, a::stride, b::stride, :]
                        for a in range(stride) for b in range(stride)], axis=1)
    p_cnt, hh, ww = ph.shape[1], ph.shape[2], ph.shape[3]
    return ph.reshape(n * p_cnt, hh, ww, c), p_cnt, hh, ww


def dwconv_bn_act_se(x, w_dw, bn, se=None, *, stride):
    """Fused depthwise conv3x3 + BN + ReLU (+ SqueezeExcite), grid over batch."""
    n, hh, ww, c = x.shape
    kh, kw, _ = w_dw.shape
    pad = (kh - 1) // 2
    out_h = (hh + 2 * pad - kh) // stride + 1
    out_w = (ww + 2 * pad - kw) // stride + 1
    ph, p_cnt, phh, pww = _pad_phase_split(x, stride, pad)
    scale, bias = fold_bn(bn)
    t = kh * kw

    inputs = [ph, w_dw.reshape(t, 1, c), scale.reshape(1, c), bias.reshape(1, c)]
    in_specs = [
        pl.BlockSpec((p_cnt, phh, pww, c), lambda i: (i, 0, 0, 0)),
        pl.BlockSpec((t, 1, c), lambda i: (0, 0, 0)),
        pl.BlockSpec((1, c), lambda i: (0, 0)),
        pl.BlockSpec((1, c), lambda i: (0, 0)),
    ]
    has_se = se is not None
    if has_se:
        rd = se["w1"].shape[1]
        inputs += [se["w1"], se["b1"].reshape(1, rd), se["w2"], se["b2"].reshape(1, c)]
        in_specs += [
            pl.BlockSpec((c, rd), lambda i: (0, 0)),
            pl.BlockSpec((1, rd), lambda i: (0, 0)),
            pl.BlockSpec((rd, c), lambda i: (0, 0)),
            pl.BlockSpec((1, c), lambda i: (0, 0)),
        ]

    return pl.pallas_call(
        functools.partial(_dw_bn_act_se_kernel, stride=stride, kh=kh, kw=kw,
                          out_h=out_h, out_w=out_w, has_se=has_se),
        out_shape=jax.ShapeDtypeStruct((n, out_h, out_w, c), x.dtype),
        grid_spec=pltpu.PrefetchScalarGridSpec(
            num_scalar_prefetch=0,
            grid=(n,),
            in_specs=in_specs,
            out_specs=pl.BlockSpec((1, out_h, out_w, c), lambda i: (i, 0, 0, 0)),
        ),
        compiler_params=pltpu.CompilerParams(dimension_semantics=("parallel",)),
    )(*inputs)


# ----------------------------------------------------------------------------
# stem conv (im2col only for the tiny 3-channel input)
# ----------------------------------------------------------------------------
def _im2col(x_nhwc, kh, kw, stride, pad):
    n, h, w, c = x_nhwc.shape
    ho = (h + 2 * pad - kh) // stride + 1
    wo = (w + 2 * pad - kw) // stride + 1
    xp = jnp.pad(x_nhwc, ((0, 0), (pad, pad), (pad, pad), (0, 0)))
    cols = []
    for di in range(kh):
        for dj in range(kw):
            cols.append(xp[:, di:di + (ho - 1) * stride + 1:stride,
                              dj:dj + (wo - 1) * stride + 1:stride, :])
    return jnp.stack(cols, axis=3), ho, wo


def conv_stem_bn_relu(x, w, bn, *, stride=2):
    kh, kw, cin, cout = w.shape
    n = x.shape[0]
    scale, bias = fold_bn(bn)
    pad = (kh - 1) // 2
    cols, ho, wo = _im2col(x, kh, kw, stride, pad)
    xm = cols.reshape(n * ho * wo, kh * kw * cin)
    y = matmul_bn_act(xm, w.reshape(kh * kw * cin, cout), scale, bias, act="relu")
    return y.reshape(n, ho, wo, cout)


# ----------------------------------------------------------------------------
# deterministic parameter init (synthetic MobileNetV3-small-style config)
# ----------------------------------------------------------------------------
def _conv_w(key, kh, kw, cin, cout):
    fan_in = kh * kw * cin
    return jax.random.normal(key, (kh, kw, cin, cout), jnp.float32) * (2.0 / fan_in) ** 0.5


def _dw_w(key, kh, kw, c):
    fan_in = kh * kw
    return jax.random.normal(key, (kh, kw, c), jnp.float32) * (2.0 / fan_in) ** 0.5


def _bn(key, c):
    k1, k2, k3, k4 = jax.random.split(key, 4)
    gamma = 1.0 + 0.1 * jax.random.normal(k1, (c,), jnp.float32)
    beta = 0.1 * jax.random.normal(k2, (c,), jnp.float32)
    mean = 0.1 * jax.random.normal(k3, (c,), jnp.float32)
    var = jnp.abs(jax.random.normal(k4, (c,), jnp.float32)) * 0.1 + 1.0
    return (gamma, beta, mean, var)


def _se(key, c):
    rd = _make_divisible(c * 0.25)
    k1, k2, k3, k4 = jax.random.split(key, 4)
    return dict(
        w1=jax.random.normal(k1, (c, rd), jnp.float32) * (2.0 / c) ** 0.5,
        b1=0.01 * jax.random.normal(k2, (rd,), jnp.float32),
        w2=jax.random.normal(k3, (rd, c), jnp.float32) * (2.0 / rd) ** 0.5,
        b2=0.01 * jax.random.normal(k4, (c,), jnp.float32),
    )


def init_params(key, in_chans=3, stem_size=16):
    k = jax.random.split(key, 28)
    p = {}
    p["stem_w"] = _conv_w(k[0], 3, 3, in_chans, stem_size)
    p["stem_bn"] = _bn(k[1], stem_size)
    # stage 1: depthwise-separable block (dw s2 + SE + pw-linear), 16 -> 16
    p["s1"] = dict(dw_w=_dw_w(k[2], 3, 3, 16), dw_bn=_bn(k[3], 16),
                   se=_se(k[4], 16),
                   pw_w=_conv_w(k[5], 1, 1, 16, 16), pw_bn=_bn(k[6], 16))
    # stage 2: inverted residual (exp 64, dw s2, pw-linear), 16 -> 24
    p["s2"] = dict(exp_w=_conv_w(k[7], 1, 1, 16, 64), exp_bn=_bn(k[8], 64),
                   dw_w=_dw_w(k[9], 3, 3, 64), dw_bn=_bn(k[10], 64),
                   pw_w=_conv_w(k[11], 1, 1, 64, 24), pw_bn=_bn(k[12], 24))
    # stage 3: inverted residual + SE (exp 72, dw s2), 24 -> 40
    p["s3"] = dict(exp_w=_conv_w(k[13], 1, 1, 24, 72), exp_bn=_bn(k[14], 72),
                   dw_w=_dw_w(k[15], 3, 3, 72), dw_bn=_bn(k[16], 72),
                   se=_se(k[17], 72),
                   pw_w=_conv_w(k[18], 1, 1, 72, 40), pw_bn=_bn(k[19], 40))
    # stage 4: inverted residual + SE, stride 1, residual, 40 -> 40 (exp 120)
    p["s4"] = dict(exp_w=_conv_w(k[20], 1, 1, 40, 120), exp_bn=_bn(k[21], 120),
                   dw_w=_dw_w(k[22], 3, 3, 120), dw_bn=_bn(k[23], 120),
                   se=_se(k[24], 120),
                   pw_w=_conv_w(k[25], 1, 1, 120, 40), pw_bn=_bn(k[26], 40))
    return p


# ----------------------------------------------------------------------------
# MobileNetV3Features forward (Pallas path, 9 pallas_calls total)
# ----------------------------------------------------------------------------
def mobilenetv3_features(params, x_nchw):
    """Returns list of feature maps (NCHW) at stages 0..4, like the PyTorch module."""
    x = jnp.transpose(x_nchw, (0, 2, 3, 1))  # NCHW -> NHWC
    n = x.shape[0]
    feats = []

    s1, s2, s3, s4 = params["s1"], params["s2"], params["s3"], params["s4"]

    # stage 0: stem conv3x3 s2 + BN + ReLU
    f0 = conv_stem_bn_relu(x, params["stem_w"], params["stem_bn"], stride=2)
    feats.append(f0)

    # stage 1: [dw s2 + BN + ReLU + SE] -> [pw-linear fused with stage-2 expansion]
    y = dwconv_bn_act_se(f0, s1["dw_w"], s1["dw_bn"], s1["se"], stride=2)
    h1, w1 = y.shape[1], y.shape[2]
    f1_2d, e2_2d = pw_then_exp(y.reshape(n * h1 * w1, y.shape[3]),
                               s1["pw_w"], s1["pw_bn"], s2["exp_w"], s2["exp_bn"])
    f1 = f1_2d.reshape(n, h1, w1, -1)
    feats.append(f1)
    e2 = e2_2d.reshape(n, h1, w1, -1)

    # stage 2: [dw s2 + BN + ReLU] -> [pw-linear fused with stage-3 expansion]
    y = dwconv_bn_act_se(e2, s2["dw_w"], s2["dw_bn"], None, stride=2)
    h2, w2 = y.shape[1], y.shape[2]
    f2_2d, e3_2d = pw_then_exp(y.reshape(n * h2 * w2, y.shape[3]),
                               s2["pw_w"], s2["pw_bn"], s3["exp_w"], s3["exp_bn"])
    f2 = f2_2d.reshape(n, h2, w2, -1)
    feats.append(f2)
    e3 = e3_2d.reshape(n, h2, w2, -1)

    # stage 3: [dw s2 + BN + ReLU + SE] -> [pw-linear fused with stage-4 expansion]
    y = dwconv_bn_act_se(e3, s3["dw_w"], s3["dw_bn"], s3["se"], stride=2)
    h3, w3 = y.shape[1], y.shape[2]
    f3_2d, e4_2d = pw_then_exp(y.reshape(n * h3 * w3, y.shape[3]),
                               s3["pw_w"], s3["pw_bn"], s4["exp_w"], s4["exp_bn"])
    f3 = f3_2d.reshape(n, h3, w3, -1)
    feats.append(f3)
    e4 = e4_2d.reshape(n, h3, w3, -1)

    # stage 4: [dw s1 + BN + ReLU + SE] -> [pw-linear + fused residual add]
    y = dwconv_bn_act_se(e4, s4["dw_w"], s4["dw_bn"], s4["se"], stride=1)
    h4, w4 = y.shape[1], y.shape[2]
    s_pw, b_pw = fold_bn(s4["pw_bn"])
    cout = s4["pw_w"].shape[-1]
    f4_2d = matmul_bn_act(
        y.reshape(n * h4 * w4, y.shape[3]),
        s4["pw_w"].reshape(s4["pw_w"].shape[-2], cout),
        s_pw, b_pw, act="linear", residual=f3_2d)
    f4 = f4_2d.reshape(n, h4, w4, cout)
    feats.append(f4)

    return [jnp.transpose(f, (0, 3, 1, 2)) for f in feats]  # back to NCHW


# ----------------------------------------------------------------------------
# pure-JAX reference (for correctness check only)
# ----------------------------------------------------------------------------
def _ref_conv(x, w, stride):
    pad = (w.shape[0] - 1) // 2
    return lax.conv_general_dilated(x, w, (stride, stride),
                                    padding=[(pad, pad), (pad, pad)],
                                    dimension_numbers=("NHWC", "HWIO", "NHWC"))


def _ref_dwconv(x, w_dw, stride):
    kh, kw, c = w_dw.shape
    pad = (kh - 1) // 2
    w = w_dw.reshape(kh, kw, 1, c)
    return lax.conv_general_dilated(x, w, (stride, stride),
                                    padding=[(pad, pad), (pad, pad)],
                                    dimension_numbers=("NHWC", "HWIO", "NHWC"),
                                    feature_group_count=c)


def _ref_bn(x, bn, eps=1e-5):
    g, b, m, v = bn
    return (x - m) / jnp.sqrt(v + eps) * g + b


def _ref_se(x, se):
    m = jnp.mean(x, axis=(1, 2))
    s = jnp.maximum(m @ se["w1"] + se["b1"], 0.0)
    g = jax.nn.sigmoid(s @ se["w2"] + se["b2"])
    return x * g[:, None, None, :]


def ref_forward(params, x_nchw):
    x = jnp.transpose(x_nchw, (0, 2, 3, 1))
    feats = []
    x = jnp.maximum(_ref_bn(_ref_conv(x, params["stem_w"], 2), params["stem_bn"]), 0.0)
    feats.append(x)
    s = params["s1"]
    y = jnp.maximum(_ref_bn(_ref_dwconv(x, s["dw_w"], 2), s["dw_bn"]), 0.0)
    y = _ref_se(y, s["se"])
    x = _ref_bn(_ref_conv(y, s["pw_w"], 1), s["pw_bn"])
    feats.append(x)
    s = params["s2"]
    y = jnp.maximum(_ref_bn(_ref_conv(x, s["exp_w"], 1), s["exp_bn"]), 0.0)
    y = jnp.maximum(_ref_bn(_ref_dwconv(y, s["dw_w"], 2), s["dw_bn"]), 0.0)
    x = _ref_bn(_ref_conv(y, s["pw_w"], 1), s["pw_bn"])
    feats.append(x)
    s = params["s3"]
    y = jnp.maximum(_ref_bn(_ref_conv(x, s["exp_w"], 1), s["exp_bn"]), 0.0)
    y = jnp.maximum(_ref_bn(_ref_dwconv(y, s["dw_w"], 2), s["dw_bn"]), 0.0)
    y = _ref_se(y, s["se"])
    x = _ref_bn(_ref_conv(y, s["pw_w"], 1), s["pw_bn"])
    feats.append(x)
    s = params["s4"]
    y = jnp.maximum(_ref_bn(_ref_conv(x, s["exp_w"], 1), s["exp_bn"]), 0.0)
    y = jnp.maximum(_ref_bn(_ref_dwconv(y, s["dw_w"], 1), s["dw_bn"]), 0.0)
    y = _ref_se(y, s["se"])
    y = _ref_bn(_ref_conv(y, s["pw_w"], 1), s["pw_bn"])
    x = x + y
    feats.append(x)
    return [jnp.transpose(f, (0, 3, 1, 2)) for f in feats]


# ----------------------------------------------------------------------------
if __name__ == "__main__":
    key = jax.random.PRNGKey(0)
    pkey, xkey = jax.random.split(key)
    params = init_params(pkey)

    # small deterministic input, NCHW like PyTorch
    x = jax.random.normal(xkey, (2, 3, 32, 32), jnp.float32)

    fwd = jax.jit(mobilenetv3_features)
    feats = fwd(params, x)
    feats = jax.block_until_ready(feats)

    # sanity check against pure-JAX reference
    refs = ref_forward(params, x)
    expected_shapes = [(2, 16, 16, 16), (2, 16, 8, 8), (2, 24, 4, 4),
                       (2, 40, 2, 2), (2, 40, 2, 2)]
    for f, r, es in zip(feats, refs, expected_shapes):
        assert f.shape == es, (f.shape, es)
        err = float(jnp.max(jnp.abs(f - r)))
        assert jnp.allclose(f, r, atol=1e-2, rtol=1e-2), f"max abs err {err}"

    print("KERNEL_OK")
</pallas_src>

<mosaic_0001>
module attributes {stable_mosaic.version = 11 : i64} {
  func.func @_mm_bn_act_kernel(%arg0: i32, %arg1: memref<256x27xf32, #tpu.memory_space<vmem>>, %arg2: memref<27x16xf32, #tpu.memory_space<vmem>>, %arg3: memref<1x16xf32, #tpu.memory_space<vmem>>, %arg4: memref<1x16xf32, #tpu.memory_space<vmem>>, %arg5: memref<256x16xf32, #tpu.memory_space<vmem>>) attributes {dimension_semantics = [#tpu.dimension_semantics<parallel>], iteration_bounds = array<i64: 2>, scalar_prefetch = 0 : i64, scratch_operands = 0 : i64, tpu.core_type = #tpu.core_type<tc>, window_params = [{transform_indices = @transform_0, window_bounds = array<i64: 256, 27>}, {pipeline_mode = #tpu.pipeline_mode<synchronous>, transform_indices = @transform_1, window_bounds = array<i64: 27, 16>}, {pipeline_mode = #tpu.pipeline_mode<synchronous>, transform_indices = @transform_2, window_bounds = array<i64: 1, 16>}, {pipeline_mode = #tpu.pipeline_mode<synchronous>, transform_indices = @transform_3, window_bounds = array<i64: 1, 16>}, {transform_indices = @transform_4, window_bounds = array<i64: 256, 16>}]} {
    %c0 = arith.constant 0 : index
    %c0_0 = arith.constant 0 : index
    %0 = vector.load %arg1[%c0, %c0_0] : memref<256x27xf32, #tpu.memory_space<vmem>>, vector<256x27xf32>
    %c0_1 = arith.constant 0 : index
    %c0_2 = arith.constant 0 : index
    %1 = vector.load %arg2[%c0_1, %c0_2] : memref<27x16xf32, #tpu.memory_space<vmem>>, vector<27x16xf32>
    %cst = arith.constant dense<0.000000e+00> : vector<256x16xf32>
    %2 = tpu.matmul %0, %1, %cst {dimension_numbers = #tpu.dot_dimension_numbers<[1], [0], [0], [1], [0, 0, 1, 1], [], []>} : vector<256x27xf32>, vector<27x16xf32>, vector<256x16xf32> -> vector<256x16xf32>
    %c0_3 = arith.constant 0 : index
    %c0_4 = arith.constant 0 : index
    %3 = vector.load %arg3[%c0_3, %c0_4] : memref<1x16xf32, #tpu.memory_space<vmem>>, vector<1x16xf32>
    %4 = vector.broadcast %3 : vector<1x16xf32> to vector<256x16xf32>
    %5 = arith.mulf %2, %4 : vector<256x16xf32>
    %c0_5 = arith.constant 0 : index
    %c0_6 = arith.constant 0 : index
    %6 = vector.load %arg4[%c0_5, %c0_6] : memref<1x16xf32, #tpu.memory_space<vmem>>, vector<1x16xf32>
    %7 = vector.broadcast %6 : vector<1x16xf32> to vector<256x16xf32>
    %8 = arith.addf %5, %7 : vector<256x16xf32>
    %cst_7 = arith.constant 0.000000e+00 : f32
    %9 = vector.broadcast %cst_7 : f32 to vector<256x16xf32>
    %10 = arith.maximumf %8, %9 : vector<256x16xf32>
    %c0_8 = arith.constant 0 : index
    %c0_9 = arith.constant 0 : index
    %11 = vector.load %arg5[%c0_8, %c0_9] : memref<256x16xf32, #tpu.memory_space<vmem>>, vector<256x16xf32>
    tpu.vector_store %arg5[%c0_8, %c0_9], %10 {strides = array<i32>} : memref<256x16xf32, #tpu.memory_space<vmem>>, vector<256x16xf32>,
    return
  }
  func.func @transform_0(%arg0: i32) -> (i32, i32) {
    %c0_i32 = arith.constant 0 : i32
    %c0_i32_0 = arith.constant 0 : i32
    return %arg0, %c0_i32 : i32, i32
  }
  func.func @transform_1(%arg0: i32) -> (i32, i32) {
    %c0_i32 = arith.constant 0 : i32
    %c0_i32_0 = arith.constant 0 : i32
    %c0_i32_1 = arith.constant 0 : i32
    return %c0_i32, %c0_i32_0 : i32, i32
  }
  func.func @transform_2(%arg0: i32) -> (i32, i32) {
    %c0_i32 = arith.constant 0 : i32
    %c0_i32_0 = arith.constant 0 : i32
    %c0_i32_1 = arith.constant 0 : i32
    return %c0_i32, %c0_i32_0 : i32, i32
  }
  func.func @transform_3(%arg0: i32) -> (i32, i32) {
    %c0_i32 = arith.constant 0 : i32
    %c0_i32_0 = arith.constant 0 : i32
    %c0_i32_1 = arith.constant 0 : i32
    return %c0_i32, %c0_i32_0 : i32, i32
  }
  func.func @transform_4(%arg0: i32) -> (i32, i32) {
    %c0_i32 = arith.constant 0 : i32
    %c0_i32_0 = arith.constant 0 : i32
    return %arg0, %c0_i32 : i32, i32
  }
}

module attributes {stable_mosaic.version = 11 : i64} {
  func.func @_dw_bn_act_se_kernel(%arg0: i32, %arg1: memref<4x9x9x16xf32, #tpu.memory_space<vmem>>, %arg2: memref<9x1x16xf32, #tpu.memory_space<vmem>>, %arg3: memref<1x16xf32, #tpu.memory_space<vmem>>, %arg4: memref<1x16xf32, #tpu.memory_space<vmem>>, %arg5: memref<16x8xf32, #tpu.memory_space<vmem>>, %arg6: memref<1x8xf32, #tpu.memory_space<vmem>>, %arg7: memref<8x16xf32, #tpu.memory_space<vmem>>, %arg8: memref<1x16xf32, #tpu.memory_space<vmem>>, %arg9: memref<1x8x8x16xf32, #tpu.memory_space<vmem>>) attributes {dimension_semantics = [#tpu.dimension_semantics<parallel>], iteration_bounds = array<i64: 2>, scalar_prefetch = 0 : i64, scratch_operands = 0 : i64, tpu.core_type = #tpu.core_type<tc>, window_params = [{transform_indices = @transform_0, window_bounds = array<i64: 4, 9, 9, 16>}, {pipeline_mode = #tpu.pipeline_mode<synchronous>, transform_indices = @transform_1, window_bounds = array<i64: 9, 1, 16>}, {pipeline_mode = #tpu.pipeline_mode<synchronous>, transform_indices = @transform_2, window_bounds = array<i64: 1, 16>}, {pipeline_mode = #tpu.pipeline_mode<synchronous>, transform_indices = @transform_3, window_bounds = array<i64: 1, 16>}, {pipeline_mode = #tpu.pipeline_mode<synchronous>, transform_indices = @transform_4, window_bounds = array<i64: 16, 8>}, {pipeline_mode = #tpu.pipeline_mode<synchronous>, transform_indices = @transform_5, window_bounds = array<i64: 1, 8>}, {pipeline_mode = #tpu.pipeline_mode<synchronous>, transform_indices = @transform_6, window_bounds = array<i64: 8, 16>}, {pipeline_mode = #tpu.pipeline_mode<synchronous>, transform_indices = @transform_7, window_bounds = array<i64: 1, 16>}, {transform_indices = @transform_8, window_bounds = array<i64: 1, 8, 8, 16>}]} {
    %c0 = arith.constant 0 : index
    %c0_0 = arith.constant 0 : index
    %c0_1 = arith.constant 0 : index
    %c0_2 = arith.constant 0 : index
    %0 = vector.load %arg1[%c0, %c0_0, %c0_1, %c0_2] : memref<4x9x9x16xf32, #tpu.memory_space<vmem>>, vector<1x8x8x16xf32>
    %1 = vector.shape_cast %0 : vector<1x8x8x16xf32> to vector<8x8x16xf32>
    %c0_3 = arith.constant 0 : index
    %c0_4 = arith.constant 0 : index
    %c0_5 = arith.constant 0 : index
    %2 = vector.load %arg2[%c0_3, %c0_4, %c0_5] : memref<9x1x16xf32, #tpu.memory_space<vmem>>, vector<1x1x16xf32>
    %3 = vector.shape_cast %2 : vector<1x1x16xf32> to vector<1x16xf32>
    %4 = vector.shape_cast %3 : vector<1x16xf32> to vector<1x1x16xf32>
    %5 = vector.broadcast %4 : vector<1x1x16xf32> to vector<8x8x16xf32>
    %6 = arith.mulf %1, %5 : vector<8x8x16xf32>
    %c1 = arith.constant 1 : index
    %c0_6 = arith.constant 0 : index
    %c0_7 = arith.constant 0 : index
    %c0_8 = arith.constant 0 : index
    %7 = vector.load %arg1[%c1, %c0_6, %c0_7, %c0_8] : memref<4x9x9x16xf32, #tpu.memory_space<vmem>>, vector<1x8x8x16xf32>
    %8 = vector.shape_cast %7 : vector<1x8x8x16xf32> to vector<8x8x16xf32>
    %c1_9 = arith.constant 1 : index
    %c0_10 = arith.constant 0 : index
    %c0_11 = arith.constant 0 : index
    %9 = vector.load %arg2[%c1_9, %c0_10, %c0_11] : memref<9x1x16xf32, #tpu.memory_space<vmem>>, vector<1x1x16xf32>
    %10 = vector.shape_cast %9 : vector<1x1x16xf32> to vector<1x16xf32>
    %11 = vector.shape_cast %10 : vector<1x16xf32> to vector<1x1x16xf32>
    %12 = vector.broadcast %11 : vector<1x1x16xf32> to vector<8x8x16xf32>
    %13 = arith.mulf %8, %12 : vector<8x8x16xf32>
    %14 = arith.addf %6, %13 : vector<8x8x16xf32>
    %c0_12 = arith.constant 0 : index
    %c0_13 = arith.constant 0 : index
    %c1_14 = arith.constant 1 : index
    %c0_15 = arith.constant 0 : index
    %15 = vector.load %arg1[%c0_12, %c0_13, %c1_14, %c0_15] : memref<4x9x9x16xf32, #tpu.memory_space<vmem>>, vector<1x8x8x16xf32>
    %16 = vector.shape_cast %15 : vector<1x8x8x16xf32> to vector<8x8x16xf32>
    %c2 = arith.constant 2 : index
    %c0_16 = arith.constant 0 : index
    %c0_17 = arith.constant 0 : index
    %17 = vector.load %arg2[%c2, %c0_16, %c0_17] : memref<9x1x16xf32, #tpu.memory_space<vmem>>, vector<1x1x16xf32>
    %18 = vector.shape_cast %17 : vector<1x1x16xf32> to vector<1x16xf32>
    %19 = vector.shape_cast %18 : vector<1x16xf32> to vector<1x1x16xf32>
    %20 = vector.broadcast %19 : vector<1x1x16xf32> to vector<8x8x16xf32>
    %21 = arith.mulf %16, %20 : vector<8x8x16xf32>
    %22 = arith.addf %14, %21 : vector<8x8x16xf32>
    %c2_18 = arith.constant 2 : index
    %c0_19 = arith.constant 0 : index
    %c0_20 = arith.constant 0 : index
    %c0_21 = arith.constant 0 : index
    %23 = vector.load %arg1[%c2_18, %c0_19, %c0_20, %c0_21] : memref<4x9x9x16xf32, #tpu.memory_space<vmem>>, vector<1x8x8x16xf32>
    %24 = vector.shape_cast %23 : vector<1x8x8x16xf32> to vector<8x8x16xf32>
    %c3 = arith.constant 3 : index
    %c0_22 = arith.constant 0 : index
    %c0_23 = arith.constant 0 : index
    %25 = vector.load %arg2[%c3, %c0_22, %c0_23] : memref<9x1x16xf32, #tpu.memory_space<vmem>>, vector<1x1x16xf32>
    %26 = vector.shape_cast %25 : vector<1x1x16xf32> to vector<1x16xf32>
    %27 = vector.shape_cast %26 : vector<1x16xf32> to vector<1x1x16xf32>
    %28 = vector.broadcast %27 : vector<1x1x16xf32> to vector<8x8x16xf32>
    %29 = arith.mulf %24, %28 : vector<8x8x16xf32>
    %30 = arith.addf %22, %29 : vector<8x8x16xf32>
    %c3_24 = arith.constant 3 : index
    %c0_25 = arith.constant 0 : index
    %c0_26 = arith.constant 0 : index
    %c0_27 = arith.constant 0 : index
    %31 = vector.load %arg1[%c3_24, %c0_25, %c0_26, %c0_27] : memref<4x9x9x16xf32, #tpu.memory_space<vmem>>, vector<1x8x8x16xf32>
    %32 = vector.shape_cast %31 : vector<1x8x8x16xf32> to vector<8x8x16xf32>
    %c4 = arith.constant 4 : index
    %c0_28 = arith.constant 0 : index
    %c0_29 = arith.constant 0 : index
    %33 = vector.load %arg2[%c4, %c0_28, %c0_29] : memref<9x1x16xf32, #tpu.memory_space<vmem>>, vector<1x1x16xf32>
    %34 = vector.shape_cast %33 : vector<1x1x16xf32> to vector<1x16xf32>
    %35 = vector.shape_cast %34 : vector<1x16xf32> to vector<1x1x16xf32>
    %36 = vector.broadcast %35 : vector<1x1x16xf32> to vector<8x8x16xf32>
    %37 = arith.mulf %32, %36 : vector<8x8x16xf32>
    %38 = arith.addf %30, %37 : vector<8x8x16xf32>
    %c2_30 = arith.constant 2 : index
    %c0_31 = arith.constant 0 : index
    %c1_32 = arith.constant 1 : index
    %c0_33 = arith.constant 0 : index
    %39 = vector.load %arg1[%c2_30, %c0_31, %c1_32, %c0_33] : memref<4x9x9x16xf32, #tpu.memory_space<vmem>>, vector<1x8x8x16xf32>
    %40 = vector.shape_cast %39 : vector<1x8x8x16xf32> to vector<8x8x16xf32>
    %c5 = arith.constant 5 : index
    %c0_34 = arith.constant 0 : index
    %c0_35 = arith.constant 0 : index
    %41 = vector.load %arg2[%c5, %c0_34, %c0_35] : memref<9x1x16xf32, #tpu.memory_space<vmem>>, vector<1x1x16xf32>
    %42 = vector.shape_cast %41 : vector<1x1x16xf32> to vector<1x16xf32>
    %43 = vector.shape_cast %42 : vector<1x16xf32> to vector<1x1x16xf32>
    %44 = vector.broadcast %43 : vector<1x1x16xf32> to vector<8x8x16xf32>
    %45 = arith.mulf %40, %44 : vector<8x8x16xf32>
    %46 = arith.addf %38, %45 : vector<8x8x16xf32>
    %c0_36 = arith.constant 0 : index
    %c1_37 = arith.constant 1 : index
    %c0_38 = arith.constant 0 : index
    %c0_39 = arith.constant 0 : index
    %47 = vector.load %arg1[%c0_36, %c1_37, %c0_38, %c0_39] : memref<4x9x9x16xf32, #tpu.memory_space<vmem>>, vector<1x8x8x16xf32>
    %48 = vector.shape_cast %47 : vector<1x8x8x16xf32> to vector<8x8x16xf32>
    %c6 = arith.constant 6 : index
    %c0_40 = arith.constant 0 : index
    %c0_41 = arith.constant 0 : index
    %49 = vector.load %arg2[%c6, %c0_40, %c0_41] : memref<9x1x16xf32, #tpu.memory_space<vmem>>, vector<1x1x16xf32>
    %50 = vector.shape_cast %49 : vector<1x1x16xf32> to vector<1x16xf32>
    %51 = vector.shape_cast %50 : vector<1x16xf32> to vector<1x1x16xf32>
    %52 = vector.broadcast %51 : vector<1x1x16xf32> to vector<8x8x16xf32>
    %53 = arith.mulf %48, %52 : vector<8x8x16xf32>
    %54 = arith.addf %46, %53 : vector<8x8x16xf32>
    %c1_42 = arith.constant 1 : index
    %c1_43 = arith.constant 1 : index
    %c0_44 = arith.constant 0 : index
    %c0_45 = arith.constant 0 : index
    %55 = vector.load %arg1[%c1_42, %c1_43, %c0_44, %c0_45] : memref<4x9x9x16xf32, #tpu.memory_space<vmem>>, vector<1x8x8x16xf32>
    %56 = vector.shape_cast %55 : vector<1x8x8x16xf32> to vector<8x8x16xf32>
    %c7 = arith.constant 7 : index
    %c0_46 = arith.constant 0 : index
    %c0_47 = arith.constant 0 : index
    %57 = vector.load %arg2[%c7, %c0_46, %c0_47] : memref<9x1x16xf32, #tpu.memory_space<vmem>>, vector<1x1x16xf32>
    %58 = vector.shape_cast %57 : vector<1x1x16xf32> to vector<1x16xf32>
    %59 = vector.shape_cast %58 : vector<1x16xf32> to vector<1x1x16xf32>
    %60 = vector.broadcast %59 : vector<1x1x16xf32> to vector<8x8x16xf32>
    %61 = arith.mulf %56, %60 : vector<8x8x16xf32>
    %62 = arith.addf %54, %61 : vector<8x8x16xf32>
    %c0_48 = arith.constant 0 : index
    %c1_49 = arith.constant 1 : index
    %c1_50 = arith.constant 1 : index
    %c0_51 = arith.constant 0 : index
    %63 = vector.load %arg1[%c0_48, %c1_49, %c1_50, %c0_51] : memref<4x9x9x16xf32, #tpu.memory_space<vmem>>, vector<1x8x8x16xf32>
    %64 = vector.shape_cast %63 : vector<1x8x8x16xf32> to vector<8x8x16xf32>
    %c8 = arith.constant 8 : index
    %c0_52 = arith.constant 0 : index
    %c0_53 = arith.constant 0 : index
    %65 = vector.load %arg2[%c8, %c0_52, %c0_53] : memref<9x1x16xf32, #tpu.memory_space<vmem>>, vector<1x1x16xf32>
    %66 = vector.shape_cast %65 : vector<1x1x16xf32> to vector<1x16xf32>
    %67 = vector.shape_cast %66 : vector<1x16xf32> to vector<1x1x16xf32>
    %68 = vector.broadcast %67 : vector<1x1x16xf32> to vector<8x8x16xf32>
    %69 = arith.mulf %64, %68 : vector<8x8x16xf32>
    %70 = arith.addf %62, %69 : vector<8x8x16xf32>
    %c0_54 = arith.constant 0 : index
    %c0_55 = arith.constant 0 : index
    %71 = vector.load %arg3[%c0_54, %c0_55] : memref<1x16xf32, #tpu.memory_space<vmem>>, vector<1x16xf32>
    %72 = vector.shape_cast %71 : vector<1x16xf32> to vector<1x1x16xf32>
    %73 = vector.broadcast %72 : vector<1x1x16xf32> to vector<8x8x16xf32>
    %74 = arith.mulf %70, %73 : vector<8x8x16xf32>
    %c0_56 = arith.constant 0 : index
    %c0_57 = arith.constant 0 : index
    %75 = vector.load %arg4[%c0_56, %c0_57] : memref<1x16xf32, #tpu.memory_space<vmem>>, vector<1x16xf32>
    %76 = vector.shape_cast %75 : vector<1x16xf32> to vector<1x1x16xf32>
    %77 = vector.broadcast %76 : vector<1x1x16xf32> to vector<8x8x16xf32>
    %78 = arith.addf %74, %77 : vector<8x8x16xf32>
    %cst = arith.constant 0.000000e+00 : f32
    %79 = vector.broadcast %cst : f32 to vector<8x8x16xf32>
    %80 = arith.maximumf %78, %79 : vector<8x8x16xf32>
    %cst_58 = arith.constant dense<0.000000e+00> : vector<8x16xf32>
    %81 = vector.multi_reduction <add>, %80, %cst_58 [0] : vector<8x8x16xf32> to vector<8x16xf32>
    %cst_59 = arith.constant dense<0.000000e+00> : vector<16xf32>
    %82 = vector.multi_reduction <add>, %81, %cst_59 [0] : vector<8x16xf32> to vector<16xf32>
    %83 = vector.shape_cast %82 : vector<16xf32> to vector<1x16xf32>
    %cst_60 = arith.constant 1.562500e-02 : f32
    %84 = vector.broadcast %cst_60 : f32 to vector<1x16xf32>
    %85 = arith.mulf %83, %84 : vector<1x16xf32>
    %c0_61 = arith.constant 0 : index
    %c0_62 = arith.constant 0 : index
    %86 = vector.load %arg5[%c0_61, %c0_62] : memref<16x8xf32, #tpu.memory_space<vmem>>, vector<16x8xf32>
    %cst_63 = arith.constant dense<0.000000e+00> : vector<1x8xf32>
    %87 = tpu.matmul %85, %86, %cst_63 {dimension_numbers = #tpu.dot_dimension_numbers<[1], [0], [0], [1], [0, 0, 1, 1], [], []>} : vector<1x16xf32>, vector<16x8xf32>, vector<1x8xf32> -> vector<1x8xf32>
    %c0_64 = arith.constant 0 : index
    %c0_65 = arith.constant 0 : index
    %88 = vector.load %arg6[%c0_64, %c0_65] : memref<1x8xf32, #tpu.memory_space<vmem>>, vector<1x8xf32>
    %89 = arith.addf %87, %88 : vector<1x8xf32>
    %cst_66 = arith.constant 0.000000e+00 : f32
    %90 = vector.broadcast %cst_66 : f32 to vector<1x8xf32>
    %91 = arith.maximumf %89, %90 : vector<1x8xf32>
    %c0_67 = arith.constant 0 : index
    %c0_68 = arith.constant 0 : index
    %92 = vector.load %arg7[%c0_67, %c0_68] : memref<8x16xf32, #tpu.memory_space<vmem>>, vector<8x16xf32>
    %cst_69 = arith.constant dense<0.000000e+00> : vector<1x16xf32>
    %93 = tpu.matmul %91, %92, %cst_69 {dimension_numbers = #tpu.dot_dimension_numbers<[1], [0], [0], [1], [0, 0, 1, 1], [], []>} : vector<1x8xf32>, vector<8x16xf32>, vector<1x16xf32> -> vector<1x16xf32>
    %c0_70 = arith.constant 0 : index
    %c0_71 = arith.constant 0 : index
    %94 = vector.load %arg8[%c0_70, %c0_71] : memref<1x16xf32, #tpu.memory_space<vmem>>, vector<1x16xf32>
    %95 = arith.addf %93, %94 : vector<1x16xf32>
    %96 = arith.negf %95 : vector<1x16xf32>
    %97 = math.exp %96 : vector<1x16xf32>
    %cst_72 = arith.constant 1.000000e+00 : f32
    %98 = vector.broadcast %cst_72 : f32 to vector<1x16xf32>
    %99 = arith.addf %98, %97 : vector<1x16xf32>
    %100 = arith.divf %98, %99 : vector<1x16xf32>
    %101 = vector.shape_cast %100 : vector<1x16xf32> to vector<1x1x16xf32>
    %102 = vector.broadcast %101 : vector<1x1x16xf32> to vector<8x8x16xf32>
    %103 = arith.mulf %80, %102 : vector<8x8x16xf32>
    %c0_73 = arith.constant 0 : index
    %c0_74 = arith.constant 0 : index
    %c0_75 = arith.constant 0 : index
    %c0_76 = arith.constant 0 : index
    %104 = vector.load %arg9[%c0_73, %c0_74, %c0_75, %c0_76] : memref<1x8x8x16xf32, #tpu.memory_space<vmem>>, vector<1x8x8x16xf32>
    %105 = vector.shape_cast %104 : vector<1x8x8x16xf32> to vector<8x8x16xf32>
    %106 = vector.shape_cast %103 : vector<8x8x16xf32> to vector<1x8x8x16xf32>
    tpu.vector_store %arg9[%c0_73, %c0_74, %c0_75, %c0_76], %106 {strides = array<i32>} : memref<1x8x8x16xf32, #tpu.memory_space<vmem>>, vector<1x8x8x16xf32>,
    return
  }
  func.func @transform_0(%arg0: i32) -> (i32, i32, i32, i32) {
    %c0_i32 = arith.constant 0 : i32
    %c0_i32_0 = arith.constant 0 : i32
    %c0_i32_1 = arith.constant 0 : i32
    %c0_i32_2 = arith.constant 0 : i32
    return %arg0, %c0_i32, %c0_i32_0, %c0_i32_1 : i32, i32, i32, i32
  }
  func.func @transform_1(%arg0: i32) -> (i32, i32, i32) {
    %c0_i32 = arith.constant 0 : i32
    %c0_i32_0 = arith.constant 0 : i32
    %c0_i32_1 = arith.constant 0 : i32
    %c0_i32_2 = arith.constant 0 : i32
    return %c0_i32, %c0_i32_0, %c0_i32_1 : i32, i32, i32
  }
  func.func @transform_2(%arg0: i32) -> (i32, i32) {
    %c0_i32 = arith.constant 0 : i32
    %c0_i32_0 = arith.constant 0 : i32
    %c0_i32_1 = arith.constant 0 : i32
    return %c0_i32, %c0_i32_0 : i32, i32
  }
  func.func @transform_3(%arg0: i32) -> (i32, i32) {
    %c0_i32 = arith.constant 0 : i32
    %c0_i32_0 = arith.constant 0 : i32
    %c0_i32_1 = arith.constant 0 : i32
    return %c0_i32, %c0_i32_0 : i32, i32
  }
  func.func @transform_4(%arg0: i32) -> (i32, i32) {
    %c0_i32 = arith.constant 0 : i32
    %c0_i32_0 = arith.constant 0 : i32
    %c0_i32_1 = arith.constant 0 : i32
    return %c0_i32, %c0_i32_0 : i32, i32
  }
  func.func @transform_5(%arg0: i32) -> (i32, i32) {
    %c0_i32 = arith.constant 0 : i32
    %c0_i32_0 = arith.constant 0 : i32
    %c0_i32_1 = arith.constant 0 : i32
    return %c0_i32, %c0_i32_0 : i32, i32
  }
  func.func @transform_6(%arg0: i32) -> (i32, i32) {
    %c0_i32 = arith.constant 0 : i32
    %c0_i32_0 = arith.constant 0 : i32
    %c0_i32_1 = arith.constant 0 : i32
    return %c0_i32, %c0_i32_0 : i32, i32
  }
  func.func @transform_7(%arg0: i32) -> (i32, i32) {
    %c0_i32 = arith.constant 0 : i32
    %c0_i32_0 = arith.constant 0 : i32
    %c0_i32_1 = arith.constant 0 : i32
    return %c0_i32, %c0_i32_0 : i32, i32
  }
  func.func @transform_8(%arg0: i32) -> (i32, i32, i32, i32) {
    %c0_i32 = arith.constant 0 : i32
    %c0_i32_0 = arith.constant 0 : i32
    %c0_i32_1 = arith.constant 0 : i32
    %c0_i32_2 = arith.constant 0 : i32
    return %arg0, %c0_i32, %c0_i32_0, %c0_i32_1 : i32, i32, i32, i32
  }
}

module attributes {stable_mosaic.version = 11 : i64} {
  func.func @_pw_exp_kernel(%arg0: i32, %arg1: memref<128x16xf32, #tpu.memory_space<vmem>>, %arg2: memref<16x16xf32, #tpu.memory_space<vmem>>, %arg3: memref<1x16xf32, #tpu.memory_space<vmem>>, %arg4: memref<1x16xf32, #tpu.memory_space<vmem>>, %arg5: memref<16x64xf32, #tpu.memory_space<vmem>>, %arg6: memref<1x64xf32, #tpu.memory_space<vmem>>, %arg7: memref<1x64xf32, #tpu.memory_space<vmem>>, %arg8: memref<128x16xf32, #tpu.memory_space<vmem>>, %arg9: memref<128x64xf32, #tpu.memory_space<vmem>>) attributes {dimension_semantics = [#tpu.dimension_semantics<parallel>], iteration_bounds = array<i64: 1>, scalar_prefetch = 0 : i64, scratch_operands = 0 : i64, tpu.core_type = #tpu.core_type<tc>, window_params = [{transform_indices = @transform_0, window_bounds = array<i64: 128, 16>}, {pipeline_mode = #tpu.pipeline_mode<synchronous>, transform_indices = @transform_1, window_bounds = array<i64: 16, 16>}, {pipeline_mode = #tpu.pipeline_mode<synchronous>, transform_indices = @transform_2, window_bounds = array<i64: 1, 16>}, {pipeline_mode = #tpu.pipeline_mode<synchronous>, transform_indices = @transform_3, window_bounds = array<i64: 1, 16>}, {pipeline_mode = #tpu.pipeline_mode<synchronous>, transform_indices = @transform_4, window_bounds = array<i64: 16, 64>}, {pipeline_mode = #tpu.pipeline_mode<synchronous>, transform_indices = @transform_5, window_bounds = array<i64: 1, 64>}, {pipeline_mode = #tpu.pipeline_mode<synchronous>, transform_indices = @transform_6, window_bounds = array<i64: 1, 64>}, {transform_indices = @transform_7, window_bounds = array<i64: 128, 16>}, {transform_indices = @transform_8, window_bounds = array<i64: 128, 64>}]} {
    %c0 = arith.constant 0 : index
    %c0_0 = arith.constant 0 : index
    %0 = vector.load %arg1[%c0, %c0_0] : memref<128x16xf32, #tpu.memory_space<vmem>>, vector<128x16xf32>
    %c0_1 = arith.constant 0 : index
    %c0_2 = arith.constant 0 : index
    %1 = vector.load %arg2[%c0_1, %c0_2] : memref<16x16xf32, #tpu.memory_space<vmem>>, vector<16x16xf32>
    %cst = arith.constant dense<0.000000e+00> : vector<128x16xf32>
    %2 = tpu.matmul %0, %1, %cst {dimension_numbers = #tpu.dot_dimension_numbers<[1], [0], [0], [1], [0, 0, 1, 1], [], []>} : vector<128x16xf32>, vector<16x16xf32>, vector<128x16xf32> -> vector<128x16xf32>
    %c0_3 = arith.constant 0 : index
    %c0_4 = arith.constant 0 : index
    %3 = vector.load %arg3[%c0_3, %c0_4] : memref<1x16xf32, #tpu.memory_space<vmem>>, vector<1x16xf32>
    %4 = vector.broadcast %3 : vector<1x16xf32> to vector<128x16xf32>
    %5 = arith.mulf %2, %4 : vector<128x16xf32>
    %c0_5 = arith.constant 0 : index
    %c0_6 = arith.constant 0 : index
    %6 = vector.load %arg4[%c0_5, %c0_6] : memref<1x16xf32, #tpu.memory_space<vmem>>, vector<1x16xf32>
    %7 = vector.broadcast %6 : vector<1x16xf32> to vector<128x16xf32>
    %8 = arith.addf %5, %7 : vector<128x16xf32>
    %c0_7 = arith.constant 0 : index
    %c0_8 = arith.constant 0 : index
    %9 = vector.load %arg8[%c0_7, %c0_8] : memref<128x16xf32, #tpu.memory_space<vmem>>, vector<128x16xf32>
    tpu.vector_store %arg8[%c0_7, %c0_8], %8 {strides = array<i32>} : memref<128x16xf32, #tpu.memory_space<vmem>>, vector<128x16xf32>,
    %c0_9 = arith.constant 0 : index
    %c0_10 = arith.constant 0 : index
    %10 = vector.load %arg5[%c0_9, %c0_10] : memref<16x64xf32, #tpu.memory_space<vmem>>, vector<16x64xf32>
    %cst_11 = arith.constant dense<0.000000e+00> : vector<128x64xf32>
    %11 = tpu.matmul %8, %10, %cst_11 {dimension_numbers = #tpu.dot_dimension_numbers<[1], [0], [0], [1], [0, 0, 1, 1], [], []>} : vector<128x16xf32>, vector<16x64xf32>, vector<128x64xf32> -> vector<128x64xf32>
    %c0_12 = arith.constant 0 : index
    %c0_13 = arith.constant 0 : index
    %12 = vector.load %arg6[%c0_12, %c0_13] : memref<1x64xf32, #tpu.memory_space<vmem>>, vector<1x64xf32>
    %13 = vector.broadcast %12 : vector<1x64xf32> to vector<128x64xf32>
    %14 = arith.mulf %11, %13 : vector<128x64xf32>
    %c0_14 = arith.constant 0 : index
    %c0_15 = arith.constant 0 : index
    %15 = vector.load %arg7[%c0_14, %c0_15] : memref<1x64xf32, #tpu.memory_space<vmem>>, vector<1x64xf32>
    %16 = vector.broadcast %15 : vector<1x64xf32> to vector<128x64xf32>
    %17 = arith.addf %14, %16 : vector<128x64xf32>
    %cst_16 = arith.constant 0.000000e+00 : f32
    %18 = vector.broadcast %cst_16 : f32 to vector<128x64xf32>
    %19 = arith.maximumf %17, %18 : vector<128x64xf32>
    %c0_17 = arith.constant 0 : index
    %c0_18 = arith.constant 0 : index
    %20 = vector.load %arg9[%c0_17, %c0_18] : memref<128x64xf32, #tpu.memory_space<vmem>>, vector<128x64xf32>
    tpu.vector_store %arg9[%c0_17, %c0_18], %19 {strides = array<i32>} : memref<128x64xf32, #tpu.memory_space<vmem>>, vector<128x64xf32>,
    return
  }
  func.func @transform_0(%arg0: i32) -> (i32, i32) {
    %c0_i32 = arith.constant 0 : i32
    %c0_i32_0 = arith.constant 0 : i32
    return %arg0, %c0_i32 : i32, i32
  }
  func.func @transform_1(%arg0: i32) -> (i32, i32) {
    %c0_i32 = arith.constant 0 : i32
    %c0_i32_0 = arith.constant 0 : i32
    %c0_i32_1 = arith.constant 0 : i32
    return %c0_i32, %c0_i32_0 : i32, i32
  }
  func.func @transform_2(%arg0: i32) -> (i32, i32) {
    %c0_i32 = arith.constant 0 : i32
    %c0_i32_0 = arith.constant 0 : i32
    %c0_i32_1 = arith.constant 0 : i32
    return %c0_i32, %c0_i32_0 : i32, i32
  }
  func.func @transform_3(%arg0: i32) -> (i32, i32) {
    %c0_i32 = arith.constant 0 : i32
    %c0_i32_0 = arith.constant 0 : i32
    %c0_i32_1 = arith.constant 0 : i32
    return %c0_i32, %c0_i32_0 : i32, i32
  }
  func.func @transform_4(%arg0: i32) -> (i32, i32) {
    %c0_i32 = arith.constant 0 : i32
    %c0_i32_0 = arith.constant 0 : i32
    %c0_i32_1 = arith.constant 0 : i32
    return %c0_i32, %c0_i32_0 : i32, i32
  }
  func.func @transform_5(%arg0: i32) -> (i32, i32) {
    %c0_i32 = arith.constant 0 : i32
    %c0_i32_0 = arith.constant 0 : i32
    %c0_i32_1 = arith.constant 0 : i32
    return %c0_i32, %c0_i32_0 : i32, i32
  }
  func.func @transform_6(%arg0: i32) -> (i32, i32) {
    %c0_i32 = arith.constant 0 : i32
    %c0_i32_0 = arith.constant 0 : i32
    %c0_i32_1 = arith.constant 0 : i32
    return %c0_i32, %c0_i32_0 : i32, i32
  }
  func.func @transform_7(%arg0: i32) -> (i32, i32) {
    %c0_i32 = arith.constant 0 : i32
    %c0_i32_0 = arith.constant 0 : i32
    return %arg0, %c0_i32 : i32, i32
  }
  func.func @transform_8(%arg0: i32) -> (i32, i32) {
    %c0_i32 = arith.constant 0 : i32
    %c0_i32_0 = arith.constant 0 : i32
    return %arg0, %c0_i32 : i32, i32
  }
}

module attributes {stable_mosaic.version = 11 : i64} {
  func.func @_dw_bn_act_se_kernel(%arg0: i32, %arg1: memref<4x5x5x64xf32, #tpu.memory_space<vmem>>, %arg2: memref<9x1x64xf32, #tpu.memory_space<vmem>>, %arg3: memref<1x64xf32, #tpu.memory_space<vmem>>, %arg4: memref<1x64xf32, #tpu.memory_space<vmem>>, %arg5: memref<1x4x4x64xf32, #tpu.memory_space<vmem>>) attributes {dimension_semantics = [#tpu.dimension_semantics<parallel>], iteration_bounds = array<i64: 2>, scalar_prefetch = 0 : i64, scratch_operands = 0 : i64, tpu.core_type = #tpu.core_type<tc>, window_params = [{transform_indices = @transform_0, window_bounds = array<i64: 4, 5, 5, 64>}, {pipeline_mode = #tpu.pipeline_mode<synchronous>, transform_indices = @transform_1, window_bounds = array<i64: 9, 1, 64>}, {pipeline_mode = #tpu.pipeline_mode<synchronous>, transform_indices = @transform_2, window_bounds = array<i64: 1, 64>}, {pipeline_mode = #tpu.pipeline_mode<synchronous>, transform_indices = @transform_3, window_bounds = array<i64: 1, 64>}, {transform_indices = @transform_4, window_bounds = array<i64: 1, 4, 4, 64>}]} {
    %c0 = arith.constant 0 : index
    %c0_0 = arith.constant 0 : index
    %c0_1 = arith.constant 0 : index
    %c0_2 = arith.constant 0 : index
    %0 = vector.load %arg1[%c0, %c0_0, %c0_1, %c0_2] : memref<4x5x5x64xf32, #tpu.memory_space<vmem>>, vector<1x4x4x64xf32>
    %1 = vector.shape_cast %0 : vector<1x4x4x64xf32> to vector<4x4x64xf32>
    %c0_3 = arith.constant 0 : index
    %c0_4 = arith.constant 0 : index
    %c0_5 = arith.constant 0 : index
    %2 = vector.load %arg2[%c0_3, %c0_4, %c0_5] : memref<9x1x64xf32, #tpu.memory_space<vmem>>, vector<1x1x64xf32>
    %3 = vector.shape_cast %2 : vector<1x1x64xf32> to vector<1x64xf32>
    %4 = vector.shape_cast %3 : vector<1x64xf32> to vector<1x1x64xf32>
    %5 = vector.broadcast %4 : vector<1x1x64xf32> to vector<4x4x64xf32>
    %6 = arith.mulf %1, %5 : vector<4x4x64xf32>
    %c1 = arith.constant 1 : index
    %c0_6 = arith.constant 0 : index
    %c0_7 = arith.constant 0 : index
    %c0_8 = arith.constant 0 : index
    %7 = vector.load %arg1[%c1, %c0_6, %c0_7, %c0_8] : memref<4x5x5x64xf32, #tpu.memory_space<vmem>>, vector<1x4x4x64xf32>
    %8 = vector.shape_cast %7 : vector<1x4x4x64xf32> to vector<4x4x64xf32>
    %c1_9 = arith.constant 1 : index
    %c0_10 = arith.constant 0 : index
    %c0_11 = arith.constant 0 : index
    %9 = vector.load %arg2[%c1_9, %c0_10, %c0_11] : memref<9x1x64xf32, #tpu.memory_space<vmem>>, vector<1x1x64xf32>
    %10 = vector.shape_cast %9 : vector<1x1x64xf32> to vector<1x64xf32>
    %11 = vector.shape_cast %10 : vector<1x64xf32> to vector<1x1x64xf32>
    %12 = vector.broadcast %11 : vector<1x1x64xf32> to vector<4x4x64xf32>
    %13 = arith.mulf %8, %12 : vector<4x4x64xf32>
    %14 = arith.addf %6, %13 : vector<4x4x64xf32>
    %c0_12 = arith.constant 0 : index
    %c0_13 = arith.constant 0 : index
    %c1_14 = arith.constant 1 : index
    %c0_15 = arith.constant 0 : index
    %15 = vector.load %arg1[%c0_12, %c0_13, %c1_14, %c0_15] : memref<4x5x5x64xf32, #tpu.memory_space<vmem>>, vector<1x4x4x64xf32>
    %16 = vector.shape_cast %15 : vector<1x4x4x64xf32> to vector<4x4x64xf32>
    %c2 = arith.constant 2 : index
    %c0_16 = arith.constant 0 : index
    %c0_17 = arith.constant 0 : index
    %17 = vector.load %arg2[%c2, %c0_16, %c0_17] : memref<9x1x64xf32, #tpu.memory_space<vmem>>, vector<1x1x64xf32>
    %18 = vector.shape_cast %17 : vector<1x1x64xf32> to vector<1x64xf32>
    %19 = vector.shape_cast %18 : vector<1x64xf32> to vector<1x1x64xf32>
    %20 = vector.broadcast %19 : vector<1x1x64xf32> to vector<4x4x64xf32>
    %21 = arith.mulf %16, %20 : vector<4x4x64xf32>
    %22 = arith.addf %14, %21 : vector<4x4x64xf32>
    %c2_18 = arith.constant 2 : index
    %c0_19 = arith.constant 0 : index
    %c0_20 = arith.constant 0 : index
    %c0_21 = arith.constant 0 : index
    %23 = vector.load %arg1[%c2_18, %c0_19, %c0_20, %c0_21] : memref<4x5x5x64xf32, #tpu.memory_space<vmem>>, vector<1x4x4x64xf32>
    %24 = vector.shape_cast %23 : vector<1x4x4x64xf32> to vector<4x4x64xf32>
    %c3 = arith.constant 3 : index
    %c0_22 = arith.constant 0 : index
    %c0_23 = arith.constant 0 : index
    %25 = vector.load %arg2[%c3, %c0_22, %c0_23] : memref<9x1x64xf32, #tpu.memory_space<vmem>>, vector<1x1x64xf32>
    %26 = vector.shape_cast %25 : vector<1x1x64xf32> to vector<1x64xf32>
    %27 = vector.shape_cast %26 : vector<1x64xf32> to vector<1x1x64xf32>
    %28 = vector.broadcast %27 : vector<1x1x64xf32> to vector<4x4x64xf32>
    %29 = arith.mulf %24, %28 : vector<4x4x64xf32>
    %30 = arith.addf %22, %29 : vector<4x4x64xf32>
    %c3_24 = arith.constant 3 : index
    %c0_25 = arith.constant 0 : index
    %c0_26 = arith.constant 0 : index
    %c0_27 = arith.constant 0 : index
    %31 = vector.load %arg1[%c3_24, %c0_25, %c0_26, %c0_27] : memref<4x5x5x64xf32, #tpu.memory_space<vmem>>, vector<1x4x4x64xf32>
    %32 = vector.shape_cast %31 : vector<1x4x4x64xf32> to vector<4x4x64xf32>
    %c4 = arith.constant 4 : index
    %c0_28 = arith.constant 0 : index
    %c0_29 = arith.constant 0 : index
    %33 = vector.load %arg2[%c4, %c0_28, %c0_29] : memref<9x1x64xf32, #tpu.memory_space<vmem>>, vector<1x1x64xf32>
    %34 = vector.shape_cast %33 : vector<1x1x64xf32> to vector<1x64xf32>
    %35 = vector.shape_cast %34 : vector<1x64xf32> to vector<1x1x64xf32>
    %36 = vector.broadcast %35 : vector<1x1x64xf32> to vector<4x4x64xf32>
    %37 = arith.mulf %32, %36 : vector<4x4x64xf32>
    %38 = arith.addf %30, %37 : vector<4x4x64xf32>
    %c2_30 = arith.constant 2 : index
    %c0_31 = arith.constant 0 : index
    %c1_32 = arith.constant 1 : index
    %c0_33 = arith.constant 0 : index
    %39 = vector.load %arg1[%c2_30, %c0_31, %c1_32, %c0_33] : memref<4x5x5x64xf32, #tpu.memory_space<vmem>>, vector<1x4x4x64xf32>
    %40 = vector.shape_cast %39 : vector<1x4x4x64xf32> to vector<4x4x64xf32>
    %c5 = arith.constant 5 : index
    %c0_34 = arith.constant 0 : index
    %c0_35 = arith.constant 0 : index
    %41 = vector.load %arg2[%c5, %c0_34, %c0_35] : memref<9x1x64xf32, #tpu.memory_space<vmem>>, vector<1x1x64xf32>
    %42 = vector.shape_cast %41 : vector<1x1x64xf32> to vector<1x64xf32>
    %43 = vector.shape_cast %42 : vector<1x64xf32> to vector<1x1x64xf32>
    %44 = vector.broadcast %43 : vector<1x1x64xf32> to vector<4x4x64xf32>
    %45 = arith.mulf %40, %44 : vector<4x4x64xf32>
    %46 = arith.addf %38, %45 : vector<4x4x64xf32>
    %c0_36 = arith.constant 0 : index
    %c1_37 = arith.constant 1 : index
    %c0_38 = arith.constant 0 : index
    %c0_39 = arith.constant 0 : index
    %47 = vector.load %arg1[%c0_36, %c1_37, %c0_38, %c0_39] : memref<4x5x5x64xf32, #tpu.memory_space<vmem>>, vector<1x4x4x64xf32>
    %48 = vector.shape_cast %47 : vector<1x4x4x64xf32> to vector<4x4x64xf32>
    %c6 = arith.constant 6 : index
    %c0_40 = arith.constant 0 : index
    %c0_41 = arith.constant 0 : index
    %49 = vector.load %arg2[%c6, %c0_40, %c0_41] : memref<9x1x64xf32, #tpu.memory_space<vmem>>, vector<1x1x64xf32>
    %50 = vector.shape_cast %49 : vector<1x1x64xf32> to vector<1x64xf32>
    %51 = vector.shape_cast %50 : vector<1x64xf32> to vector<1x1x64xf32>
    %52 = vector.broadcast %51 : vector<1x1x64xf32> to vector<4x4x64xf32>
    %53 = arith.mulf %48, %52 : vector<4x4x64xf32>
    %54 = arith.addf %46, %53 : vector<4x4x64xf32>
    %c1_42 = arith.constant 1 : index
    %c1_43 = arith.constant 1 : index
    %c0_44 = arith.constant 0 : index
    %c0_45 = arith.constant 0 : index
    %55 = vector.load %arg1[%c1_42, %c1_43, %c0_44, %c0_45] : memref<4x5x5x64xf32, #tpu.memory_space<vmem>>, vector<1x4x4x64xf32>
    %56 = vector.shape_cast %55 : vector<1x4x4x64xf32> to vector<4x4x64xf32>
    %c7 = arith.constant 7 : index
    %c0_46 = arith.constant 0 : index
    %c0_47 = arith.constant 0 : index
    %57 = vector.load %arg2[%c7, %c0_46, %c0_47] : memref<9x1x64xf32, #tpu.memory_space<vmem>>, vector<1x1x64xf32>
    %58 = vector.shape_cast %57 : vector<1x1x64xf32> to vector<1x64xf32>
    %59 = vector.shape_cast %58 : vector<1x64xf32> to vector<1x1x64xf32>
    %60 = vector.broadcast %59 : vector<1x1x64xf32> to vector<4x4x64xf32>
    %61 = arith.mulf %56, %60 : vector<4x4x64xf32>
    %62 = arith.addf %54, %61 : vector<4x4x64xf32>
    %c0_48 = arith.constant 0 : index
    %c1_49 = arith.constant 1 : index
    %c1_50 = arith.constant 1 : index
    %c0_51 = arith.constant 0 : index
    %63 = vector.load %arg1[%c0_48, %c1_49, %c1_50, %c0_51] : memref<4x5x5x64xf32, #tpu.memory_space<vmem>>, vector<1x4x4x64xf32>
    %64 = vector.shape_cast %63 : vector<1x4x4x64xf32> to vector<4x4x64xf32>
    %c8 = arith.constant 8 : index
    %c0_52 = arith.constant 0 : index
    %c0_53 = arith.constant 0 : index
    %65 = vector.load %arg2[%c8, %c0_52, %c0_53] : memref<9x1x64xf32, #tpu.memory_space<vmem>>, vector<1x1x64xf32>
    %66 = vector.shape_cast %65 : vector<1x1x64xf32> to vector<1x64xf32>
    %67 = vector.shape_cast %66 : vector<1x64xf32> to vector<1x1x64xf32>
    %68 = vector.broadcast %67 : vector<1x1x64xf32> to vector<4x4x64xf32>
    %69 = arith.mulf %64, %68 : vector<4x4x64xf32>
    %70 = arith.addf %62, %69 : vector<4x4x64xf32>
    %c0_54 = arith.constant 0 : index
    %c0_55 = arith.constant 0 : index
    %71 = vector.load %arg3[%c0_54, %c0_55] : memref<1x64xf32, #tpu.memory_space<vmem>>, vector<1x64xf32>
    %72 = vector.shape_cast %71 : vector<1x64xf32> to vector<1x1x64xf32>
    %73 = vector.broadcast %72 : vector<1x1x64xf32> to vector<4x4x64xf32>
    %74 = arith.mulf %70, %73 : vector<4x4x64xf32>
    %c0_56 = arith.constant 0 : index
    %c0_57 = arith.constant 0 : index
    %75 = vector.load %arg4[%c0_56, %c0_57] : memref<1x64xf32, #tpu.memory_space<vmem>>, vector<1x64xf32>
    %76 = vector.shape_cast %75 : vector<1x64xf32> to vector<1x1x64xf32>
    %77 = vector.broadcast %76 : vector<1x1x64xf32> to vector<4x4x64xf32>
    %78 = arith.addf %74, %77 : vector<4x4x64xf32>
    %cst = arith.constant 0.000000e+00 : f32
    %79 = vector.broadcast %cst : f32 to vector<4x4x64xf32>
    %80 = arith.maximumf %78, %79 : vector<4x4x64xf32>
    %c0_58 = arith.constant 0 : index
    %c0_59 = arith.constant 0 : index
    %c0_60 = arith.constant 0 : index
    %c0_61 = arith.constant 0 : index
    %81 = vector.load %arg5[%c0_58, %c0_59, %c0_60, %c0_61] : memref<1x4x4x64xf32, #tpu.memory_space<vmem>>, vector<1x4x4x64xf32>
    %82 = vector.shape_cast %81 : vector<1x4x4x64xf32> to vector<4x4x64xf32>
    %83 = vector.shape_cast %80 : vector<4x4x64xf32> to vector<1x4x4x64xf32>
    tpu.vector_store %arg5[%c0_58, %c0_59, %c0_60, %c0_61], %83 {strides = array<i32>} : memref<1x4x4x64xf32, #tpu.memory_space<vmem>>, vector<1x4x4x64xf32>,
    return
  }
  func.func @transform_0(%arg0: i32) -> (i32, i32, i32, i32) {
    %c0_i32 = arith.constant 0 : i32
    %c0_i32_0 = arith.constant 0 : i32
    %c0_i32_1 = arith.constant 0 : i32
    %c0_i32_2 = arith.constant 0 : i32
    return %arg0, %c0_i32, %c0_i32_0, %c0_i32_1 : i32, i32, i32, i32
  }
  func.func @transform_1(%arg0: i32) -> (i32, i32, i32) {
    %c0_i32 = arith.constant 0 : i32
    %c0_i32_0 = arith.constant 0 : i32
    %c0_i32_1 = arith.constant 0 : i32
    %c0_i32_2 = arith.constant 0 : i32
    return %c0_i32, %c0_i32_0, %c0_i32_1 : i32, i32, i32
  }
  func.func @transform_2(%arg0: i32) -> (i32, i32) {
    %c0_i32 = arith.constant 0 : i32
    %c0_i32_0 = arith.constant 0 : i32
    %c0_i32_1 = arith.constant 0 : i32
    return %c0_i32, %c0_i32_0 : i32, i32
  }
  func.func @transform_3(%arg0: i32) -> (i32, i32) {
    %c0_i32 = arith.constant 0 : i32
    %c0_i32_0 = arith.constant 0 : i32
    %c0_i32_1 = arith.constant 0 : i32
    return %c0_i32, %c0_i32_0 : i32, i32
  }
  func.func @transform_4(%arg0: i32) -> (i32, i32, i32, i32) {
    %c0_i32 = arith.constant 0 : i32
    %c0_i32_0 = arith.constant 0 : i32
    %c0_i32_1 = arith.constant 0 : i32
    %c0_i32_2 = arith.constant 0 : i32
    return %arg0, %c0_i32, %c0_i32_0, %c0_i32_1 : i32, i32, i32, i32
  }
}

module attributes {stable_mosaic.version = 11 : i64} {
  func.func @_pw_exp_kernel(%arg0: i32, %arg1: memref<32x64xf32, #tpu.memory_space<vmem>>, %arg2: memref<64x24xf32, #tpu.memory_space<vmem>>, %arg3: memref<1x24xf32, #tpu.memory_space<vmem>>, %arg4: memref<1x24xf32, #tpu.memory_space<vmem>>, %arg5: memref<24x72xf32, #tpu.memory_space<vmem>>, %arg6: memref<1x72xf32, #tpu.memory_space<vmem>>, %arg7: memref<1x72xf32, #tpu.memory_space<vmem>>, %arg8: memref<32x24xf32, #tpu.memory_space<vmem>>, %arg9: memref<32x72xf32, #tpu.memory_space<vmem>>) attributes {dimension_semantics = [#tpu.dimension_semantics<parallel>], iteration_bounds = array<i64: 1>, scalar_prefetch = 0 : i64, scratch_operands = 0 : i64, tpu.core_type = #tpu.core_type<tc>, window_params = [{transform_indices = @transform_0, window_bounds = array<i64: 32, 64>}, {pipeline_mode = #tpu.pipeline_mode<synchronous>, transform_indices = @transform_1, window_bounds = array<i64: 64, 24>}, {pipeline_mode = #tpu.pipeline_mode<synchronous>, transform_indices = @transform_2, window_bounds = array<i64: 1, 24>}, {pipeline_mode = #tpu.pipeline_mode<synchronous>, transform_indices = @transform_3, window_bounds = array<i64: 1, 24>}, {pipeline_mode = #tpu.pipeline_mode<synchronous>, transform_indices = @transform_4, window_bounds = array<i64: 24, 72>}, {pipeline_mode = #tpu.pipeline_mode<synchronous>, transform_indices = @transform_5, window_bounds = array<i64: 1, 72>}, {pipeline_mode = #tpu.pipeline_mode<synchronous>, transform_indices = @transform_6, window_bounds = array<i64: 1, 72>}, {transform_indices = @transform_7, window_bounds = array<i64: 32, 24>}, {transform_indices = @transform_8, window_bounds = array<i64: 32, 72>}]} {
    %c0 = arith.constant 0 : index
    %c0_0 = arith.constant 0 : index
    %0 = vector.load %arg1[%c0, %c0_0] : memref<32x64xf32, #tpu.memory_space<vmem>>, vector<32x64xf32>
    %c0_1 = arith.constant 0 : index
    %c0_2 = arith.constant 0 : index
    %1 = vector.load %arg2[%c0_1, %c0_2] : memref<64x24xf32, #tpu.memory_space<vmem>>, vector<64x24xf32>
    %cst = arith.constant dense<0.000000e+00> : vector<32x24xf32>
    %2 = tpu.matmul %0, %1, %cst {dimension_numbers = #tpu.dot_dimension_numbers<[1], [0], [0], [1], [0, 0, 1, 1], [], []>} : vector<32x64xf32>, vector<64x24xf32>, vector<32x24xf32> -> vector<32x24xf32>
    %c0_3 = arith.constant 0 : index
    %c0_4 = arith.constant 0 : index
    %3 = vector.load %arg3[%c0_3, %c0_4] : memref<1x24xf32, #tpu.memory_space<vmem>>, vector<1x24xf32>
    %4 = vector.broadcast %3 : vector<1x24xf32> to vector<32x24xf32>
    %5 = arith.mulf %2, %4 : vector<32x24xf32>
    %c0_5 = arith.constant 0 : index
    %c0_6 = arith.constant 0 : index
    %6 = vector.load %arg4[%c0_5, %c0_6] : memref<1x24xf32, #tpu.memory_space<vmem>>, vector<1x24xf32>
    %7 = vector.broadcast %6 : vector<1x24xf32> to vector<32x24xf32>
    %8 = arith.addf %5, %7 : vector<32x24xf32>
    %c0_7 = arith.constant 0 : index
    %c0_8 = arith.constant 0 : index
    %9 = vector.load %arg8[%c0_7, %c0_8] : memref<32x24xf32, #tpu.memory_space<vmem>>, vector<32x24xf32>
    tpu.vector_store %arg8[%c0_7, %c0_8], %8 {strides = array<i32>} : memref<32x24xf32, #tpu.memory_space<vmem>>, vector<32x24xf32>,
    %c0_9 = arith.constant 0 : index
    %c0_10 = arith.constant 0 : index
    %10 = vector.load %arg5[%c0_9, %c0_10] : memref<24x72xf32, #tpu.memory_space<vmem>>, vector<24x72xf32>
    %cst_11 = arith.constant dense<0.000000e+00> : vector<32x72xf32>
    %11 = tpu.matmul %8, %10, %cst_11 {dimension_numbers = #tpu.dot_dimension_numbers<[1], [0], [0], [1], [0, 0, 1, 1], [], []>} : vector<32x24xf32>, vector<24x72xf32>, vector<32x72xf32> -> vector<32x72xf32>
    %c0_12 = arith.constant 0 : index
    %c0_13 = arith.constant 0 : index
    %12 = vector.load %arg6[%c0_12, %c0_13] : memref<1x72xf32, #tpu.memory_space<vmem>>, vector<1x72xf32>
    %13 = vector.broadcast %12 : vector<1x72xf32> to vector<32x72xf32>
    %14 = arith.mulf %11, %13 : vector<32x72xf32>
    %c0_14 = arith.constant 0 : index
    %c0_15 = arith.constant 0 : index
    %15 = vector.load %arg7[%c0_14, %c0_15] : memref<1x72xf32, #tpu.memory_space<vmem>>, vector<1x72xf32>
    %16 = vector.broadcast %15 : vector<1x72xf32> to vector<32x72xf32>
    %17 = arith.addf %14, %16 : vector<32x72xf32>
    %cst_16 = arith.constant 0.000000e+00 : f32
    %18 = vector.broadcast %cst_16 : f32 to vector<32x72xf32>
    %19 = arith.maximumf %17, %18 : vector<32x72xf32>
    %c0_17 = arith.constant 0 : index
    %c0_18 = arith.constant 0 : index
    %20 = vector.load %arg9[%c0_17, %c0_18] : memref<32x72xf32, #tpu.memory_space<vmem>>, vector<32x72xf32>
    tpu.vector_store %arg9[%c0_17, %c0_18], %19 {strides = array<i32>} : memref<32x72xf32, #tpu.memory_space<vmem>>, vector<32x72xf32>,
    return
  }
  func.func @transform_0(%arg0: i32) -> (i32, i32) {
    %c0_i32 = arith.constant 0 : i32
    %c0_i32_0 = arith.constant 0 : i32
    return %arg0, %c0_i32 : i32, i32
  }
  func.func @transform_1(%arg0: i32) -> (i32, i32) {
    %c0_i32 = arith.constant 0 : i32
    %c0_i32_0 = arith.constant 0 : i32
    %c0_i32_1 = arith.constant 0 : i32
    return %c0_i32, %c0_i32_0 : i32, i32
  }
  func.func @transform_2(%arg0: i32) -> (i32, i32) {
    %c0_i32 = arith.constant 0 : i32
    %c0_i32_0 = arith.constant 0 : i32
    %c0_i32_1 = arith.constant 0 : i32
    return %c0_i32, %c0_i32_0 : i32, i32
  }
  func.func @transform_3(%arg0: i32) -> (i32, i32) {
    %c0_i32 = arith.constant 0 : i32
    %c0_i32_0 = arith.constant 0 : i32
    %c0_i32_1 = arith.constant 0 : i32
    return %c0_i32, %c0_i32_0 : i32, i32
  }
  func.func @transform_4(%arg0: i32) -> (i32, i32) {
    %c0_i32 = arith.constant 0 : i32
    %c0_i32_0 = arith.constant 0 : i32
    %c0_i32_1 = arith.constant 0 : i32
    return %c0_i32, %c0_i32_0 : i32, i32
  }
  func.func @transform_5(%arg0: i32) -> (i32, i32) {
    %c0_i32 = arith.constant 0 : i32
    %c0_i32_0 = arith.constant 0 : i32
    %c0_i32_1 = arith.constant 0 : i32
    return %c0_i32, %c0_i32_0 : i32, i32
  }
  func.func @transform_6(%arg0: i32) -> (i32, i32) {
    %c0_i32 = arith.constant 0 : i32
    %c0_i32_0 = arith.constant 0 : i32
    %c0_i32_1 = arith.constant 0 : i32
    return %c0_i32, %c0_i32_0 : i32, i32
  }
  func.func @transform_7(%arg0: i32) -> (i32, i32) {
    %c0_i32 = arith.constant 0 : i32
    %c0_i32_0 = arith.constant 0 : i32
    return %arg0, %c0_i32 : i32, i32
  }
  func.func @transform_8(%arg0: i32) -> (i32, i32) {
    %c0_i32 = arith.constant 0 : i32
    %c0_i32_0 = arith.constant 0 : i32
    return %arg0, %c0_i32 : i32, i32
  }
}

module attributes {stable_mosaic.version = 11 : i64} {
  func.func @_dw_bn_act_se_kernel(%arg0: i32, %arg1: memref<4x3x3x72xf32, #tpu.memory_space<vmem>>, %arg2: memref<9x1x72xf32, #tpu.memory_space<vmem>>, %arg3: memref<1x72xf32, #tpu.memory_space<vmem>>, %arg4: memref<1x72xf32, #tpu.memory_space<vmem>>, %arg5: memref<72x16xf32, #tpu.memory_space<vmem>>, %arg6: memref<1x16xf32, #tpu.memory_space<vmem>>, %arg7: memref<16x72xf32, #tpu.memory_space<vmem>>, %arg8: memref<1x72xf32, #tpu.memory_space<vmem>>, %arg9: memref<1x2x2x72xf32, #tpu.memory_space<vmem>>) attributes {dimension_semantics = [#tpu.dimension_semantics<parallel>], iteration_bounds = array<i64: 2>, scalar_prefetch = 0 : i64, scratch_operands = 0 : i64, tpu.core_type = #tpu.core_type<tc>, window_params = [{transform_indices = @transform_0, window_bounds = array<i64: 4, 3, 3, 72>}, {pipeline_mode = #tpu.pipeline_mode<synchronous>, transform_indices = @transform_1, window_bounds = array<i64: 9, 1, 72>}, {pipeline_mode = #tpu.pipeline_mode<synchronous>, transform_indices = @transform_2, window_bounds = array<i64: 1, 72>}, {pipeline_mode = #tpu.pipeline_mode<synchronous>, transform_indices = @transform_3, window_bounds = array<i64: 1, 72>}, {pipeline_mode = #tpu.pipeline_mode<synchronous>, transform_indices = @transform_4, window_bounds = array<i64: 72, 16>}, {pipeline_mode = #tpu.pipeline_mode<synchronous>, transform_indices = @transform_5, window_bounds = array<i64: 1, 16>}, {pipeline_mode = #tpu.pipeline_mode<synchronous>, transform_indices = @transform_6, window_bounds = array<i64: 16, 72>}, {pipeline_mode = #tpu.pipeline_mode<synchronous>, transform_indices = @transform_7, window_bounds = array<i64: 1, 72>}, {transform_indices = @transform_8, window_bounds = array<i64: 1, 2, 2, 72>}]} {
    %c0 = arith.constant 0 : index
    %c0_0 = arith.constant 0 : index
    %c0_1 = arith.constant 0 : index
    %c0_2 = arith.constant 0 : index
    %0 = vector.load %arg1[%c0, %c0_0, %c0_1, %c0_2] : memref<4x3x3x72xf32, #tpu.memory_space<vmem>>, vector<1x2x2x72xf32>
    %1 = vector.shape_cast %0 : vector<1x2x2x72xf32> to vector<2x2x72xf32>
    %c0_3 = arith.constant 0 : index
    %c0_4 = arith.constant 0 : index
    %c0_5 = arith.constant 0 : index
    %2 = vector.load %arg2[%c0_3, %c0_4, %c0_5] : memref<9x1x72xf32, #tpu.memory_space<vmem>>, vector<1x1x72xf32>
    %3 = vector.shape_cast %2 : vector<1x1x72xf32> to vector<1x72xf32>
    %4 = vector.shape_cast %3 : vector<1x72xf32> to vector<1x1x72xf32>
    %5 = vector.broadcast %4 : vector<1x1x72xf32> to vector<2x2x72xf32>
    %6 = arith.mulf %1, %5 : vector<2x2x72xf32>
    %c1 = arith.constant 1 : index
    %c0_6 = arith.constant 0 : index
    %c0_7 = arith.constant 0 : index
    %c0_8 = arith.constant 0 : index
    %7 = vector.load %arg1[%c1, %c0_6, %c0_7, %c0_8] : memref<4x3x3x72xf32, #tpu.memory_space<vmem>>, vector<1x2x2x72xf32>
    %8 = vector.shape_cast %7 : vector<1x2x2x72xf32> to vector<2x2x72xf32>
    %c1_9 = arith.constant 1 : index
    %c0_10 = arith.constant 0 : index
    %c0_11 = arith.constant 0 : index
    %9 = vector.load %arg2[%c1_9, %c0_10, %c0_11] : memref<9x1x72xf32, #tpu.memory_space<vmem>>, vector<1x1x72xf32>
    %10 = vector.shape_cast %9 : vector<1x1x72xf32> to vector<1x72xf32>
    %11 = vector.shape_cast %10 : vector<1x72xf32> to vector<1x1x72xf32>
    %12 = vector.broadcast %11 : vector<1x1x72xf32> to vector<2x2x72xf32>
    %13 = arith.mulf %8, %12 : vector<2x2x72xf32>
    %14 = arith.addf %6, %13 : vector<2x2x72xf32>
    %c0_12 = arith.constant 0 : index
    %c0_13 = arith.constant 0 : index
    %c1_14 = arith.constant 1 : index
    %c0_15 = arith.constant 0 : index
    %15 = vector.load %arg1[%c0_12, %c0_13, %c1_14, %c0_15] : memref<4x3x3x72xf32, #tpu.memory_space<vmem>>, vector<1x2x2x72xf32>
    %16 = vector.shape_cast %15 : vector<1x2x2x72xf32> to vector<2x2x72xf32>
    %c2 = arith.constant 2 : index
    %c0_16 = arith.constant 0 : index
    %c0_17 = arith.constant 0 : index
    %17 = vector.load %arg2[%c2, %c0_16, %c0_17] : memref<9x1x72xf32, #tpu.memory_space<vmem>>, vector<1x1x72xf32>
    %18 = vector.shape_cast %17 : vector<1x1x72xf32> to vector<1x72xf32>
    %19 = vector.shape_cast %18 : vector<1x72xf32> to vector<1x1x72xf32>
    %20 = vector.broadcast %19 : vector<1x1x72xf32> to vector<2x2x72xf32>
    %21 = arith.mulf %16, %20 : vector<2x2x72xf32>
    %22 = arith.addf %14, %21 : vector<2x2x72xf32>
    %c2_18 = arith.constant 2 : index
    %c0_19 = arith.constant 0 : index
    %c0_20 = arith.constant 0 : index
    %c0_21 = arith.constant 0 : index
    %23 = vector.load %arg1[%c2_18, %c0_19, %c0_20, %c0_21] : memref<4x3x3x72xf32, #tpu.memory_space<vmem>>, vector<1x2x2x72xf32>
    %24 = vector.shape_cast %23 : vector<1x2x2x72xf32> to vector<2x2x72xf32>
    %c3 = arith.constant 3 : index
    %c0_22 = arith.constant 0 : index
    %c0_23 = arith.constant 0 : index
    %25 = vector.load %arg2[%c3, %c0_22, %c0_23] : memref<9x1x72xf32, #tpu.memory_space<vmem>>, vector<1x1x72xf32>
    %26 = vector.shape_cast %25 : vector<1x1x72xf32> to vector<1x72xf32>
    %27 = vector.shape_cast %26 : vector<1x72xf32> to vector<1x1x72xf32>
    %28 = vector.broadcast %27 : vector<1x1x72xf32> to vector<2x2x72xf32>
    %29 = arith.mulf %24, %28 : vector<2x2x72xf32>
    %30 = arith.addf %22, %29 : vector<2x2x72xf32>
    %c3_24 = arith.constant 3 : index
    %c0_25 = arith.constant 0 : index
    %c0_26 = arith.constant 0 : index
    %c0_27 = arith.constant 0 : index
    %31 = vector.load %arg1[%c3_24, %c0_25, %c0_26, %c0_27] : memref<4x3x3x72xf32, #tpu.memory_space<vmem>>, vector<1x2x2x72xf32>
    %32 = vector.shape_cast %31 : vector<1x2x2x72xf32> to vector<2x2x72xf32>
    %c4 = arith.constant 4 : index
    %c0_28 = arith.constant 0 : index
    %c0_29 = arith.constant 0 : index
    %33 = vector.load %arg2[%c4, %c0_28, %c0_29] : memref<9x1x72xf32, #tpu.memory_space<vmem>>, vector<1x1x72xf32>
    %34 = vector.shape_cast %33 : vector<1x1x72xf32> to vector<1x72xf32>
    %35 = vector.shape_cast %34 : vector<1x72xf32> to vector<1x1x72xf32>
    %36 = vector.broadcast %35 : vector<1x1x72xf32> to vector<2x2x72xf32>
    %37 = arith.mulf %32, %36 : vector<2x2x72xf32>
    %38 = arith.addf %30, %37 : vector<2x2x72xf32>
    %c2_30 = arith.constant 2 : index
    %c0_31 = arith.constant 0 : index
    %c1_32 = arith.constant 1 : index
    %c0_33 = arith.constant 0 : index
    %39 = vector.load %arg1[%c2_30, %c0_31, %c1_32, %c0_33] : memref<4x3x3x72xf32, #tpu.memory_space<vmem>>, vector<1x2x2x72xf32>
    %40 = vector.shape_cast %39 : vector<1x2x2x72xf32> to vector<2x2x72xf32>
    %c5 = arith.constant 5 : index
    %c0_34 = arith.constant 0 : index
    %c0_35 = arith.constant 0 : index
    %41 = vector.load %arg2[%c5, %c0_34, %c0_35] : memref<9x1x72xf32, #tpu.memory_space<vmem>>, vector<1x1x72xf32>
    %42 = vector.shape_cast %41 : vector<1x1x72xf32> to vector<1x72xf32>
    %43 = vector.shape_cast %42 : vector<1x72xf32> to vector<1x1x72xf32>
    %44 = vector.broadcast %43 : vector<1x1x72xf32> to vector<2x2x72xf32>
    %45 = arith.mulf %40, %44 : vector<2x2x72xf32>
    %46 = arith.addf %38, %45 : vector<2x2x72xf32>
    %c0_36 = arith.constant 0 : index
    %c1_37 = arith.constant 1 : index
    %c0_38 = arith.constant 0 : index
    %c0_39 = arith.constant 0 : index
    %47 = vector.load %arg1[%c0_36, %c1_37, %c0_38, %c0_39] : memref<4x3x3x72xf32, #tpu.memory_space<vmem>>, vector<1x2x2x72xf32>
    %48 = vector.shape_cast %47 : vector<1x2x2x72xf32> to vector<2x2x72xf32>
    %c6 = arith.constant 6 : index
    %c0_40 = arith.constant 0 : index
    %c0_41 = arith.constant 0 : index
    %49 = vector.load %arg2[%c6, %c0_40, %c0_41] : memref<9x1x72xf32, #tpu.memory_space<vmem>>, vector<1x1x72xf32>
    %50 = vector.shape_cast %49 : vector<1x1x72xf32> to vector<1x72xf32>
    %51 = vector.shape_cast %50 : vector<1x72xf32> to vector<1x1x72xf32>
    %52 = vector.broadcast %51 : vector<1x1x72xf32> to vector<2x2x72xf32>
    %53 = arith.mulf %48, %52 : vector<2x2x72xf32>
    %54 = arith.addf %46, %53 : vector<2x2x72xf32>
    %c1_42 = arith.constant 1 : index
    %c1_43 = arith.constant 1 : index
    %c0_44 = arith.constant 0 : index
    %c0_45 = arith.constant 0 : index
    %55 = vector.load %arg1[%c1_42, %c1_43, %c0_44, %c0_45] : memref<4x3x3x72xf32, #tpu.memory_space<vmem>>, vector<1x2x2x72xf32>
    %56 = vector.shape_cast %55 : vector<1x2x2x72xf32> to vector<2x2x72xf32>
    %c7 = arith.constant 7 : index
    %c0_46 = arith.constant 0 : index
    %c0_47 = arith.constant 0 : index
    %57 = vector.load %arg2[%c7, %c0_46, %c0_47] : memref<9x1x72xf32, #tpu.memory_space<vmem>>, vector<1x1x72xf32>
    %58 = vector.shape_cast %57 : vector<1x1x72xf32> to vector<1x72xf32>
    %59 = vector.shape_cast %58 : vector<1x72xf32> to vector<1x1x72xf32>
    %60 = vector.broadcast %59 : vector<1x1x72xf32> to vector<2x2x72xf32>
    %61 = arith.mulf %56, %60 : vector<2x2x72xf32>
    %62 = arith.addf %54, %61 : vector<2x2x72xf32>
    %c0_48 = arith.constant 0 : index
    %c1_49 = arith.constant 1 : index
    %c1_50 = arith.constant 1 : index
    %c0_51 = arith.constant 0 : index
    %63 = vector.load %arg1[%c0_48, %c1_49, %c1_50, %c0_51] : memref<4x3x3x72xf32, #tpu.memory_space<vmem>>, vector<1x2x2x72xf32>
    %64 = vector.shape_cast %63 : vector<1x2x2x72xf32> to vector<2x2x72xf32>
    %c8 = arith.constant 8 : index
    %c0_52 = arith.constant 0 : index
    %c0_53 = arith.constant 0 : index
    %65 = vector.load %arg2[%c8, %c0_52, %c0_53] : memref<9x1x72xf32, #tpu.memory_space<vmem>>, vector<1x1x72xf32>
    %66 = vector.shape_cast %65 : vector<1x1x72xf32> to vector<1x72xf32>
    %67 = vector.shape_cast %66 : vector<1x72xf32> to vector<1x1x72xf32>
    %68 = vector.broadcast %67 : vector<1x1x72xf32> to vector<2x2x72xf32>
    %69 = arith.mulf %64, %68 : vector<2x2x72xf32>
    %70 = arith.addf %62, %69 : vector<2x2x72xf32>
    %c0_54 = arith.constant 0 : index
    %c0_55 = arith.constant 0 : index
    %71 = vector.load %arg3[%c0_54, %c0_55] : memref<1x72xf32, #tpu.memory_space<vmem>>, vector<1x72xf32>
    %72 = vector.shape_cast %71 : vector<1x72xf32> to vector<1x1x72xf32>
    %73 = vector.broadcast %72 : vector<1x1x72xf32> to vector<2x2x72xf32>
    %74 = arith.mulf %70, %73 : vector<2x2x72xf32>
    %c0_56 = arith.constant 0 : index
    %c0_57 = arith.constant 0 : index
    %75 = vector.load %arg4[%c0_56, %c0_57] : memref<1x72xf32, #tpu.memory_space<vmem>>, vector<1x72xf32>
    %76 = vector.shape_cast %75 : vector<1x72xf32> to vector<1x1x72xf32>
    %77 = vector.broadcast %76 : vector<1x1x72xf32> to vector<2x2x72xf32>
    %78 = arith.addf %74, %77 : vector<2x2x72xf32>
    %cst = arith.constant 0.000000e+00 : f32
    %79 = vector.broadcast %cst : f32 to vector<2x2x72xf32>
    %80 = arith.maximumf %78, %79 : vector<2x2x72xf32>
    %cst_58 = arith.constant dense<0.000000e+00> : vector<2x72xf32>
    %81 = vector.multi_reduction <add>, %80, %cst_58 [0] : vector<2x2x72xf32> to vector<2x72xf32>
    %cst_59 = arith.constant dense<0.000000e+00> : vector<72xf32>
    %82 = vector.multi_reduction <add>, %81, %cst_59 [0] : vector<2x72xf32> to vector<72xf32>
    %83 = vector.shape_cast %82 : vector<72xf32> to vector<1x72xf32>
    %cst_60 = arith.constant 2.500000e-01 : f32
    %84 = vector.broadcast %cst_60 : f32 to vector<1x72xf32>
    %85 = arith.mulf %83, %84 : vector<1x72xf32>
    %c0_61 = arith.constant 0 : index
    %c0_62 = arith.constant 0 : index
    %86 = vector.load %arg5[%c0_61, %c0_62] : memref<72x16xf32, #tpu.memory_space<vmem>>, vector<72x16xf32>
    %cst_63 = arith.constant dense<0.000000e+00> : vector<1x16xf32>
    %87 = tpu.matmul %85, %86, %cst_63 {dimension_numbers = #tpu.dot_dimension_numbers<[1], [0], [0], [1], [0, 0, 1, 1], [], []>} : vector<1x72xf32>, vector<72x16xf32>, vector<1x16xf32> -> vector<1x16xf32>
    %c0_64 = arith.constant 0 : index
    %c0_65 = arith.constant 0 : index
    %88 = vector.load %arg6[%c0_64, %c0_65] : memref<1x16xf32, #tpu.memory_space<vmem>>, vector<1x16xf32>
    %89 = arith.addf %87, %88 : vector<1x16xf32>
    %cst_66 = arith.constant 0.000000e+00 : f32
    %90 = vector.broadcast %cst_66 : f32 to vector<1x16xf32>
    %91 = arith.maximumf %89, %90 : vector<1x16xf32>
    %c0_67 = arith.constant 0 : index
    %c0_68 = arith.constant 0 : index
    %92 = vector.load %arg7[%c0_67, %c0_68] : memref<16x72xf32, #tpu.memory_space<vmem>>, vector<16x72xf32>
    %cst_69 = arith.constant dense<0.000000e+00> : vector<1x72xf32>
    %93 = tpu.matmul %91, %92, %cst_69 {dimension_numbers = #tpu.dot_dimension_numbers<[1], [0], [0], [1], [0, 0, 1, 1], [], []>} : vector<1x16xf32>, vector<16x72xf32>, vector<1x72xf32> -> vector<1x72xf32>
    %c0_70 = arith.constant 0 : index
    %c0_71 = arith.constant 0 : index
    %94 = vector.load %arg8[%c0_70, %c0_71] : memref<1x72xf32, #tpu.memory_space<vmem>>, vector<1x72xf32>
    %95 = arith.addf %93, %94 : vector<1x72xf32>
    %96 = arith.negf %95 : vector<1x72xf32>
    %97 = math.exp %96 : vector<1x72xf32>
    %cst_72 = arith.constant 1.000000e+00 : f32
    %98 = vector.broadcast %cst_72 : f32 to vector<1x72xf32>
    %99 = arith.addf %98, %97 : vector<1x72xf32>
    %100 = arith.divf %98, %99 : vector<1x72xf32>
    %101 = vector.shape_cast %100 : vector<1x72xf32> to vector<1x1x72xf32>
    %102 = vector.broadcast %101 : vector<1x1x72xf32> to vector<2x2x72xf32>
    %103 = arith.mulf %80, %102 : vector<2x2x72xf32>
    %c0_73 = arith.constant 0 : index
    %c0_74 = arith.constant 0 : index
    %c0_75 = arith.constant 0 : index
    %c0_76 = arith.constant 0 : index
    %104 = vector.load %arg9[%c0_73, %c0_74, %c0_75, %c0_76] : memref<1x2x2x72xf32, #tpu.memory_space<vmem>>, vector<1x2x2x72xf32>
    %105 = vector.shape_cast %104 : vector<1x2x2x72xf32> to vector<2x2x72xf32>
    %106 = vector.shape_cast %103 : vector<2x2x72xf32> to vector<1x2x2x72xf32>
    tpu.vector_store %arg9[%c0_73, %c0_74, %c0_75, %c0_76], %106 {strides = array<i32>} : memref<1x2x2x72xf32, #tpu.memory_space<vmem>>, vector<1x2x2x72xf32>,
    return
  }
  func.func @transform_0(%arg0: i32) -> (i32, i32, i32, i32) {
    %c0_i32 = arith.constant 0 : i32
    %c0_i32_0 = arith.constant 0 : i32
    %c0_i32_1 = arith.constant 0 : i32
    %c0_i32_2 = arith.constant 0 : i32
    return %arg0, %c0_i32, %c0_i32_0, %c0_i32_1 : i32, i32, i32, i32
  }
  func.func @transform_1(%arg0: i32) -> (i32, i32, i32) {
    %c0_i32 = arith.constant 0 : i32
    %c0_i32_0 = arith.constant 0 : i32
    %c0_i32_1 = arith.constant 0 : i32
    %c0_i32_2 = arith.constant 0 : i32
    return %c0_i32, %c0_i32_0, %c0_i32_1 : i32, i32, i32
  }
  func.func @transform_2(%arg0: i32) -> (i32, i32) {
    %c0_i32 = arith.constant 0 : i32
    %c0_i32_0 = arith.constant 0 : i32
    %c0_i32_1 = arith.constant 0 : i32
    return %c0_i32, %c0_i32_0 : i32, i32
  }
  func.func @transform_3(%arg0: i32) -> (i32, i32) {
    %c0_i32 = arith.constant 0 : i32
    %c0_i32_0 = arith.constant 0 : i32
    %c0_i32_1 = arith.constant 0 : i32
    return %c0_i32, %c0_i32_0 : i32, i32
  }
  func.func @transform_4(%arg0: i32) -> (i32, i32) {
    %c0_i32 = arith.constant 0 : i32
    %c0_i32_0 = arith.constant 0 : i32
    %c0_i32_1 = arith.constant 0 : i32
    return %c0_i32, %c0_i32_0 : i32, i32
  }
  func.func @transform_5(%arg0: i32) -> (i32, i32) {
    %c0_i32 = arith.constant 0 : i32
    %c0_i32_0 = arith.constant 0 : i32
    %c0_i32_1 = arith.constant 0 : i32
    return %c0_i32, %c0_i32_0 : i32, i32
  }
  func.func @transform_6(%arg0: i32) -> (i32, i32) {
    %c0_i32 = arith.constant 0 : i32
    %c0_i32_0 = arith.constant 0 : i32
    %c0_i32_1 = arith.constant 0 : i32
    return %c0_i32, %c0_i32_0 : i32, i32
  }
  func.func @transform_7(%arg0: i32) -> (i32, i32) {
    %c0_i32 = arith.constant 0 : i32
    %c0_i32_0 = arith.constant 0 : i32
    %c0_i32_1 = arith.constant 0 : i32
    return %c0_i32, %c0_i32_0 : i32, i32
  }
  func.func @transform_8(%arg0: i32) -> (i32, i32, i32, i32) {
    %c0_i32 = arith.constant 0 : i32
    %c0_i32_0 = arith.constant 0 : i32
    %c0_i32_1 = arith.constant 0 : i32
    %c0_i32_2 = arith.constant 0 : i32
    return %arg0, %c0_i32, %c0_i32_0, %c0_i32_1 : i32, i32, i32, i32
  }
}

module attributes {stable_mosaic.version = 11 : i64} {
  func.func @_pw_exp_kernel(%arg0: i32, %arg1: memref<8x72xf32, #tpu.memory_space<vmem>>, %arg2: memref<72x40xf32, #tpu.memory_space<vmem>>, %arg3: memref<1x40xf32, #tpu.memory_space<vmem>>, %arg4: memref<1x40xf32, #tpu.memory_space<vmem>>, %arg5: memref<40x120xf32, #tpu.memory_space<vmem>>, %arg6: memref<1x120xf32, #tpu.memory_space<vmem>>, %arg7: memref<1x120xf32, #tpu.memory_space<vmem>>, %arg8: memref<8x40xf32, #tpu.memory_space<vmem>>, %arg9: memref<8x120xf32, #tpu.memory_space<vmem>>) attributes {dimension_semantics = [#tpu.dimension_semantics<parallel>], iteration_bounds = array<i64: 1>, scalar_prefetch = 0 : i64, scratch_operands = 0 : i64, tpu.core_type = #tpu.core_type<tc>, window_params = [{transform_indices = @transform_0, window_bounds = array<i64: 8, 72>}, {pipeline_mode = #tpu.pipeline_mode<synchronous>, transform_indices = @transform_1, window_bounds = array<i64: 72, 40>}, {pipeline_mode = #tpu.pipeline_mode<synchronous>, transform_indices = @transform_2, window_bounds = array<i64: 1, 40>}, {pipeline_mode = #tpu.pipeline_mode<synchronous>, transform_indices = @transform_3, window_bounds = array<i64: 1, 40>}, {pipeline_mode = #tpu.pipeline_mode<synchronous>, transform_indices = @transform_4, window_bounds = array<i64: 40, 120>}, {pipeline_mode = #tpu.pipeline_mode<synchronous>, transform_indices = @transform_5, window_bounds = array<i64: 1, 120>}, {pipeline_mode = #tpu.pipeline_mode<synchronous>, transform_indices = @transform_6, window_bounds = array<i64: 1, 120>}, {transform_indices = @transform_7, window_bounds = array<i64: 8, 40>}, {transform_indices = @transform_8, window_bounds = array<i64: 8, 120>}]} {
    %c0 = arith.constant 0 : index
    %c0_0 = arith.constant 0 : index
    %0 = vector.load %arg1[%c0, %c0_0] : memref<8x72xf32, #tpu.memory_space<vmem>>, vector<8x72xf32>
    %c0_1 = arith.constant 0 : index
    %c0_2 = arith.constant 0 : index
    %1 = vector.load %arg2[%c0_1, %c0_2] : memref<72x40xf32, #tpu.memory_space<vmem>>, vector<72x40xf32>
    %cst = arith.constant dense<0.000000e+00> : vector<8x40xf32>
    %2 = tpu.matmul %0, %1, %cst {dimension_numbers = #tpu.dot_dimension_numbers<[1], [0], [0], [1], [0, 0, 1, 1], [], []>} : vector<8x72xf32>, vector<72x40xf32>, vector<8x40xf32> -> vector<8x40xf32>
    %c0_3 = arith.constant 0 : index
    %c0_4 = arith.constant 0 : index
    %3 = vector.load %arg3[%c0_3, %c0_4] : memref<1x40xf32, #tpu.memory_space<vmem>>, vector<1x40xf32>
    %4 = vector.broadcast %3 : vector<1x40xf32> to vector<8x40xf32>
    %5 = arith.mulf %2, %4 : vector<8x40xf32>
    %c0_5 = arith.constant 0 : index
    %c0_6 = arith.constant 0 : index
    %6 = vector.load %arg4[%c0_5, %c0_6] : memref<1x40xf32, #tpu.memory_space<vmem>>, vector<1x40xf32>
    %7 = vector.broadcast %6 : vector<1x40xf32> to vector<8x40xf32>
    %8 = arith.addf %5, %7 : vector<8x40xf32>
    %c0_7 = arith.constant 0 : index
    %c0_8 = arith.constant 0 : index
    %9 = vector.load %arg8[%c0_7, %c0_8] : memref<8x40xf32, #tpu.memory_space<vmem>>, vector<8x40xf32>
    tpu.vector_store %arg8[%c0_7, %c0_8], %8 {strides = array<i32>} : memref<8x40xf32, #tpu.memory_space<vmem>>, vector<8x40xf32>,
    %c0_9 = arith.constant 0 : index
    %c0_10 = arith.constant 0 : index
    %10 = vector.load %arg5[%c0_9, %c0_10] : memref<40x120xf32, #tpu.memory_space<vmem>>, vector<40x120xf32>
    %cst_11 = arith.constant dense<0.000000e+00> : vector<8x120xf32>
    %11 = tpu.matmul %8, %10, %cst_11 {dimension_numbers = #tpu.dot_dimension_numbers<[1], [0], [0], [1], [0, 0, 1, 1], [], []>} : vector<8x40xf32>, vector<40x120xf32>, vector<8x120xf32> -> vector<8x120xf32>
    %c0_12 = arith.constant 0 : index
    %c0_13 = arith.constant 0 : index
    %12 = vector.load %arg6[%c0_12, %c0_13] : memref<1x120xf32, #tpu.memory_space<vmem>>, vector<1x120xf32>
    %13 = vector.broadcast %12 : vector<1x120xf32> to vector<8x120xf32>
    %14 = arith.mulf %11, %13 : vector<8x120xf32>
    %c0_14 = arith.constant 0 : index
    %c0_15 = arith.constant 0 : index
    %15 = vector.load %arg7[%c0_14, %c0_15] : memref<1x120xf32, #tpu.memory_space<vmem>>, vector<1x120xf32>
    %16 = vector.broadcast %15 : vector<1x120xf32> to vector<8x120xf32>
    %17 = arith.addf %14, %16 : vector<8x120xf32>
    %cst_16 = arith.constant 0.000000e+00 : f32
    %18 = vector.broadcast %cst_16 : f32 to vector<8x120xf32>
    %19 = arith.maximumf %17, %18 : vector<8x120xf32>
    %c0_17 = arith.constant 0 : index
    %c0_18 = arith.constant 0 : index
    %20 = vector.load %arg9[%c0_17, %c0_18] : memref<8x120xf32, #tpu.memory_space<vmem>>, vector<8x120xf32>
    tpu.vector_store %arg9[%c0_17, %c0_18], %19 {strides = array<i32>} : memref<8x120xf32, #tpu.memory_space<vmem>>, vector<8x120xf32>,
    return
  }
  func.func @transform_0(%arg0: i32) -> (i32, i32) {
    %c0_i32 = arith.constant 0 : i32
    %c0_i32_0 = arith.constant 0 : i32
    return %arg0, %c0_i32 : i32, i32
  }
  func.func @transform_1(%arg0: i32) -> (i32, i32) {
    %c0_i32 = arith.constant 0 : i32
    %c0_i32_0 = arith.constant 0 : i32
    %c0_i32_1 = arith.constant 0 : i32
    return %c0_i32, %c0_i32_0 : i32, i32
  }
  func.func @transform_2(%arg0: i32) -> (i32, i32) {
    %c0_i32 = arith.constant 0 : i32
    %c0_i32_0 = arith.constant 0 : i32
    %c0_i32_1 = arith.constant 0 : i32
    return %c0_i32, %c0_i32_0 : i32, i32
  }
  func.func @transform_3(%arg0: i32) -> (i32, i32) {
    %c0_i32 = arith.constant 0 : i32
    %c0_i32_0 = arith.constant 0 : i32
    %c0_i32_1 = arith.constant 0 : i32
    return %c0_i32, %c0_i32_0 : i32, i32
  }
  func.func @transform_4(%arg0: i32) -> (i32, i32) {
    %c0_i32 = arith.constant 0 : i32
    %c0_i32_0 = arith.constant 0 : i32
    %c0_i32_1 = arith.constant 0 : i32
    return %c0_i32, %c0_i32_0 : i32, i32
  }
  func.func @transform_5(%arg0: i32) -> (i32, i32) {
    %c0_i32 = arith.constant 0 : i32
    %c0_i32_0 = arith.constant 0 : i32
    %c0_i32_1 = arith.constant 0 : i32
    return %c0_i32, %c0_i32_0 : i32, i32
  }
  func.func @transform_6(%arg0: i32) -> (i32, i32) {
    %c0_i32 = arith.constant 0 : i32
    %c0_i32_0 = arith.constant 0 : i32
    %c0_i32_1 = arith.constant 0 : i32
    return %c0_i32, %c0_i32_0 : i32, i32
  }
  func.func @transform_7(%arg0: i32) -> (i32, i32) {
    %c0_i32 = arith.constant 0 : i32
    %c0_i32_0 = arith.constant 0 : i32
    return %arg0, %c0_i32 : i32, i32
  }
  func.func @transform_8(%arg0: i32) -> (i32, i32) {
    %c0_i32 = arith.constant 0 : i32
    %c0_i32_0 = arith.constant 0 : i32
    return %arg0, %c0_i32 : i32, i32
  }
}

module attributes {stable_mosaic.version = 11 : i64} {
  func.func @_mm_bn_act_kernel(%arg0: i32, %arg1: memref<8x120xf32, #tpu.memory_space<vmem>>, %arg2: memref<120x40xf32, #tpu.memory_space<vmem>>, %arg3: memref<1x40xf32, #tpu.memory_space<vmem>>, %arg4: memref<1x40xf32, #tpu.memory_space<vmem>>, %arg5: memref<8x40xf32, #tpu.memory_space<vmem>>, %arg6: memref<8x40xf32, #tpu.memory_space<vmem>>) attributes {dimension_semantics = [#tpu.dimension_semantics<parallel>], iteration_bounds = array<i64: 1>, scalar_prefetch = 0 : i64, scratch_operands = 0 : i64, tpu.core_type = #tpu.core_type<tc>, window_params = [{transform_indices = @transform_0, window_bounds = array<i64: 8, 120>}, {pipeline_mode = #tpu.pipeline_mode<synchronous>, transform_indices = @transform_1, window_bounds = array<i64: 120, 40>}, {pipeline_mode = #tpu.pipeline_mode<synchronous>, transform_indices = @transform_2, window_bounds = array<i64: 1, 40>}, {pipeline_mode = #tpu.pipeline_mode<synchronous>, transform_indices = @transform_3, window_bounds = array<i64: 1, 40>}, {transform_indices = @transform_4, window_bounds = array<i64: 8, 40>}, {transform_indices = @transform_5, window_bounds = array<i64: 8, 40>}]} {
    %c0 = arith.constant 0 : index
    %c0_0 = arith.constant 0 : index
    %0 = vector.load %arg1[%c0, %c0_0] : memref<8x120xf32, #tpu.memory_space<vmem>>, vector<8x120xf32>
    %c0_1 = arith.constant 0 : index
    %c0_2 = arith.constant 0 : index
    %1 = vector.load %arg2[%c0_1, %c0_2] : memref<120x40xf32, #tpu.memory_space<vmem>>, vector<120x40xf32>
    %cst = arith.constant dense<0.000000e+00> : vector<8x40xf32>
    %2 = tpu.matmul %0, %1, %cst {dimension_numbers = #tpu.dot_dimension_numbers<[1], [0], [0], [1], [0, 0, 1, 1], [], []>} : vector<8x120xf32>, vector<120x40xf32>, vector<8x40xf32> -> vector<8x40xf32>
    %c0_3 = arith.constant 0 : index
    %c0_4 = arith.constant 0 : index
    %3 = vector.load %arg3[%c0_3, %c0_4] : memref<1x40xf32, #tpu.memory_space<vmem>>, vector<1x40xf32>
    %4 = vector.broadcast %3 : vector<1x40xf32> to vector<8x40xf32>
    %5 = arith.mulf %2, %4 : vector<8x40xf32>
    %c0_5 = arith.constant 0 : index
    %c0_6 = arith.constant 0 : index
    %6 = vector.load %arg4[%c0_5, %c0_6] : memref<1x40xf32, #tpu.memory_space<vmem>>, vector<1x40xf32>
    %7 = vector.broadcast %6 : vector<1x40xf32> to vector<8x40xf32>
    %8 = arith.addf %5, %7 : vector<8x40xf32>
    %c0_7 = arith.constant 0 : index
    %c0_8 = arith.constant 0 : index
    %9 = vector.load %arg5[%c0_7, %c0_8] : memref<8x40xf32, #tpu.memory_space<vmem>>, vector<8x40xf32>
    %10 = arith.addf %8, %9 : vector<8x40xf32>
    %c0_9 = arith.constant 0 : index
    %c0_10 = arith.constant 0 : index
    %11 = vector.load %arg6[%c0_9, %c0_10] : memref<8x40xf32, #tpu.memory_space<vmem>>, vector<8x40xf32>
    tpu.vector_store %arg6[%c0_9, %c0_10], %10 {strides = array<i32>} : memref<8x40xf32, #tpu.memory_space<vmem>>, vector<8x40xf32>,
    return
  }
  func.func @transform_0(%arg0: i32) -> (i32, i32) {
    %c0_i32 = arith.constant 0 : i32
    %c0_i32_0 = arith.constant 0 : i32
    return %arg0, %c0_i32 : i32, i32
  }
  func.func @transform_1(%arg0: i32) -> (i32, i32) {
    %c0_i32 = arith.constant 0 : i32
    %c0_i32_0 = arith.constant 0 : i32
    %c0_i32_1 = arith.constant 0 : i32
    return %c0_i32, %c0_i32_0 : i32, i32
  }
  func.func @transform_2(%arg0: i32) -> (i32, i32) {
    %c0_i32 = arith.constant 0 : i32
    %c0_i32_0 = arith.constant 0 : i32
    %c0_i32_1 = arith.constant 0 : i32
    return %c0_i32, %c0_i32_0 : i32, i32
  }
  func.func @transform_3(%arg0: i32) -> (i32, i32) {
    %c0_i32 = arith.constant 0 : i32
    %c0_i32_0 = arith.constant 0 : i32
    %c0_i32_1 = arith.constant 0 : i32
    return %c0_i32, %c0_i32_0 : i32, i32
  }
  func.func @transform_4(%arg0: i32) -> (i32, i32) {
    %c0_i32 = arith.constant 0 : i32
    %c0_i32_0 = arith.constant 0 : i32
    return %arg0, %c0_i32 : i32, i32
  }
  func.func @transform_5(%arg0: i32) -> (i32, i32) {
    %c0_i32 = arith.constant 0 : i32
    %c0_i32_0 = arith.constant 0 : i32
    return %arg0, %c0_i32 : i32, i32
  }
}

module attributes {stable_mosaic.version = 11 : i64} {
  func.func @_dw_bn_act_se_kernel(%arg0: i32, %arg1: memref<1x4x4x120xf32, #tpu.memory_space<vmem>>, %arg2: memref<9x1x120xf32, #tpu.memory_space<vmem>>, %arg3: memref<1x120xf32, #tpu.memory_space<vmem>>, %arg4: memref<1x120xf32, #tpu.memory_space<vmem>>, %arg5: memref<120x32xf32, #tpu.memory_space<vmem>>, %arg6: memref<1x32xf32, #tpu.memory_space<vmem>>, %arg7: memref<32x120xf32, #tpu.memory_space<vmem>>, %arg8: memref<1x120xf32, #tpu.memory_space<vmem>>, %arg9: memref<1x2x2x120xf32, #tpu.memory_space<vmem>>) attributes {dimension_semantics = [#tpu.dimension_semantics<parallel>], iteration_bounds = array<i64: 2>, scalar_prefetch = 0 : i64, scratch_operands = 0 : i64, tpu.core_type = #tpu.core_type<tc>, window_params = [{transform_indices = @transform_0, window_bounds = array<i64: 1, 4, 4, 120>}, {pipeline_mode = #tpu.pipeline_mode<synchronous>, transform_indices = @transform_1, window_bounds = array<i64: 9, 1, 120>}, {pipeline_mode = #tpu.pipeline_mode<synchronous>, transform_indices = @transform_2, window_bounds = array<i64: 1, 120>}, {pipeline_mode = #tpu.pipeline_mode<synchronous>, transform_indices = @transform_3, window_bounds = array<i64: 1, 120>}, {pipeline_mode = #tpu.pipeline_mode<synchronous>, transform_indices = @transform_4, window_bounds = array<i64: 120, 32>}, {pipeline_mode = #tpu.pipeline_mode<synchronous>, transform_indices = @transform_5, window_bounds = array<i64: 1, 32>}, {pipeline_mode = #tpu.pipeline_mode<synchronous>, transform_indices = @transform_6, window_bounds = array<i64: 32, 120>}, {pipeline_mode = #tpu.pipeline_mode<synchronous>, transform_indices = @transform_7, window_bounds = array<i64: 1, 120>}, {transform_indices = @transform_8, window_bounds = array<i64: 1, 2, 2, 120>}]} {
    %c0 = arith.constant 0 : index
    %c0_0 = arith.constant 0 : index
    %c0_1 = arith.constant 0 : index
    %c0_2 = arith.constant 0 : index
    %0 = vector.load %arg1[%c0, %c0_0, %c0_1, %c0_2] : memref<1x4x4x120xf32, #tpu.memory_space<vmem>>, vector<1x2x2x120xf32>
    %1 = vector.shape_cast %0 : vector<1x2x2x120xf32> to vector<2x2x120xf32>
    %c0_3 = arith.constant 0 : index
    %c0_4 = arith.constant 0 : index
    %c0_5 = arith.constant 0 : index
    %2 = vector.load %arg2[%c0_3, %c0_4, %c0_5] : memref<9x1x120xf32, #tpu.memory_space<vmem>>, vector<1x1x120xf32>
    %3 = vector.shape_cast %2 : vector<1x1x120xf32> to vector<1x120xf32>
    %4 = vector.shape_cast %3 : vector<1x120xf32> to vector<1x1x120xf32>
    %5 = vector.broadcast %4 : vector<1x1x120xf32> to vector<2x2x120xf32>
    %6 = arith.mulf %1, %5 : vector<2x2x120xf32>
    %c0_6 = arith.constant 0 : index
    %c0_7 = arith.constant 0 : index
    %c1 = arith.constant 1 : index
    %c0_8 = arith.constant 0 : index
    %7 = vector.load %arg1[%c0_6, %c0_7, %c1, %c0_8] : memref<1x4x4x120xf32, #tpu.memory_space<vmem>>, vector<1x2x2x120xf32>
    %8 = vector.shape_cast %7 : vector<1x2x2x120xf32> to vector<2x2x120xf32>
    %c1_9 = arith.constant 1 : index
    %c0_10 = arith.constant 0 : index
    %c0_11 = arith.constant 0 : index
    %9 = vector.load %arg2[%c1_9, %c0_10, %c0_11] : memref<9x1x120xf32, #tpu.memory_space<vmem>>, vector<1x1x120xf32>
    %10 = vector.shape_cast %9 : vector<1x1x120xf32> to vector<1x120xf32>
    %11 = vector.shape_cast %10 : vector<1x120xf32> to vector<1x1x120xf32>
    %12 = vector.broadcast %11 : vector<1x1x120xf32> to vector<2x2x120xf32>
    %13 = arith.mulf %8, %12 : vector<2x2x120xf32>
    %14 = arith.addf %6, %13 : vector<2x2x120xf32>
    %c0_12 = arith.constant 0 : index
    %c0_13 = arith.constant 0 : index
    %c2 = arith.constant 2 : index
    %c0_14 = arith.constant 0 : index
    %15 = vector.load %arg1[%c0_12, %c0_13, %c2, %c0_14] : memref<1x4x4x120xf32, #tpu.memory_space<vmem>>, vector<1x2x2x120xf32>
    %16 = vector.shape_cast %15 : vector<1x2x2x120xf32> to vector<2x2x120xf32>
    %c2_15 = arith.constant 2 : index
    %c0_16 = arith.constant 0 : index
    %c0_17 = arith.constant 0 : index
    %17 = vector.load %arg2[%c2_15, %c0_16, %c0_17] : memref<9x1x120xf32, #tpu.memory_space<vmem>>, vector<1x1x120xf32>
    %18 = vector.shape_cast %17 : vector<1x1x120xf32> to vector<1x120xf32>
    %19 = vector.shape_cast %18 : vector<1x120xf32> to vector<1x1x120xf32>
    %20 = vector.broadcast %19 : vector<1x1x120xf32> to vector<2x2x120xf32>
    %21 = arith.mulf %16, %20 : vector<2x2x120xf32>
    %22 = arith.addf %14, %21 : vector<2x2x120xf32>
    %c0_18 = arith.constant 0 : index
    %c1_19 = arith.constant 1 : index
    %c0_20 = arith.constant 0 : index
    %c0_21 = arith.constant 0 : index
    %23 = vector.load %arg1[%c0_18, %c1_19, %c0_20, %c0_21] : memref<1x4x4x120xf32, #tpu.memory_space<vmem>>, vector<1x2x2x120xf32>
    %24 = vector.shape_cast %23 : vector<1x2x2x120xf32> to vector<2x2x120xf32>
    %c3 = arith.constant 3 : index
    %c0_22 = arith.constant 0 : index
    %c0_23 = arith.constant 0 : index
    %25 = vector.load %arg2[%c3, %c0_22, %c0_23] : memref<9x1x120xf32, #tpu.memory_space<vmem>>, vector<1x1x120xf32>
    %26 = vector.shape_cast %25 : vector<1x1x120xf32> to vector<1x120xf32>
    %27 = vector.shape_cast %26 : vector<1x120xf32> to vector<1x1x120xf32>
    %28 = vector.broadcast %27 : vector<1x1x120xf32> to vector<2x2x120xf32>
    %29 = arith.mulf %24, %28 : vector<2x2x120xf32>
    %30 = arith.addf %22, %29 : vector<2x2x120xf32>
    %c0_24 = arith.constant 0 : index
    %c1_25 = arith.constant 1 : index
    %c1_26 = arith.constant 1 : index
    %c0_27 = arith.constant 0 : index
    %31 = vector.load %arg1[%c0_24, %c1_25, %c1_26, %c0_27] : memref<1x4x4x120xf32, #tpu.memory_space<vmem>>, vector<1x2x2x120xf32>
    %32 = vector.shape_cast %31 : vector<1x2x2x120xf32> to vector<2x2x120xf32>
    %c4 = arith.constant 4 : index
    %c0_28 = arith.constant 0 : index
    %c0_29 = arith.constant 0 : index
    %33 = vector.load %arg2[%c4, %c0_28, %c0_29] : memref<9x1x120xf32, #tpu.memory_space<vmem>>, vector<1x1x120xf32>
    %34 = vector.shape_cast %33 : vector<1x1x120xf32> to vector<1x120xf32>
    %35 = vector.shape_cast %34 : vector<1x120xf32> to vector<1x1x120xf32>
    %36 = vector.broadcast %35 : vector<1x1x120xf32> to vector<2x2x120xf32>
    %37 = arith.mulf %32, %36 : vector<2x2x120xf32>
    %38 = arith.addf %30, %37 : vector<2x2x120xf32>
    %c0_30 = arith.constant 0 : index
    %c1_31 = arith.constant 1 : index
    %c2_32 = arith.constant 2 : index
    %c0_33 = arith.constant 0 : index
    %39 = vector.load %arg1[%c0_30, %c1_31, %c2_32, %c0_33] : memref<1x4x4x120xf32, #tpu.memory_space<vmem>>, vector<1x2x2x120xf32>
    %40 = vector.shape_cast %39 : vector<1x2x2x120xf32> to vector<2x2x120xf32>
    %c5 = arith.constant 5 : index
    %c0_34 = arith.constant 0 : index
    %c0_35 = arith.constant 0 : index
    %41 = vector.load %arg2[%c5, %c0_34, %c0_35] : memref<9x1x120xf32, #tpu.memory_space<vmem>>, vector<1x1x120xf32>
    %42 = vector.shape_cast %41 : vector<1x1x120xf32> to vector<1x120xf32>
    %43 = vector.shape_cast %42 : vector<1x120xf32> to vector<1x1x120xf32>
    %44 = vector.broadcast %43 : vector<1x1x120xf32> to vector<2x2x120xf32>
    %45 = arith.mulf %40, %44 : vector<2x2x120xf32>
    %46 = arith.addf %38, %45 : vector<2x2x120xf32>
    %c0_36 = arith.constant 0 : index
    %c2_37 = arith.constant 2 : index
    %c0_38 = arith.constant 0 : index
    %c0_39 = arith.constant 0 : index
    %47 = vector.load %arg1[%c0_36, %c2_37, %c0_38, %c0_39] : memref<1x4x4x120xf32, #tpu.memory_space<vmem>>, vector<1x2x2x120xf32>
    %48 = vector.shape_cast %47 : vector<1x2x2x120xf32> to vector<2x2x120xf32>
    %c6 = arith.constant 6 : index
    %c0_40 = arith.constant 0 : index
    %c0_41 = arith.constant 0 : index
    %49 = vector.load %arg2[%c6, %c0_40, %c0_41] : memref<9x1x120xf32, #tpu.memory_space<vmem>>, vector<1x1x120xf32>
    %50 = vector.shape_cast %49 : vector<1x1x120xf32> to vector<1x120xf32>
    %51 = vector.shape_cast %50 : vector<1x120xf32> to vector<1x1x120xf32>
    %52 = vector.broadcast %51 : vector<1x1x120xf32> to vector<2x2x120xf32>
    %53 = arith.mulf %48, %52 : vector<2x2x120xf32>
    %54 = arith.addf %46, %53 : vector<2x2x120xf32>
    %c0_42 = arith.constant 0 : index
    %c2_43 = arith.constant 2 : index
    %c1_44 = arith.constant 1 : index
    %c0_45 = arith.constant 0 : index
    %55 = vector.load %arg1[%c0_42, %c2_43, %c1_44, %c0_45] : memref<1x4x4x120xf32, #tpu.memory_space<vmem>>, vector<1x2x2x120xf32>
    %56 = vector.shape_cast %55 : vector<1x2x2x120xf32> to vector<2x2x120xf32>
    %c7 = arith.constant 7 : index
    %c0_46 = arith.constant 0 : index
    %c0_47 = arith.constant 0 : index
    %57 = vector.load %arg2[%c7, %c0_46, %c0_47] : memref<9x1x120xf32, #tpu.memory_space<vmem>>, vector<1x1x120xf32>
    %58 = vector.shape_cast %57 : vector<1x1x120xf32> to vector<1x120xf32>
    %59 = vector.shape_cast %58 : vector<1x120xf32> to vector<1x1x120xf32>
    %60 = vector.broadcast %59 : vector<1x1x120xf32> to vector<2x2x120xf32>
    %61 = arith.mulf %56, %60 : vector<2x2x120xf32>
    %62 = arith.addf %54, %61 : vector<2x2x120xf32>
    %c0_48 = arith.constant 0 : index
    %c2_49 = arith.constant 2 : index
    %c2_50 = arith.constant 2 : index
    %c0_51 = arith.constant 0 : index
    %63 = vector.load %arg1[%c0_48, %c2_49, %c2_50, %c0_51] : memref<1x4x4x120xf32, #tpu.memory_space<vmem>>, vector<1x2x2x120xf32>
    %64 = vector.shape_cast %63 : vector<1x2x2x120xf32> to vector<2x2x120xf32>
    %c8 = arith.constant 8 : index
    %c0_52 = arith.constant 0 : index
    %c0_53 = arith.constant 0 : index
    %65 = vector.load %arg2[%c8, %c0_52, %c0_53] : memref<9x1x120xf32, #tpu.memory_space<vmem>>, vector<1x1x120xf32>
    %66 = vector.shape_cast %65 : vector<1x1x120xf32> to vector<1x120xf32>
    %67 = vector.shape_cast %66 : vector<1x120xf32> to vector<1x1x120xf32>
    %68 = vector.broadcast %67 : vector<1x1x120xf32> to vector<2x2x120xf32>
    %69 = arith.mulf %64, %68 : vector<2x2x120xf32>
    %70 = arith.addf %62, %69 : vector<2x2x120xf32>
    %c0_54 = arith.constant 0 : index
    %c0_55 = arith.constant 0 : index
    %71 = vector.load %arg3[%c0_54, %c0_55] : memref<1x120xf32, #tpu.memory_space<vmem>>, vector<1x120xf32>
    %72 = vector.shape_cast %71 : vector<1x120xf32> to vector<1x1x120xf32>
    %73 = vector.broadcast %72 : vector<1x1x120xf32> to vector<2x2x120xf32>
    %74 = arith.mulf %70, %73 : vector<2x2x120xf32>
    %c0_56 = arith.constant 0 : index
    %c0_57 = arith.constant 0 : index
    %75 = vector.load %arg4[%c0_56, %c0_57] : memref<1x120xf32, #tpu.memory_space<vmem>>, vector<1x120xf32>
    %76 = vector.shape_cast %75 : vector<1x120xf32> to vector<1x1x120xf32>
    %77 = vector.broadcast %76 : vector<1x1x120xf32> to vector<2x2x120xf32>
    %78 = arith.addf %74, %77 : vector<2x2x120xf32>
    %cst = arith.constant 0.000000e+00 : f32
    %79 = vector.broadcast %cst : f32 to vector<2x2x120xf32>
    %80 = arith.maximumf %78, %79 : vector<2x2x120xf32>
    %cst_58 = arith.constant dense<0.000000e+00> : vector<2x120xf32>
    %81 = vector.multi_reduction <add>, %80, %cst_58 [0] : vector<2x2x120xf32> to vector<2x120xf32>
    %cst_59 = arith.constant dense<0.000000e+00> : vector<120xf32>
    %82 = vector.multi_reduction <add>, %81, %cst_59 [0] : vector<2x120xf32> to vector<120xf32>
    %83 = vector.shape_cast %82 : vector<120xf32> to vector<1x120xf32>
    %cst_60 = arith.constant 2.500000e-01 : f32
    %84 = vector.broadcast %cst_60 : f32 to vector<1x120xf32>
    %85 = arith.mulf %83, %84 : vector<1x120xf32>
    %c0_61 = arith.constant 0 : index
    %c0_62 = arith.constant 0 : index
    %86 = vector.load %arg5[%c0_61, %c0_62] : memref<120x32xf32, #tpu.memory_space<vmem>>, vector<120x32xf32>
    %cst_63 = arith.constant dense<0.000000e+00> : vector<1x32xf32>
    %87 = tpu.matmul %85, %86, %cst_63 {dimension_numbers = #tpu.dot_dimension_numbers<[1], [0], [0], [1], [0, 0, 1, 1], [], []>} : vector<1x120xf32>, vector<120x32xf32>, vector<1x32xf32> -> vector<1x32xf32>
    %c0_64 = arith.constant 0 : index
    %c0_65 = arith.constant 0 : index
    %88 = vector.load %arg6[%c0_64, %c0_65] : memref<1x32xf32, #tpu.memory_space<vmem>>, vector<1x32xf32>
    %89 = arith.addf %87, %88 : vector<1x32xf32>
    %cst_66 = arith.constant 0.000000e+00 : f32
    %90 = vector.broadcast %cst_66 : f32 to vector<1x32xf32>
    %91 = arith.maximumf %89, %90 : vector<1x32xf32>
    %c0_67 = arith.constant 0 : index
    %c0_68 = arith.constant 0 : index
    %92 = vector.load %arg7[%c0_67, %c0_68] : memref<32x120xf32, #tpu.memory_space<vmem>>, vector<32x120xf32>
    %cst_69 = arith.constant dense<0.000000e+00> : vector<1x120xf32>
    %93 = tpu.matmul %91, %92, %cst_69 {dimension_numbers = #tpu.dot_dimension_numbers<[1], [0], [0], [1], [0, 0, 1, 1], [], []>} : vector<1x32xf32>, vector<32x120xf32>, vector<1x120xf32> -> vector<1x120xf32>
    %c0_70 = arith.constant 0 : index
    %c0_71 = arith.constant 0 : index
    %94 = vector.load %arg8[%c0_70, %c0_71] : memref<1x120xf32, #tpu.memory_space<vmem>>, vector<1x120xf32>
    %95 = arith.addf %93, %94 : vector<1x120xf32>
    %96 = arith.negf %95 : vector<1x120xf32>
    %97 = math.exp %96 : vector<1x120xf32>
    %cst_72 = arith.constant 1.000000e+00 : f32
    %98 = vector.broadcast %cst_72 : f32 to vector<1x120xf32>
    %99 = arith.addf %98, %97 : vector<1x120xf32>
    %100 = arith.divf %98, %99 : vector<1x120xf32>
    %101 = vector.shape_cast %100 : vector<1x120xf32> to vector<1x1x120xf32>
    %102 = vector.broadcast %101 : vector<1x1x120xf32> to vector<2x2x120xf32>
    %103 = arith.mulf %80, %102 : vector<2x2x120xf32>
    %c0_73 = arith.constant 0 : index
    %c0_74 = arith.constant 0 : index
    %c0_75 = arith.constant 0 : index
    %c0_76 = arith.constant 0 : index
    %104 = vector.load %arg9[%c0_73, %c0_74, %c0_75, %c0_76] : memref<1x2x2x120xf32, #tpu.memory_space<vmem>>, vector<1x2x2x120xf32>
    %105 = vector.shape_cast %104 : vector<1x2x2x120xf32> to vector<2x2x120xf32>
    %106 = vector.shape_cast %103 : vector<2x2x120xf32> to vector<1x2x2x120xf32>
    tpu.vector_store %arg9[%c0_73, %c0_74, %c0_75, %c0_76], %106 {strides = array<i32>} : memref<1x2x2x120xf32, #tpu.memory_space<vmem>>, vector<1x2x2x120xf32>,
    return
  }
  func.func @transform_0(%arg0: i32) -> (i32, i32, i32, i32) {
    %c0_i32 = arith.constant 0 : i32
    %c0_i32_0 = arith.constant 0 : i32
    %c0_i32_1 = arith.constant 0 : i32
    %c0_i32_2 = arith.constant 0 : i32
    return %arg0, %c0_i32, %c0_i32_0, %c0_i32_1 : i32, i32, i32, i32
  }
  func.func @transform_1(%arg0: i32) -> (i32, i32, i32) {
    %c0_i32 = arith.constant 0 : i32
    %c0_i32_0 = arith.constant 0 : i32
    %c0_i32_1 = arith.constant 0 : i32
    %c0_i32_2 = arith.constant 0 : i32
    return %c0_i32, %c0_i32_0, %c0_i32_1 : i32, i32, i32
  }
  func.func @transform_2(%arg0: i32) -> (i32, i32) {
    %c0_i32 = arith.constant 0 : i32
    %c0_i32_0 = arith.constant 0 : i32
    %c0_i32_1 = arith.constant 0 : i32
    return %c0_i32, %c0_i32_0 : i32, i32
  }
  func.func @transform_3(%arg0: i32) -> (i32, i32) {
    %c0_i32 = arith.constant 0 : i32
    %c0_i32_0 = arith.constant 0 : i32
    %c0_i32_1 = arith.constant 0 : i32
    return %c0_i32, %c0_i32_0 : i32, i32
  }
  func.func @transform_4(%arg0: i32) -> (i32, i32) {
    %c0_i32 = arith.constant 0 : i32
    %c0_i32_0 = arith.constant 0 : i32
    %c0_i32_1 = arith.constant 0 : i32
    return %c0_i32, %c0_i32_0 : i32, i32
  }
  func.func @transform_5(%arg0: i32) -> (i32, i32) {
    %c0_i32 = arith.constant 0 : i32
    %c0_i32_0 = arith.constant 0 : i32
    %c0_i32_1 = arith.constant 0 : i32
    return %c0_i32, %c0_i32_0 : i32, i32
  }
  func.func @transform_6(%arg0: i32) -> (i32, i32) {
    %c0_i32 = arith.constant 0 : i32
    %c0_i32_0 = arith.constant 0 : i32
    %c0_i32_1 = arith.constant 0 : i32
    return %c0_i32, %c0_i32_0 : i32, i32
  }
  func.func @transform_7(%arg0: i32) -> (i32, i32) {
    %c0_i32 = arith.constant 0 : i32
    %c0_i32_0 = arith.constant 0 : i32
    %c0_i32_1 = arith.constant 0 : i32
    return %c0_i32, %c0_i32_0 : i32, i32
  }
  func.func @transform_8(%arg0: i32) -> (i32, i32, i32, i32) {
    %c0_i32 = arith.constant 0 : i32
    %c0_i32_0 = arith.constant 0 : i32
    %c0_i32_1 = arith.constant 0 : i32
    %c0_i32_2 = arith.constant 0 : i32
    return %arg0, %c0_i32, %c0_i32_0, %c0_i32_1 : i32, i32, i32, i32
  }
}

</mosaic_0001>

<bundles_post_ra>
// kernel: mobilenetv3_features.9
= control target key start
LH: loop header
LB: loop body
LE: loop exit
PB: predicated region body
PF: predicated region fallthrough
CT: control target
= control target key end

     0   :  { %s957_s15 = smov 0   ;;  %s1199_s0 = inlined_call_operand.vmem [shape: f32[512,27], index: 0, kind: input, shape index: {}]   ;;  %s1200_s1 = inlined_call_operand.vmem [shape: f32[27,16], index: 1, kind: input, shape index: {}]   ;;  %s1201_s2 = inlined_call_operand.vmem [shape: f32[1,16], index: 2, kind: input, shape index: {}]   ;;  %s1202_s3 = inlined_call_operand.vmem [shape: f32[1,16], index: 3, kind: input, shape index: {}]   ;;  %s1203_s4 = inlined_call_operand.vmem [shape: f32[512,16], index: 4, kind: output, shape index: {}]  }
   0x1 LB: > { %s762_s16 = sadd.s32 4294967295, %s929_s15   ;;  %p766_p0 = scmp.ge.s32.totalorder %s929_s15, 1  ;;  %s929_s15 = sphi %s957_s15, %s14_s15  }
   0x2   : > { %p163_p1 = scmp.lt.s32.totalorder %s929_s15, 3 }
   0x4   : > { %p164_p2 = pnand %p766_p0, %p163_p1 }
   0x5   : > { %v233_v0 = vld [vmem:[%s1200_s1] sm:$0xff] (!%p164_p2)  ;;  %v234_v1 = vld [vmem:[%s1200_s1 + $0x8] sm:$0xff] (!%p164_p2)  ;;  %v235_v2 = vld [vmem:[%s1200_s1 + $0x10] sm:$0xff] (!%p164_p2)  ;;  %vm334_vm0 = vcmask (!%p164_p2), 1042432   ;;  %s767_s23 = sshll.u32 (!%p164_p2), %s762_s16, 5  ;;  %vm931_vm1 = vmmov (!%p164_p2), 1  }
   0x6   : > { %167 = sbr.rel (%p164_p2) target bundleno = 267 (0x10b), region = 36  ;;  %v900_v3 = vpack.c.bf16 (!%p164_p2), %v234_v1, %v233_v0  ;;  %v236_v4 = vld [vmem:[%s1200_s1 + $0x18] sm:$0x7] (!%p164_p2)  ;;  %p190_p3 = scmp.lt.s32.totalorder (!%p164_p2), %s767_s23, 63  ;;  %vm905_vm2 = vmpackc.low (!%p164_p2), %vm334_vm0, %vm931_vm1  ;;  %vm237_vm3 = vcmask (!%p164_p2), 220160   ;;  %vm673_vm4 = vcmask (!%p164_p2), 130048  }
   0x7   : > { %v904_v5 = vpack.c.bf16 (!%p164_p2), %v236_v4, %v235_v2  ;;  %v1054_v38 = vld [vmem:[%s1201_s2] ss:$0 sm:$0xff] (!%p164_p2) }
   0x8   : > { %901 = vmatprep.subr.bf16.mxu0 (!%p164_p2), %v900_v3  ;;  %910 = vmatprep.subr.bf16.mxu1 (!%p164_p2), %v900_v3  ;;  %v1059_v40 = vld [vmem:[%s1202_s3] ss:$0 sm:$0xff] (!%p164_p2) }
   0x9   : > { %903 = vmatpush3.bf16.msra.mxu0 (!%p164_p2), %v900_v3  ;;  %912 = vmatpush3.bf16.msra.mxu1 (!%p164_p2), %v900_v3 }
   0xa   : > { %906 = vmatprep.subr.msk.bf16.mxu0 (!%p164_p2), %vm905_vm2, %v904_v5  ;;  %911 = vmatprep.subr.msk.bf16.mxu1 (!%p164_p2), %vm905_vm2, %v904_v5 }
   0xd   : > { %s1205_s23 = smov (!%p190_p3, %s767_s23), 63  ;;  %909 = vmatpush3.bf16.msk.msra.mxu0 %vm905_vm2, %v904_v5  ;;  %913 = vmatpush3.bf16.msk.msra.mxu1 %vm905_vm2, %v904_v5 }
   0xe   : > { %s768_s26 = sshll.u32 %s1205_s23, 3 }
   0xf   : > { %s985_s29 = scalar_lea.vmem %s1199_s0, %s768_s26  ;;  %s1072_s10 = scalar_lea.vmem %s1203_s4, %s768_s26 }
  0x10   : > { %v201_v6 = vld [vmem:[%s985_s29] sm:$0xff]  ;;  %v202_v8 = vld [vmem:[%s985_s29 + $0x8] sm:$0xff]  ;;  %v203_v10 = vld [vmem:[%s985_s29 + $0x10] sm:$0xff] }
  0x11   : > { %v217_v7 = vld [vmem:[%s985_s29 + $0x80] sm:$0xff]  ;;  %v218_v9 = vld [vmem:[%s985_s29 + $0x88] sm:$0xff]  ;;  %852 = vmatprep.mubr.msk.f32.mxu0 %vm237_vm3, %v201_v6  ;;  %v219_v11 = vld [vmem:[%s985_s29 + $0x90] sm:$0xff] }
  0x12   : > { %876 = vmatprep.mubr.msk.f32.mxu1 %vm237_vm3, %v217_v7  ;;  %853 = vmatmul.mubr.msk.f32.vlgmr.msra.gmra.mrb[0].mxu0 %vm237_vm3, %v202_v8  ;;  %v204_v12 = vld [vmem:[%s985_s29 + $0x18] sm:$0xff]  ;;  %v205_v14 = vld [vmem:[%s985_s29 + $0x20] sm:$0xff]  ;;  %v206_v16 = vld [vmem:[%s985_s29 + $0x28] sm:$0xff] }
  0x13   : > { %877 = vmatmul.mubr.msk.f32.vlgmr.msra.gmra.mrb[0].mxu1 %vm237_vm3, %v218_v9  ;;  %855 = vmatprep.mubr.msk.f32.mxu0 %vm237_vm3, %v203_v10  ;;  %v220_v13 = vld [vmem:[%s985_s29 + $0x98] sm:$0xff]  ;;  %v221_v15 = vld [vmem:[%s985_s29 + $0xa0] sm:$0xff]  ;;  %v222_v17 = vld [vmem:[%s985_s29 + $0xa8] sm:$0xff] }
  0x14   : > { %879 = vmatprep.mubr.msk.f32.mxu1 %vm237_vm3, %v219_v11  ;;  %v207_v18 = vld [vmem:[%s985_s29 + $0x30] sm:$0xff]  ;;  %v208_v20 = vld [vmem:[%s985_s29 + $0x38] sm:$0xff]  ;;  %v209_v22 = vld [vmem:[%s985_s29 + $0x40] sm:$0xff] }
  0x15   : > { %v223_v19 = vld [vmem:[%s985_s29 + $0xb0] sm:$0xff]  ;;  %v224_v21 = vld [vmem:[%s985_s29 + $0xb8] sm:$0xff]  ;;  %v225_v23 = vld [vmem:[%s985_s29 + $0xc0] sm:$0xff] }
  0x16   : > { %856 = vmatmul.mubr.msk.f32.gmra.mrb[2].mxu0 %vm237_vm3, %v204_v12  ;;  %v210_v24 = vld [vmem:[%s985_s29 + $0x48] sm:$0xff]  ;;  %v211_v26 = vld [vmem:[%s985_s29 + $0x50] sm:$0xff]  ;;  %v212_v28 = vld [vmem:[%s985_s29 + $0x58] sm:$0xff] }
  0x17   : > { %880 = vmatmul.mubr.msk.f32.gmra.mrb[2].mxu1 %vm237_vm3, %v220_v13  ;;  %858 = vmatprep.mubr.msk.f32.mxu0 %vm237_vm3, %v205_v14  ;;  %v226_v25 = vld [vmem:[%s985_s29 + $0xc8] sm:$0xff]  ;;  %v227_v27 = vld [vmem:[%s985_s29 + $0xd0] sm:$0xff]  ;;  %v228_v29 = vld [vmem:[%s985_s29 + $0xd8] sm:$0xff] }
  0x18   : > { %882 = vmatprep.mubr.msk.f32.mxu1 %vm237_vm3, %v221_v15  ;;  %v213_v30 = vld [vmem:[%s985_s29 + $0x60] sm:$0xff]  ;;  %v214_v32 = vld [vmem:[%s985_s29 + $0x68] sm:$0xff]  ;;  %v215_v34 = vld [vmem:[%s985_s29 + $0x70] sm:$0xff] }
  0x19   : > { %v229_v31 = vld [vmem:[%s985_s29 + $0xe0] sm:$0xff]  ;;  %v230_v33 = vld [vmem:[%s985_s29 + $0xe8] sm:$0xff]  ;;  %v231_v35 = vld [vmem:[%s985_s29 + $0xf0] sm:$0xff] }
  0x1a   : > { %859 = vmatmul.mubr.msk.f32.gmra.mrb[4].mxu0 %vm237_vm3, %v206_v16  ;;  %v216_v36 = vld [vmem:[%s985_s29 + $0x78] sm:$0xff] }
  0x1b   : > { %883 = vmatmul.mubr.msk.f32.gmra.mrb[4].mxu1 %vm237_vm3, %v222_v17  ;;  %861 = vmatprep.mubr.msk.f32.mxu0 %vm237_vm3, %v207_v18  ;;  %v232_v37 = vld [vmem:[%s985_s29 + $0xf8] sm:$0xff] }
  0x1c   : > { %885 = vmatprep.mubr.msk.f32.mxu1 %vm237_vm3, %v223_v19 }
  0x1e   : > { %862 = vmatmul.mubr.msk.f32.gmra.mrb[6].mxu0 %vm237_vm3, %v208_v20 }
  0x1f   : > { %886 = vmatmul.mubr.msk.f32.gmra.mrb[6].mxu1 %vm237_vm3, %v224_v21  ;;  %864 = vmatprep.mubr.msk.f32.mxu0 %vm237_vm3, %v209_v22 }
  0x20   : > { %888 = vmatprep.mubr.msk.f32.mxu1 %vm237_vm3, %v225_v23 }
  0x22   : > { %865 = vmatmul.mubr.msk.f32.gmra.mrb[8].mxu0 %vm237_vm3, %v210_v24 }
  0x23   : > { %889 = vmatmul.mubr.msk.f32.gmra.mrb[8].mxu1 %vm237_vm3, %v226_v25  ;;  %867 = vmatprep.mubr.msk.f32.mxu0 %vm237_vm3, %v211_v26 }
  0x24   : > { %891 = vmatprep.mubr.msk.f32.mxu1 %vm237_vm3, %v227_v27 }
  0x26   : > { %868 = vmatmul.mubr.msk.f32.gmra.mrb[10].mxu0 %vm237_vm3, %v212_v28 }
  0x27   : > { %892 = vmatmul.mubr.msk.f32.gmra.mrb[10].mxu1 %vm237_vm3, %v228_v29  ;;  %870 = vmatprep.mubr.msk.f32.mxu0 %vm237_vm3, %v213_v30 }
  0x28   : > { %894 = vmatprep.mubr.msk.f32.mxu1 %vm237_vm3, %v229_v31 }
  0x2a   : > { %871 = vmatmul.mubr.msk.f32.gmra.mrb[12].mxu0 %vm237_vm3, %v214_v32 }
  0x2b   : > { %895 = vmatmul.mubr.msk.f32.gmra.mrb[12].mxu1 %vm237_vm3, %v230_v33  ;;  %873 = vmatprep.mubr.msk.f32.mxu0 %vm237_vm3, %v215_v34 }
  0x2c   : > { %897 = vmatprep.mubr.msk.f32.mxu1 %vm237_vm3, %v231_v35 }
  0x2e   : > { %874 = vmatmul.mubr.msk.f32.gmra.mrb[14].mxu0 %vm237_vm3, %v216_v36 }
  0x2f   : > { %898 = vmatmul.mubr.msk.f32.gmra.mrb[14].mxu1 %vm237_vm3, %v232_v37 }
  0xe5   : > { %v854_v39 = vpop.f32.mrb[0].mxu0 }
  0xe6   : > { %v878_v41 = vpop.f32.mrb[0].mxu1  ;;  %v571_v42 = vmul.f32 %v854_v39, %v1054_v38  ;;  %v404_v44 = vpop.f32.mrb[1].mxu0 }
  0xe7   : > { %v587_v43 = vmul.f32 %v878_v41, %v1054_v38  ;;  %v484_v45 = vpop.f32.mrb[1].mxu1  ;;  %v570_v46 = vmul.f32 %v1054_v38, %v404_v44 }
  0xe8   : > { %v586_v47 = vmul.f32 %v1054_v38, %v484_v45  ;;  %v610_v48 = vadd.f32 %v1059_v40, %v571_v42 }
  0xe9   : > { %v626_v49 = vadd.f32 %v1059_v40, %v587_v43  ;;  %v609_v50 = vadd.f32 %v1059_v40, %v570_v46  ;;  %v857_v52 = vpop.f32.mrb[2].mxu0 }
  0xea   : > { %v625_v51 = vadd.f32 %v1059_v40, %v586_v47  ;;  %v881_v53 = vpop.f32.mrb[2].mxu1  ;;  %v642_v54 = vmax.f32 %v610_v48, 0.0  ;;  %v573_v56 = vmul.f32 %v857_v52, %v1054_v38  ;;  %v414_v58 = vpop.f32.mrb[3].mxu0 }
  0xeb   : > { %v658_v55 = vmax.f32 %v626_v49, 0.0  ;;  %v589_v57 = vmul.f32 %v881_v53, %v1054_v38  ;;  %v494_v59 = vpop.f32.mrb[3].mxu1  ;;  %v641_v60 = vmax.f32 %v609_v50, 0.0  ;;  %v572_v62 = vmul.f32 %v1054_v38, %v414_v58 }
  0xec   : > { %v657_v61 = vmax.f32 %v625_v51, 0.0  ;;  %v588_v63 = vmul.f32 %v1054_v38, %v494_v59  ;;  %675 = vst.msk [vmem:[%s1072_s10 + $0x8] sm:$0xff] %vm673_vm4, %v642_v54  ;;  %v612_v0 = vadd.f32 %v1059_v40, %v573_v56 }
  0xed   : > { %691 = vst.msk [vmem:[%s1072_s10 + $0x88] sm:$0xff] %vm673_vm4, %v658_v55  ;;  %v628_v1 = vadd.f32 %v1059_v40, %v589_v57  ;;  %674 = vst.msk [vmem:[%s1072_s10] sm:$0xff] %vm673_vm4, %v641_v60  ;;  %v611_v2 = vadd.f32 %v1059_v40, %v572_v62  ;;  %v860_v4 = vpop.f32.mrb[4].mxu0 }
  0xee   : > { %690 = vst.msk [vmem:[%s1072_s10 + $0x80] sm:$0xff] %vm673_vm4, %v657_v61  ;;  %v627_v3 = vadd.f32 %v1059_v40, %v588_v63  ;;  %v884_v5 = vpop.f32.mrb[4].mxu1  ;;  %v644_v6 = vmax.f32 %v612_v0, 0.0  ;;  %v575_v8 = vmul.f32 %v860_v4, %v1054_v38  ;;  %v424_v10 = vpop.f32.mrb[5].mxu0 }
  0xef   : > { %v660_v7 = vmax.f32 %v628_v1, 0.0  ;;  %v591_v9 = vmul.f32 %v884_v5, %v1054_v38  ;;  %v504_v11 = vpop.f32.mrb[5].mxu1  ;;  %v643_v12 = vmax.f32 %v611_v2, 0.0  ;;  %v574_v14 = vmul.f32 %v1054_v38, %v424_v10 }
  0xf0   : > { %v659_v13 = vmax.f32 %v627_v3, 0.0  ;;  %v590_v15 = vmul.f32 %v1054_v38, %v504_v11  ;;  %677 = vst.msk [vmem:[%s1072_s10 + $0x18] sm:$0xff] %vm673_vm4, %v644_v6  ;;  %v614_v16 = vadd.f32 %v1059_v40, %v575_v8 }
  0xf1   : > { %693 = vst.msk [vmem:[%s1072_s10 + $0x98] sm:$0xff] %vm673_vm4, %v660_v7  ;;  %v630_v17 = vadd.f32 %v1059_v40, %v591_v9  ;;  %676 = vst.msk [vmem:[%s1072_s10 + $0x10] sm:$0xff] %vm673_vm4, %v643_v12  ;;  %v613_v18 = vadd.f32 %v1059_v40, %v574_v14  ;;  %v863_v20 = vpop.f32.mrb[6].mxu0 }
  0xf2   : > { %692 = vst.msk [vmem:[%s1072_s10 + $0x90] sm:$0xff] %vm673_vm4, %v659_v13  ;;  %v629_v19 = vadd.f32 %v1059_v40, %v590_v15  ;;  %v887_v21 = vpop.f32.mrb[6].mxu1  ;;  %v646_v22 = vmax.f32 %v614_v16, 0.0  ;;  %v577_v24 = vmul.f32 %v863_v20, %v1054_v38  ;;  %v434_v26 = vpop.f32.mrb[7].mxu0 }
  0xf3   : > { %v662_v23 = vmax.f32 %v630_v17, 0.0  ;;  %v593_v25 = vmul.f32 %v887_v21, %v1054_v38  ;;  %v514_v27 = vpop.f32.mrb[7].mxu1  ;;  %v645_v28 = vmax.f32 %v613_v18, 0.0  ;;  %v576_v30 = vmul.f32 %v1054_v38, %v434_v26 }
  0xf4   : > { %v661_v29 = vmax.f32 %v629_v19, 0.0  ;;  %v592_v31 = vmul.f32 %v1054_v38, %v514_v27  ;;  %679 = vst.msk [vmem:[%s1072_s10 + $0x28] sm:$0xff] %vm673_vm4, %v646_v22  ;;  %v616_v32 = vadd.f32 %v1059_v40, %v577_v24 }
  0xf5   : > { %695 = vst.msk [vmem:[%s1072_s10 + $0xa8] sm:$0xff] %vm673_vm4, %v662_v23  ;;  %v632_v33 = vadd.f32 %v1059_v40, %v593_v25  ;;  %678 = vst.msk [vmem:[%s1072_s10 + $0x20] sm:$0xff] %vm673_vm4, %v645_v28  ;;  %v615_v34 = vadd.f32 %v1059_v40, %v576_v30  ;;  %v866_v36 = vpop.f32.mrb[8].mxu0 }
  0xf6   : > { %694 = vst.msk [vmem:[%s1072_s10 + $0xa0] sm:$0xff] %vm673_vm4, %v661_v29  ;;  %v631_v35 = vadd.f32 %v1059_v40, %v592_v31  ;;  %v890_v37 = vpop.f32.mrb[8].mxu1  ;;  %v648_v39 = vmax.f32 %v616_v32, 0.0  ;;  %v579_v42 = vmul.f32 %v866_v36, %v1054_v38  ;;  %v444_v44 = vpop.f32.mrb[9].mxu0 }
  0xf7   : > { %v664_v41 = vmax.f32 %v632_v33, 0.0  ;;  %v595_v43 = vmul.f32 %v890_v37, %v1054_v38  ;;  %v524_v45 = vpop.f32.mrb[9].mxu1  ;;  %v647_v46 = vmax.f32 %v615_v34, 0.0  ;;  %v578_v48 = vmul.f32 %v1054_v38, %v444_v44 }
  0xf8   : > { %v663_v47 = vmax.f32 %v631_v35, 0.0  ;;  %v594_v49 = vmul.f32 %v1054_v38, %v524_v45  ;;  %681 = vst.msk [vmem:[%s1072_s10 + $0x38] sm:$0xff] %vm673_vm4, %v648_v39  ;;  %v618_v50 = vadd.f32 %v1059_v40, %v579_v42 }
  0xf9   : > { %697 = vst.msk [vmem:[%s1072_s10 + $0xb8] sm:$0xff] %vm673_vm4, %v664_v41  ;;  %v634_v51 = vadd.f32 %v1059_v40, %v595_v43  ;;  %680 = vst.msk [vmem:[%s1072_s10 + $0x30] sm:$0xff] %vm673_vm4, %v647_v46  ;;  %v617_v52 = vadd.f32 %v1059_v40, %v578_v48  ;;  %v869_v54 = vpop.f32.mrb[10].mxu0 }
  0xfa   : > { %696 = vst.msk [vmem:[%s1072_s10 + $0xb0] sm:$0xff] %vm673_vm4, %v663_v47  ;;  %v633_v53 = vadd.f32 %v1059_v40, %v594_v49  ;;  %v893_v55 = vpop.f32.mrb[10].mxu1  ;;  %v650_v56 = vmax.f32 %v618_v50, 0.0  ;;  %v581_v58 = vmul.f32 %v869_v54, %v1054_v38  ;;  %v454_v60 = vpop.f32.mrb[11].mxu0 }
  0xfb   : > { %v666_v57 = vmax.f32 %v634_v51, 0.0  ;;  %v597_v59 = vmul.f32 %v893_v55, %v1054_v38  ;;  %v534_v61 = vpop.f32.mrb[11].mxu1  ;;  %v649_v62 = vmax.f32 %v617_v52, 0.0  ;;  %v580_v0 = vmul.f32 %v1054_v38, %v454_v60 }
  0xfc   : > { %v665_v63 = vmax.f32 %v633_v53, 0.0  ;;  %v596_v1 = vmul.f32 %v1054_v38, %v534_v61  ;;  %683 = vst.msk [vmem:[%s1072_s10 + $0x48] sm:$0xff] %vm673_vm4, %v650_v56  ;;  %v620_v2 = vadd.f32 %v1059_v40, %v581_v58 }
  0xfd   : > { %699 = vst.msk [vmem:[%s1072_s10 + $0xc8] sm:$0xff] %vm673_vm4, %v666_v57  ;;  %v636_v3 = vadd.f32 %v1059_v40, %v597_v59  ;;  %682 = vst.msk [vmem:[%s1072_s10 + $0x40] sm:$0xff] %vm673_vm4, %v649_v62  ;;  %v619_v4 = vadd.f32 %v1059_v40, %v580_v0  ;;  %v872_v6 = vpop.f32.mrb[12].mxu0 }
  0xfe   : > { %698 = vst.msk [vmem:[%s1072_s10 + $0xc0] sm:$0xff] %vm673_vm4, %v665_v63  ;;  %v635_v5 = vadd.f32 %v1059_v40, %v596_v1  ;;  %v896_v7 = vpop.f32.mrb[12].mxu1  ;;  %v652_v8 = vmax.f32 %v620_v2, 0.0  ;;  %v583_v10 = vmul.f32 %v872_v6, %v1054_v38  ;;  %v464_v12 = vpop.f32.mrb[13].mxu0 }
  0xff   : > { %v668_v9 = vmax.f32 %v636_v3, 0.0  ;;  %v599_v11 = vmul.f32 %v896_v7, %v1054_v38  ;;  %v544_v13 = vpop.f32.mrb[13].mxu1  ;;  %v651_v14 = vmax.f32 %v619_v4, 0.0  ;;  %v582_v16 = vmul.f32 %v1054_v38, %v464_v12 }
 0x100   : > { %v667_v15 = vmax.f32 %v635_v5, 0.0  ;;  %v598_v17 = vmul.f32 %v1054_v38, %v544_v13  ;;  %685 = vst.msk [vmem:[%s1072_s10 + $0x58] sm:$0xff] %vm673_vm4, %v652_v8  ;;  %v622_v18 = vadd.f32 %v1059_v40, %v583_v10 }
 0x101   : > { %701 = vst.msk [vmem:[%s1072_s10 + $0xd8] sm:$0xff] %vm673_vm4, %v668_v9  ;;  %v638_v19 = vadd.f32 %v1059_v40, %v599_v11  ;;  %684 = vst.msk [vmem:[%s1072_s10 + $0x50] sm:$0xff] %vm673_vm4, %v651_v14  ;;  %v621_v20 = vadd.f32 %v1059_v40, %v582_v16  ;;  %v875_v22 = vpop.f32.mrb[14].mxu0 }
 0x102   : > { %700 = vst.msk [vmem:[%s1072_s10 + $0xd0] sm:$0xff] %vm673_vm4, %v667_v15  ;;  %v637_v21 = vadd.f32 %v1059_v40, %v598_v17  ;;  %v899_v23 = vpop.f32.mrb[14].mxu1  ;;  %v654_v24 = vmax.f32 %v622_v18, 0.0  ;;  %v585_v26 = vmul.f32 %v875_v22, %v1054_v38  ;;  %v474_v28 = vpop.f32.mrb[15].mxu0 }
 0x103   : > { %v670_v25 = vmax.f32 %v638_v19, 0.0  ;;  %v601_v27 = vmul.f32 %v899_v23, %v1054_v38  ;;  %v554_v29 = vpop.f32.mrb[15].mxu1  ;;  %v653_v30 = vmax.f32 %v621_v20, 0.0  ;;  %v584_v32 = vmul.f32 %v1054_v38, %v474_v28 }
 0x104   : > { %v669_v31 = vmax.f32 %v637_v21, 0.0  ;;  %v600_v33 = vmul.f32 %v1054_v38, %v554_v29  ;;  %687 = vst.msk [vmem:[%s1072_s10 + $0x68] sm:$0xff] %vm673_vm4, %v654_v24  ;;  %v624_v34 = vadd.f32 %v1059_v40, %v585_v26 }
 0x105   : > { %703 = vst.msk [vmem:[%s1072_s10 + $0xe8] sm:$0xff] %vm673_vm4, %v670_v25  ;;  %v640_v35 = vadd.f32 %v1059_v40, %v601_v27  ;;  %686 = vst.msk [vmem:[%s1072_s10 + $0x60] sm:$0xff] %vm673_vm4, %v653_v30  ;;  %v623_v36 = vadd.f32 %v1059_v40, %v584_v32 }
 0x106   : > { %702 = vst.msk [vmem:[%s1072_s10 + $0xe0] sm:$0xff] %vm673_vm4, %v669_v31  ;;  %v639_v37 = vadd.f32 %v1059_v40, %v600_v33  ;;  %v656_v39 = vmax.f32 %v624_v34, 0.0 }
 0x107   : > { %v672_v41 = vmax.f32 %v640_v35, 0.0  ;;  %v655_v38 = vmax.f32 %v623_v36, 0.0 }
 0x108   : > { %v671_v42 = vmax.f32 %v639_v37, 0.0  ;;  %689 = vst.msk [vmem:[%s1072_s10 + $0x78] sm:$0xff] %vm673_vm4, %v656_v39 }
 0x109   : > { %705 = vst.msk [vmem:[%s1072_s10 + $0xf8] sm:$0xff] %vm673_vm4, %v672_v41  ;;  %688 = vst.msk [vmem:[%s1072_s10 + $0x70] sm:$0xff] %vm673_vm4, %v655_v38 }
 0x10a   : > { %704 = vst.msk [vmem:[%s1072_s10 + $0xf0] sm:$0xff] %vm673_vm4, %v671_v42 }
 0x10b PF: > { %s14_s15 = sadd.s32 1, %s929_s15  }
 0x10c   : > { %p11_p4 = scmp.ge.s32.totalorder %s14_s15, 4  }
 0x10e   :  { %13 = sbr.rel (!%p11_p4) target bundleno = 1 (0x1), region = 66 }

// kernel: mobilenetv3_features.10
= control target key start
LH: loop header
LB: loop body
LE: loop exit
PB: predicated region body
PF: predicated region fallthrough
CT: control target
= control target key end

     0   :  { %s1073_s27 = smov 0   ;;  %s1325_s0 = inlined_call_operand.vmem [shape: f32[8,9,9,16], index: 0, kind: input, shape index: {}]   ;;  %s1326_s1 = inlined_call_operand.vmem [shape: f32[9,1,16], index: 1, kind: input, shape index: {}]   ;;  %s1327_s2 = inlined_call_operand.vmem [shape: f32[1,16], index: 2, kind: input, shape index: {}]   ;;  %s1328_s3 = inlined_call_operand.vmem [shape: f32[1,16], index: 3, kind: input, shape index: {}]   ;;  %s1329_s4 = inlined_call_operand.vmem [shape: f32[16,8], index: 4, kind: input, shape index: {}]   ;;  %s1330_s5 = inlined_call_operand.vmem [shape: f32[1,8], index: 5, kind: input, shape index: {}]   ;;  %s1331_s6 = inlined_call_operand.vmem [shape: f32[8,16], index: 6, kind: input, shape index: {}]   ;;  %s1332_s7 = inlined_call_operand.vmem [shape: f32[1,16], index: 7, kind: input, shape index: {}]   ;;  %s1333_s8 = inlined_call_operand.vmem [shape: f32[2,8,8,16], index: 8, kind: output, shape index: {}]  }
   0x1 LB: > { %s1079_s28 = sadd.s32 4294967295, %s1023_s27   ;;  %p895_p0 = scmp.ge.s32.totalorder %s1023_s27, 1  ;;  %s1023_s27 = sphi %s1073_s27, %s18_s27  }
   0x2   : > { %p264_p1 = scmp.lt.s32.totalorder %s1023_s27, 3 }
   0x4   : > { %p265_p2 = pnand %p895_p0, %p264_p1 }
   0x5   : > { %v657_v0 = vld [vmem:[%s1329_s4] sm:$0xff] (!%p265_p2)  ;;  %v658_v1 = vld [vmem:[%s1329_s4 + $0x8] sm:$0xff] (!%p265_p2)  ;;  %s896_s11 = sshll.u32 (!%p265_p2), %s1079_s28, 2  ;;  %v1025_v2 = vmov (!%p265_p2), 0.0|0.0   ;;  %vm1026_vm0 = vmmov (!%p265_p2), 0   ;;  %v1027_v4 = vmov (!%p265_p2), 0.0  }
   0x6   : > { %268 = sbr.rel (%p265_p2) target bundleno = 555 (0x22b), region = 52  ;;  %998 = vmatprep.subr.bf16.mxu0 (!%p265_p2), %v1025_v2  ;;  %v999_v3 = vpack.c.bf16 (!%p265_p2), %v658_v1, %v657_v0  ;;  %990 = vmatprep.mubr.msk.f32.mxu0 (!%p265_p2), %vm1026_vm0, %v1027_v4  ;;  %p300_p3 = scmp.lt.s32.totalorder (!%p265_p2), %s896_s11, 7  ;;  %v900_v5 = vld [vmem:[%s1326_s1] ss:$0 sm:$0xff] (!%p265_p2)  ;;  %v1096_v6 = vld [vmem:[%s1326_s1 + $0x6] ss:$0 sm:$0xff] (!%p265_p2) }
   0x7   : > { %993 = vmatprep.subr.mxu1 (!%p265_p2), %v1027_v4  ;;  %995 = vmatprep.mubr.msk.f32.mxu1 (!%p265_p2), %vm1026_vm0, %v1027_v4  ;;  %v910_v7 = vld [vmem:[%s1326_s1 + $0x1] ss:$0 sm:$0xff] (!%p265_p2)  ;;  %v912_v24 = vld [vmem:[%s1326_s1 + $0x2] ss:$0 sm:$0xff] (!%p265_p2)  ;;  %vm633_vm1 = vcmask (!%p265_p2), 130048   ;;  %vm736_vm2 = vcmask (!%p265_p2), 64512  }
   0x8   : > { %1000 = vmatpush3.bf16.msra.mxu0 (!%p265_p2), %v999_v3  ;;  %v922_v3 = vld [vmem:[%s1326_s1 + $0x3] ss:$0 sm:$0xff] (!%p265_p2)  ;;  %p306_p4 = scmp.lt.s32.totalorder (!%p265_p2), %s1079_s28, 1 }
   0xd   : > { %s1335_s11 = smov (!%p300_p3, %s896_s11), 7  ;;  %s1337_s28 = smov (!%p306_p4, %s1079_s28), 1 }
   0xe   : > { %s1001_s12 = smul.u32 144, %s1335_s11  ;;  %s980_s24 = sshll.u32 %s1337_s28, 6 }
   0xf   : > { %s310_s29 = scalar_lea.vmem %s1333_s8, %s980_s24 }
  0x10   : > { %s1101_s19 = scalar_lea.vmem %s1325_s0, %s1001_s12 }
  0x11   : > { %v311_v8 = vld [vmem:[%s1101_s19] sm:$0xff]  ;;  %v312_v9 = vld [vmem:[%s1101_s19 + $0x10] sm:$0xff] }
  0x12   : > { %v313_v10 = vld [vmem:[%s1101_s19 + $0x20] sm:$0xff]  ;;  %v314_v11 = vld [vmem:[%s1101_s19 + $0x30] sm:$0xff]  ;;  %v326_v14 = vmul.f32 %v900_v5, %v311_v8  ;;  %v327_v15 = vmul.f32 %v900_v5, %v312_v9  ;;  %v1115_v17 = vmul.f32 %v1096_v6, %v312_v9 }
  0x13   : > { %v315_v12 = vld [vmem:[%s1101_s19 + $0x40] sm:$0xff]  ;;  %v1112_v13 = vld [vmem:[%s1101_s19 + $0x50] sm:$0xff]  ;;  %v328_v16 = vmul.f32 %v900_v5, %v313_v10  ;;  %v329_v20 = vmul.f32 %v900_v5, %v314_v11  ;;  %v1129_v25 = vmul.f32 %v1096_v6, %v313_v10  ;;  %v1143_v32 = vmul.f32 %v1096_v6, %v314_v11 }
  0x14   : > { %v1118_v18 = vld [vmem:[%s1101_s19 + $0x60] sm:$0xff]  ;;  %v1121_v19 = vld [vmem:[%s1101_s19 + $0x70] sm:$0xff]  ;;  %v330_v21 = vmul.f32 %v900_v5, %v315_v12  ;;  %v331_v22 = vmul.f32 %v900_v5, %v1112_v13  ;;  %v1158_v39 = vmul.f32 %v1096_v6, %v315_v12 }
  0x15   : > { %v901_v23 = vld [vmem:[%s1101_s19 + $0x90] sm:$0xff]  ;;  %v332_v26 = vmul.f32 %v900_v5, %v1118_v18  ;;  %v333_v27 = vmul.f32 %v900_v5, %v1121_v19  ;;  %v1134_v28 = vld [vmem:[%s1101_s19 + $0xa0] sm:$0xff] }
  0x16   : > { %v1137_v29 = vld [vmem:[%s1101_s19 + $0xb0] sm:$0xff]  ;;  %v1140_v30 = vld [vmem:[%s1101_s19 + $0xc0] sm:$0xff]  ;;  %v351_v31 = vmul.f32 %v910_v7, %v901_v23  ;;  %v352_v36 = vmul.f32 %v910_v7, %v1134_v28 }
  0x17   : > { %v1146_v33 = vld [vmem:[%s1101_s19 + $0xd0] sm:$0xff]  ;;  %v1149_v34 = vld [vmem:[%s1101_s19 + $0xe0] sm:$0xff]  ;;  %v353_v37 = vmul.f32 %v910_v7, %v1137_v29  ;;  %v354_v38 = vmul.f32 %v910_v7, %v1140_v30 }
  0x18   : > { %v1152_v35 = vld [vmem:[%s1101_s19 + $0xf0] sm:$0xff]  ;;  %v1161_v40 = vld [vmem:[%s1101_s19 + $0x100] sm:$0xff]  ;;  %v355_v41 = vmul.f32 %v910_v7, %v1146_v33  ;;  %v356_v42 = vmul.f32 %v910_v7, %v1149_v34  ;;  %v359_v44 = vadd.f32 %v351_v31, %v326_v14  ;;  %v360_v48 = vadd.f32 %v352_v36, %v327_v15 }
  0x19   : > { %v357_v43 = vmul.f32 %v910_v7, %v1152_v35  ;;  %v367_v45 = vld [vmem:[%s1101_s19 + $0x1] sm:$0xff]  ;;  %v1168_v46 = vld [vmem:[%s1101_s19 + $0x11] sm:$0xff]  ;;  %v358_v47 = vmul.f32 %v910_v7, %v1161_v40  ;;  %v361_v49 = vadd.f32 %v353_v37, %v328_v16  ;;  %v362_v50 = vadd.f32 %v354_v38, %v329_v20 }
  0x1a   : > { %v1172_v51 = vld [vmem:[%s1101_s19 + $0x21] sm:$0xff]  ;;  %v1175_v52 = vld [vmem:[%s1101_s19 + $0x31] sm:$0xff]  ;;  %v363_v54 = vadd.f32 %v355_v41, %v330_v21  ;;  %v364_v55 = vadd.f32 %v356_v42, %v331_v22  ;;  %v383_v60 = vmul.f32 %v912_v24, %v367_v45  ;;  %v384_v62 = vmul.f32 %v912_v24, %v1168_v46 }
  0x1b   : > { %v1178_v53 = vld [vmem:[%s1101_s19 + $0x41] sm:$0xff]  ;;  %v365_v56 = vadd.f32 %v357_v43, %v332_v26  ;;  %v1181_v57 = vld [vmem:[%s1101_s19 + $0x51] sm:$0xff]  ;;  %v366_v61 = vadd.f32 %v358_v47, %v333_v27  ;;  %v385_v63 = vmul.f32 %v912_v24, %v1172_v51  ;;  %v386_v0 = vmul.f32 %v912_v24, %v1175_v52 }
  0x1c   : > { %v1184_v58 = vld [vmem:[%s1101_s19 + $0x61] sm:$0xff]  ;;  %v1187_v59 = vld [vmem:[%s1101_s19 + $0x71] sm:$0xff]  ;;  %v387_v4 = vmul.f32 %v912_v24, %v1178_v53  ;;  %v388_v5 = vmul.f32 %v912_v24, %v1181_v57  ;;  %v391_v12 = vadd.f32 %v383_v60, %v359_v44  ;;  %v392_v14 = vadd.f32 %v384_v62, %v360_v48 }
  0x1d   : > { %v913_v1 = vld [vmem:[%s1101_s19 + $0x120] sm:$0xff]  ;;  %v914_v2 = vld [vmem:[%s1101_s19 + $0x130] sm:$0xff]  ;;  %v389_v7 = vmul.f32 %v912_v24, %v1184_v58  ;;  %v390_v8 = vmul.f32 %v912_v24, %v1187_v59  ;;  %v393_v15 = vadd.f32 %v385_v63, %v361_v49  ;;  %v394_v16 = vadd.f32 %v386_v0, %v362_v50 }
  0x1e   : > { %v915_v9 = vld [vmem:[%s1101_s19 + $0x140] sm:$0xff]  ;;  %v916_v10 = vld [vmem:[%s1101_s19 + $0x150] sm:$0xff]  ;;  %v395_v23 = vadd.f32 %v387_v4, %v363_v54  ;;  %v396_v26 = vadd.f32 %v388_v5, %v364_v55  ;;  %v416_v24 = vmul.f32 %v922_v3, %v913_v1  ;;  %v417_v36 = vmul.f32 %v922_v3, %v914_v2 }
  0x1f   : > { %v917_v11 = vld [vmem:[%s1101_s19 + $0x160] sm:$0xff]  ;;  %v918_v20 = vld [vmem:[%s1101_s19 + $0x170] sm:$0xff]  ;;  %v397_v27 = vadd.f32 %v389_v7, %v365_v56  ;;  %v398_v31 = vadd.f32 %v390_v8, %v366_v61  ;;  %v418_v37 = vmul.f32 %v922_v3, %v915_v9  ;;  %v419_v38 = vmul.f32 %v922_v3, %v916_v10 }
  0x20   : > { %v919_v21 = vld [vmem:[%s1101_s19 + $0x180] sm:$0xff]  ;;  %v920_v22 = vld [vmem:[%s1101_s19 + $0x190] sm:$0xff]  ;;  %v420_v44 = vmul.f32 %v922_v3, %v917_v11  ;;  %v421_v45 = vmul.f32 %v922_v3, %v918_v20  ;;  %v424_v55 = vadd.f32 %v416_v24, %v391_v12  ;;  %v425_v56 = vadd.f32 %v417_v36, %v392_v14 }
  0x21   : > { %v923_v41 = vld [vmem:[%s1101_s19 + $0x1b0] sm:$0xff]  ;;  %v924_v42 = vld [vmem:[%s1101_s19 + $0x1c0] sm:$0xff]  ;;  %v422_v47 = vmul.f32 %v922_v3, %v919_v21  ;;  %v423_v48 = vmul.f32 %v922_v3, %v920_v22  ;;  %v426_v60 = vadd.f32 %v418_v37, %v393_v15  ;;  %v427_v61 = vadd.f32 %v419_v38, %v394_v16 }
  0x22   : > { %v932_v43 = vld [vmem:[%s1326_s1 + $0x4] ss:$0 sm:$0xff]  ;;  %v925_v49 = vld [vmem:[%s1101_s19 + $0x1d0] sm:$0xff]  ;;  %v428_v1 = vadd.f32 %v420_v44, %v395_v23  ;;  %v429_v2 = vadd.f32 %v421_v45, %v396_v26  ;;  %v942_v12 = vld [vmem:[%s1326_s1 + $0x5] ss:$0 sm:$0xff] }
  0x23   : > { %v926_v50 = vld [vmem:[%s1101_s19 + $0x1e0] sm:$0xff]  ;;  %v927_v54 = vld [vmem:[%s1101_s19 + $0x1f0] sm:$0xff]  ;;  %v430_v4 = vadd.f32 %v422_v47, %v397_v27  ;;  %v431_v5 = vadd.f32 %v423_v48, %v398_v31  ;;  %v449_v3 = vmul.f32 %v932_v43, %v923_v41  ;;  %v450_v7 = vmul.f32 %v932_v43, %v924_v42 }
  0x24   : > { %v928_v62 = vld [vmem:[%s1101_s19 + $0x200] sm:$0xff]  ;;  %v929_v63 = vld [vmem:[%s1101_s19 + $0x210] sm:$0xff]  ;;  %v451_v8 = vmul.f32 %v932_v43, %v925_v49  ;;  %v452_v9 = vmul.f32 %v932_v43, %v926_v50  ;;  %v453_v14 = vmul.f32 %v932_v43, %v927_v54 }
  0x25   : > { %v930_v0 = vld [vmem:[%s1101_s19 + $0x220] sm:$0xff]  ;;  %v934_v11 = vld [vmem:[%s1101_s19 + $0x131] sm:$0xff]  ;;  %v454_v15 = vmul.f32 %v932_v43, %v928_v62  ;;  %v455_v16 = vmul.f32 %v932_v43, %v929_v63  ;;  %v457_v26 = vadd.f32 %v449_v3, %v424_v55  ;;  %v458_v27 = vadd.f32 %v450_v7, %v425_v56 }
  0x26   : > { %v933_v10 = vld [vmem:[%s1101_s19 + $0x121] sm:$0xff]  ;;  %v456_v20 = vmul.f32 %v932_v43, %v930_v0  ;;  %v936_v22 = vld [vmem:[%s1101_s19 + $0x151] sm:$0xff]  ;;  %v459_v31 = vadd.f32 %v451_v8, %v426_v60  ;;  %v460_v24 = vadd.f32 %v452_v9, %v427_v61  ;;  %v461_v41 = vadd.f32 %v453_v14, %v428_v1 }
  0x27   : > { %v935_v21 = vld [vmem:[%s1101_s19 + $0x141] sm:$0xff]  ;;  %v938_v36 = vld [vmem:[%s1101_s19 + $0x171] sm:$0xff]  ;;  %v462_v42 = vadd.f32 %v454_v15, %v429_v2  ;;  %v463_v44 = vadd.f32 %v455_v16, %v430_v4  ;;  %v481_v47 = vmul.f32 %v942_v12, %v933_v10  ;;  %v482_v48 = vmul.f32 %v942_v12, %v934_v11 }
  0x28   : > { %v937_v23 = vld [vmem:[%s1101_s19 + $0x161] sm:$0xff]  ;;  %v940_v38 = vld [vmem:[%s1101_s19 + $0x191] sm:$0xff]  ;;  %v464_v45 = vadd.f32 %v456_v20, %v431_v5  ;;  %v483_v49 = vmul.f32 %v942_v12, %v935_v21  ;;  %v484_v50 = vmul.f32 %v942_v12, %v936_v22  ;;  %v486_v54 = vmul.f32 %v942_v12, %v938_v36 }
  0x29   : > { %v939_v37 = vld [vmem:[%s1101_s19 + $0x181] sm:$0xff]  ;;  %v485_v43 = vmul.f32 %v942_v12, %v937_v23  ;;  %v488_v63 = vmul.f32 %v942_v12, %v940_v38  ;;  %v489_v56 = vadd.f32 %v481_v47, %v457_v26  ;;  %v490_v60 = vadd.f32 %v482_v48, %v458_v27  ;;  %v960_v15 = vld [vmem:[%s1101_s19 + $0x110] sm:$0xff]  ;;  %v973_v47 = vld [vmem:[%s1327_s2] ss:$0 sm:$0xff] }
  0x2a   : > { %v487_v62 = vmul.f32 %v942_v12, %v939_v37  ;;  %v950_v55 = vld [vmem:[%s1101_s19 + $0x80] sm:$0xff]  ;;  %v491_v61 = vadd.f32 %v483_v49, %v459_v31  ;;  %v492_v0 = vadd.f32 %v484_v50, %v460_v24  ;;  %v494_v7 = vadd.f32 %v486_v54, %v462_v42  ;;  %v972_v26 = vld [vmem:[%s1326_s1 + $0x8] ss:$0 sm:$0xff] }
  0x2b   : > { %v493_v3 = vadd.f32 %v485_v43, %v461_v41  ;;  %v496_v2 = vadd.f32 %v488_v63, %v464_v45  ;;  %v518_v4 = vmul.f32 %v1096_v6, %v1112_v13  ;;  %v519_v5 = vmul.f32 %v1096_v6, %v1118_v18  ;;  %v962_v10 = vld [vmem:[%s1326_s1 + $0x7] ss:$0 sm:$0xff] }
  0x2c   : > { %v495_v1 = vadd.f32 %v487_v62, %v463_v44  ;;  %v520_v8 = vmul.f32 %v1096_v6, %v1121_v19  ;;  %v521_v9 = vmul.f32 %v1096_v6, %v950_v55  ;;  %v522_v11 = vadd.f32 %v1115_v17, %v489_v56 }
  0x2d   : > { %v523_v12 = vadd.f32 %v1129_v25, %v490_v60  ;;  %v524_v14 = vadd.f32 %v1143_v32, %v491_v61  ;;  %v525_v13 = vadd.f32 %v1158_v39, %v492_v0  ;;  %v526_v16 = vadd.f32 %v518_v4, %v493_v3 }
  0x2e   : > { %v527_v18 = vadd.f32 %v519_v5, %v494_v7  ;;  %v528_v20 = vadd.f32 %v520_v8, %v495_v1  ;;  %v529_v19 = vadd.f32 %v521_v9, %v496_v2  ;;  %v547_v6 = vmul.f32 %v962_v10, %v1134_v28 }
  0x2f   : > { %v548_v21 = vmul.f32 %v962_v10, %v1137_v29  ;;  %v549_v22 = vmul.f32 %v962_v10, %v1140_v30  ;;  %v550_v17 = vmul.f32 %v962_v10, %v1146_v33  ;;  %v551_v25 = vmul.f32 %v962_v10, %v1149_v34  ;;  %v970_v29 = vld [vmem:[%s1101_s19 + $0x81] sm:$0xff] }
  0x30   : > { %v552_v32 = vmul.f32 %v962_v10, %v1152_v35  ;;  %v553_v39 = vmul.f32 %v962_v10, %v1161_v40  ;;  %v554_v23 = vmul.f32 %v962_v10, %v960_v15  ;;  %v555_v27 = vadd.f32 %v547_v6, %v522_v11 }
  0x31   : > { %v556_v31 = vadd.f32 %v548_v21, %v523_v12  ;;  %v557_v28 = vadd.f32 %v549_v22, %v524_v14  ;;  %v558_v24 = vadd.f32 %v550_v17, %v525_v13  ;;  %v559_v36 = vadd.f32 %v551_v25, %v526_v16 }
  0x32   : > { %v560_v30 = vadd.f32 %v552_v32, %v527_v18  ;;  %v561_v37 = vadd.f32 %v553_v39, %v528_v20  ;;  %v562_v33 = vadd.f32 %v554_v23, %v529_v19  ;;  %v579_v34 = vmul.f32 %v972_v26, %v1168_v46 }
  0x33   : > { %v580_v35 = vmul.f32 %v972_v26, %v1172_v51  ;;  %v581_v40 = vmul.f32 %v972_v26, %v1175_v52  ;;  %v582_v38 = vmul.f32 %v972_v26, %v1178_v53  ;;  %v583_v41 = vmul.f32 %v972_v26, %v1181_v57  ;;  %v974_v53 = vld [vmem:[%s1328_s3] ss:$0 sm:$0xff] }
  0x34   : > { %v584_v42 = vmul.f32 %v972_v26, %v1184_v58  ;;  %v585_v44 = vmul.f32 %v972_v26, %v1187_v59  ;;  %v586_v45 = vmul.f32 %v972_v26, %v970_v29  ;;  %v587_v48 = vadd.f32 %v579_v34, %v555_v27 }
  0x35   : > { %v588_v49 = vadd.f32 %v580_v35, %v556_v31  ;;  %v589_v46 = vadd.f32 %v581_v40, %v557_v28  ;;  %v590_v50 = vadd.f32 %v582_v38, %v558_v24  ;;  %v591_v51 = vadd.f32 %v583_v41, %v559_v36  ;;  %v734_v35 = vld [vmem:[%s1331_s6] sm:$0xff] }
  0x36   : > { %v592_v43 = vadd.f32 %v584_v42, %v560_v30  ;;  %v593_v52 = vadd.f32 %v585_v44, %v561_v37  ;;  %v594_v54 = vadd.f32 %v586_v45, %v562_v33  ;;  %v602_v57 = vmul.f32 %v973_v47, %v587_v48  ;;  %994 = vmatpush3.msra.mxu1 %v734_v35  ;;  %v659_v40 = vld [vmem:[%s1330_s5] sm:$0x1] }
  0x37   : > { %v603_v58 = vmul.f32 %v973_v47, %v588_v49  ;;  %v604_v59 = vmul.f32 %v973_v47, %v589_v46  ;;  %v605_v62 = vmul.f32 %v973_v47, %v590_v50  ;;  %v606_v63 = vmul.f32 %v973_v47, %v591_v51  ;;  %v735_v45 = vld [vmem:[%s1332_s7] sm:$0x1] }
  0x38   : > { %v607_v55 = vmul.f32 %v973_v47, %v592_v43  ;;  %v608_v56 = vmul.f32 %v973_v47, %v593_v52  ;;  %v1269_v60 = vadd.f32 %v974_v53, %v602_v57  ;;  %v609_v7 = vmul.f32 %v973_v47, %v594_v54 }
  0x39   : > { %v1271_v61 = vadd.f32 %v974_v53, %v603_v58  ;;  %v1273_v0 = vadd.f32 %v974_v53, %v604_v59  ;;  %v1275_v3 = vadd.f32 %v974_v53, %v605_v62  ;;  %v1277_v1 = vadd.f32 %v974_v53, %v606_v63 }
  0x3a   : > { %v1279_v2 = vadd.f32 %v974_v53, %v607_v55  ;;  %v625_v4 = vmax.f32 %v1269_v60, 0.0  ;;  %v1285_v10 = vadd.f32 %v974_v53, %v608_v56  ;;  %v624_v16 = vadd.f32 %v974_v53, %v609_v7 }
  0x3b   : > { %v626_v5 = vmax.f32 %v1271_v61, 0.0  ;;  %v627_v8 = vmax.f32 %v1273_v0, 0.0  ;;  %v628_v9 = vmax.f32 %v1275_v3, 0.0  ;;  %v629_v11 = vmax.f32 %v1277_v1, 0.0 }
  0x3c   : > { %v634_v12 = vsel %vm633_vm1, %v625_v4, 0.0  ;;  %v630_v18 = vmax.f32 %v1279_v2, 0.0  ;;  %v631_v6 = vmax.f32 %v1285_v10, 0.0  ;;  %v632_v17 = vmax.f32 %v624_v16, 0.0 }
  0x3d   : > { %v635_v14 = vsel %vm633_vm1, %v626_v5, 0.0  ;;  %v637_v13 = vsel %vm633_vm1, %v627_v8, 0.0  ;;  %v639_v20 = vsel %vm633_vm1, %v628_v9, 0.0  ;;  %v641_v21 = vsel %vm633_vm1, %v629_v11, 0.0 }
  0x3e   : > { %v636_v15 = vadd.f32 %v635_v14, %v634_v12  ;;  %v643_v25 = vsel %vm633_vm1, %v630_v18, 0.0  ;;  %v645_v39 = vsel %vm633_vm1, %v631_v6, 0.0  ;;  %v647_v26 = vsel %vm633_vm1, %v632_v17, 0.0 }
  0x3f   : > { %v816_v43 = vlaneseq }
  0x40   : > { %v638_v19 = vadd.f32 %v637_v13, %v636_v15 }
  0x41   : > { %v817_v52 = vshrl.u32 %v816_v43, 7 }
  0x42   : > { %v640_v22 = vadd.f32 %v639_v20, %v638_v19 }
  0x43   : > { %v818_v54 = vsub.s32 0, %v817_v52 }
  0x44   : > { %v642_v32 = vadd.f32 %v641_v21, %v640_v22 }
  0x46   : > { %v644_v23 = vadd.f32 %v643_v25, %v642_v32 }
  0x48   : > { %v646_v27 = vadd.f32 %v645_v39, %v644_v23 }
  0x4a   : > { %v648_v31 = vadd.f32 %v647_v26, %v646_v27 }
  0x4c   : > { %v649_v28 = vsel %vm633_vm1, %v648_v31, 0.0 }
  0x4d   : > { %v650_v24 = vrot.slane %v649_v28, 4 }
  0x4f   : > { %v651_v29 = vadd.f32 %v650_v24, %v649_v28 }
  0x51   : > { %v652_v36 = vrot.slane %v651_v29, 2 }
  0x53   : > { %v653_v30 = vadd.f32 %v652_v36, %v651_v29 }
  0x55   : > { %v654_v37 = vrot.slane %v653_v30, 1 }
  0x57   : > { %v655_v33 = vadd.f32 %v654_v37, %v653_v30 }
  0x59   : > { %v656_v34 = vmul.f32 0.015625, %v655_v33 }
  0x5b   : > { %991 = vmatmul.mubr.msk.f32.vlgmr.msra.gmra.mrb[0].mxu0 %vm633_vm1, %v656_v34 }
 0x12e   : > { %v729_v38 = vpop.f32.mrb[0].mxu0 }
 0x12f   : > { %v730_v41 = vadd.f32 %v729_v38, %v659_v40  ;;  %v992_v42 = vpop.f32.mrb[1].mxu0 }
 0x131   : > { %v733_v44 = vmax.f32 %v730_v41, 0.0 }
 0x133   : > { %996 = vmatmul.mubr.msk.f32.vlgmr.msra.gmra.mrb[0].mxu1 %vm736_vm2, %v733_v44 }
 0x206   : > { %v806_v47 = vpop.f32.mrb[0].mxu1 }
 0x207   : > { %v807_v48 = vadd.f32 %v806_v47, %v735_v45  ;;  %v997_v49 = vpop.f32.mrb[1].mxu1 }
 0x209   : > { %v977_v46 = vmul.f32 -1.442695, %v807_v48 }
 0x20b   : > { %1013 = vpow2.f32 %v977_v46 }
 0x215   : > { %v1014_v50 = vpop.eup %1013 }
 0x216   : > { %v813_v51 = vadd.f32 1.0, %v1014_v50 }
 0x218   : > { %1015 = vrcp.f32 %v813_v51 }
 0x222   : > { %v1016_v53 = vpop.eup %1015 }
 0x223   : > { %v819_v57 = vrot.slane %v1016_v53, %v818_v54 }
 0x225   : > { %v820_v58 = vmul.f32 %v819_v57, %v625_v4  ;;  %v821_v59 = vmul.f32 %v819_v57, %v626_v5  ;;  %v822_v62 = vmul.f32 %v819_v57, %v627_v8  ;;  %v823_v63 = vmul.f32 %v819_v57, %v628_v9 }
 0x226   : > { %v824_v55 = vmul.f32 %v819_v57, %v629_v11  ;;  %v825_v56 = vmul.f32 %v819_v57, %v630_v18  ;;  %v826_v60 = vmul.f32 %v819_v57, %v631_v6  ;;  %v827_v61 = vmul.f32 %v819_v57, %v632_v17 }
 0x227   : > { %828 = vst.msk [vmem:[%s310_s29] sm:$0xff] %vm633_vm1, %v820_v58  ;;  %829 = vst.msk [vmem:[%s310_s29 + $0x8] sm:$0xff] %vm633_vm1, %v821_v59 }
 0x228   : > { %830 = vst.msk [vmem:[%s310_s29 + $0x10] sm:$0xff] %vm633_vm1, %v822_v62  ;;  %831 = vst.msk [vmem:[%s310_s29 + $0x18] sm:$0xff] %vm633_vm1, %v823_v63 }
 0x229   : > { %832 = vst.msk [vmem:[%s310_s29 + $0x20] sm:$0xff] %vm633_vm1, %v824_v55  ;;  %833 = vst.msk [vmem:[%s310_s29 + $0x28] sm:$0xff] %vm633_vm1, %v825_v56 }
 0x22a   : > { %834 = vst.msk [vmem:[%s310_s29 + $0x30] sm:$0xff] %vm633_vm1, %v826_v60  ;;  %835 = vst.msk [vmem:[%s310_s29 + $0x38] sm:$0xff] %vm633_vm1, %v827_v61 }
 0x22b PF: > { %s18_s27 = sadd.s32 1, %s1023_s27  }
 0x22c   : > { %p15_p5 = scmp.ge.s32.totalorder %s18_s27, 4  }
 0x22e   :  { %17 = sbr.rel (!%p15_p5) target bundleno = 1 (0x1), region = 95 }

// kernel: mobilenetv3_features.11
= control target key start
LH: loop header
LB: loop body
LE: loop exit
PB: predicated region body
PF: predicated region fallthrough
CT: control target
= control target key end

     0   :  { %vm47_vm0 = vcmask 130048   ;;  %s1076_s0 = inlined_call_operand.vmem [shape: f32[128,16], index: 0, kind: input, shape index: {}]   ;;  %s1077_s1 = inlined_call_operand.vmem [shape: f32[16,16], index: 1, kind: input, shape index: {}]   ;;  %s1078_s2 = inlined_call_operand.vmem [shape: f32[1,16], index: 2, kind: input, shape index: {}]   ;;  %s1079_s3 = inlined_call_operand.vmem [shape: f32[1,16], index: 3, kind: input, shape index: {}]   ;;  %s1080_s4 = inlined_call_operand.vmem [shape: f32[16,64], index: 4, kind: input, shape index: {}]   ;;  %s1081_s5 = inlined_call_operand.vmem [shape: f32[1,64], index: 5, kind: input, shape index: {}]   ;;  %s1082_s6 = inlined_call_operand.vmem [shape: f32[1,64], index: 6, kind: input, shape index: {}]   ;;  %s1083_s7 = inlined_call_operand.hbm [shape: f32[128,16], index: 7, kind: output, shape index: {0}]   ;;  %s1084_s8 = inlined_call_operand.vmem [shape: f32[128,64], index: 8, kind: output, shape index: {1}]  }
   0x1   :  { %v45_v0 = vld [vmem:[%s1077_s1] sm:$0xff]  ;;  %v46_v1 = vld [vmem:[%s1077_s1 + $0x8] sm:$0xff]  ;;  %v31_v5 = vld [vmem:[%s1076_s0 + $0x10] sm:$0xff] }
   0x2   :  { %v29_v2 = vld [vmem:[%s1076_s0] sm:$0xff]  ;;  %v725_v3 = vpack.c.bf16 %v46_v1, %v45_v0  ;;  %v30_v4 = vld [vmem:[%s1076_s0 + $0x8] sm:$0xff] }
   0x3   :  { %673 = vmatprep.mubr.msk.f32.mxu0 %vm47_vm0, %v29_v2 }
   0x4   :  { %726 = vmatprep.subr.bf16.mxu0 %v725_v3 }
   0x5   :  { %728 = vmatpush3.bf16.msra.mxu0 %v725_v3 }
   0x6   :  { %14 = vsyncpa [#allocation3], 0  ;;  %v32_v6 = vld [vmem:[%s1076_s0 + $0x18] sm:$0xff]  ;;  %v33_v7 = vld [vmem:[%s1076_s0 + $0x20] sm:$0xff] }
   0x7   :  { %v34_v8 = vld [vmem:[%s1076_s0 + $0x28] sm:$0xff]  ;;  %v35_v9 = vld [vmem:[%s1076_s0 + $0x30] sm:$0xff]  ;;  %v36_v10 = vld [vmem:[%s1076_s0 + $0x38] sm:$0xff] }
   0x8   :  { %674 = vmatmul.mubr.msk.f32.vlgmr.msra.gmra.mrb[0].mxu0 %vm47_vm0, %v30_v4  ;;  %v37_v11 = vld [vmem:[%s1076_s0 + $0x40] sm:$0xff]  ;;  %v38_v12 = vld [vmem:[%s1076_s0 + $0x48] sm:$0xff]  ;;  %v39_v13 = vld [vmem:[%s1076_s0 + $0x50] sm:$0xff] }
   0x9   :  { %676 = vmatprep.mubr.msk.f32.mxu0 %vm47_vm0, %v31_v5  ;;  %v40_v14 = vld [vmem:[%s1076_s0 + $0x58] sm:$0xff]  ;;  %v41_v15 = vld [vmem:[%s1076_s0 + $0x60] sm:$0xff]  ;;  %v42_v16 = vld [vmem:[%s1076_s0 + $0x68] sm:$0xff] }
   0xa   :  { %v43_v17 = vld [vmem:[%s1076_s0 + $0x70] sm:$0xff]  ;;  %v44_v18 = vld [vmem:[%s1076_s0 + $0x78] sm:$0xff]  ;;  %v303_v19 = vld [vmem:[%s1080_s4] sm:$0xff] }
   0xb   :  { %v304_v20 = vld [vmem:[%s1080_s4 + $0x8] sm:$0xff]  ;;  %v887_v22 = vld [vmem:[%s1078_s2] ss:$0 sm:$0xff]  ;;  %s760_s2 = smov [#allocation2]  }
   0xc   :  { %677 = vmatmul.mubr.msk.f32.gmra.mrb[2].mxu0 %vm47_vm0, %v32_v6  ;;  %v729_v21 = vpack.c.bf16 %v304_v20, %v303_v19  ;;  %v892_v24 = vld [vmem:[%s1079_s3] ss:$0 sm:$0xff]  ;;  %s582_s3 = sshll.u32 %s760_s2, 4  ;;  %s583_s3 = int_to_ptr.vmem [resolvable:$true] %s582_s3 }
   0xd   :  { %679 = vmatprep.mubr.msk.f32.mxu0 %vm47_vm0, %v33_v7  ;;  %s736_s4 = scalar_lea.vmem %s583_s3, 2048  ;;  %p741_p1 = scmp.lt.s32.totalorder %s583_s3, %s583_s3 }
   0xe   :  { %730 = vmatprep.subr.bf16.mxu1 %v729_v21  ;;  %p737_p0 = scmp.ne.s32.totalorder %s583_s3, %s736_s4  ;;  %p742_p2 = scmp.lt.s32.totalorder %s736_s4, %s736_s4 }
   0xf   :  { %732 = vmatpush3.bf16.msra.mxu1 %v729_v21 }
  0x10   :  { %680 = vmatmul.mubr.msk.f32.gmra.mrb[4].mxu0 %vm47_vm0, %v34_v8  ;;  %p743_p3 = por %p742_p2, %p741_p1 }
  0x11   :  { %682 = vmatprep.mubr.msk.f32.mxu0 %vm47_vm0, %v35_v9 }
  0x12   :  { %p744_p4 = pnand %p743_p3, %p737_p0 }
  0x14   :  { %683 = vmatmul.mubr.msk.f32.gmra.mrb[6].mxu0 %vm47_vm0, %v36_v10 }
  0x15   :  { %685 = vmatprep.mubr.msk.f32.mxu0 %vm47_vm0, %v37_v11 }
  0x18   :  { %686 = vmatmul.mubr.msk.f32.gmra.mrb[8].mxu0 %vm47_vm0, %v38_v12 }
  0x19   :  { %688 = vmatprep.mubr.msk.f32.mxu0 %vm47_vm0, %v39_v13 }
  0x1c   :  { %689 = vmatmul.mubr.msk.f32.gmra.mrb[10].mxu0 %vm47_vm0, %v40_v14 }
  0x1d   :  { %691 = vmatprep.mubr.msk.f32.mxu0 %vm47_vm0, %v41_v15 }
  0x20   :  { %692 = vmatmul.mubr.msk.f32.gmra.mrb[12].mxu0 %vm47_vm0, %v42_v16 }
  0x21   :  { %694 = vmatprep.mubr.msk.f32.mxu0 %vm47_vm0, %v43_v17 }
  0x24   :  { %695 = vmatmul.mubr.msk.f32.gmra.mrb[14].mxu0 %vm47_vm0, %v44_v18 }
  0xdb   :  { %v675_v23 = vpop.f32.mrb[0].mxu0 }
  0xdc   :  { %v249_v25 = vmul.f32 %v675_v23, %v887_v22  ;;  %v162_v26 = vpop.f32.mrb[1].mxu0 }
  0xdd   :  { %v248_v27 = vmul.f32 %v887_v22, %v162_v26 }
  0xde   :  { %v272_v28 = vadd.f32 %v892_v24, %v249_v25 }
  0xdf   :  { %v678_v29 = vpop.f32.mrb[2].mxu0  ;;  %v271_v30 = vadd.f32 %v892_v24, %v248_v27 }
  0xe0   :  { %288 = vst.msk [vmem:[#allocation2 + $0x8] sm:$0xff] %vm47_vm0, %v272_v28  ;;  %v251_v31 = vmul.f32 %v678_v29, %v887_v22  ;;  %v172_v32 = vpop.f32.mrb[3].mxu0 }
  0xe1   :  { %v250_v33 = vmul.f32 %v887_v22, %v172_v32  ;;  %287 = vst.msk [vmem:[#allocation2] sm:$0xff] %vm47_vm0, %v271_v30  ;;  %701 = vmatprep.mubr.msk.f32.mxu1 %vm47_vm0, %v271_v30 }
  0xe2   :  { %v274_v34 = vadd.f32 %v892_v24, %v251_v31  ;;  %702 = vmatmul.mubr.msk.f32.vlgmr.msra.gmra.mrb[0].mxu1 %vm47_vm0, %v272_v28 }
  0xe3   :  { %v273_v35 = vadd.f32 %v892_v24, %v250_v33  ;;  %v681_v36 = vpop.f32.mrb[4].mxu0 }
  0xe4   :  { %290 = vst.msk [vmem:[#allocation2 + $0x18] sm:$0xff] %vm47_vm0, %v274_v34  ;;  %v253_v37 = vmul.f32 %v681_v36, %v887_v22  ;;  %v182_v38 = vpop.f32.mrb[5].mxu0 }
  0xe5   :  { %289 = vst.msk [vmem:[#allocation2 + $0x10] sm:$0xff] %vm47_vm0, %v273_v35  ;;  %v252_v39 = vmul.f32 %v887_v22, %v182_v38  ;;  %704 = vmatprep.mubr.msk.f32.mxu1 %vm47_vm0, %v273_v35 }
  0xe6   :  { %v276_v40 = vadd.f32 %v892_v24, %v253_v37  ;;  %705 = vmatmul.mubr.msk.f32.gmra.mrb[2].mxu1 %vm47_vm0, %v274_v34 }
  0xe7   :  { %v275_v41 = vadd.f32 %v892_v24, %v252_v39  ;;  %v684_v42 = vpop.f32.mrb[6].mxu0 }
  0xe8   :  { %292 = vst.msk [vmem:[#allocation2 + $0x28] sm:$0xff] %vm47_vm0, %v276_v40  ;;  %v255_v43 = vmul.f32 %v684_v42, %v887_v22  ;;  %v192_v44 = vpop.f32.mrb[7].mxu0 }
  0xe9   :  { %291 = vst.msk [vmem:[#allocation2 + $0x20] sm:$0xff] %vm47_vm0, %v275_v41  ;;  %v254_v45 = vmul.f32 %v887_v22, %v192_v44  ;;  %707 = vmatprep.mubr.msk.f32.mxu1 %vm47_vm0, %v275_v41 }
  0xea   :  { %v278_v46 = vadd.f32 %v892_v24, %v255_v43  ;;  %708 = vmatmul.mubr.msk.f32.gmra.mrb[4].mxu1 %vm47_vm0, %v276_v40 }
  0xeb   :  { %v277_v47 = vadd.f32 %v892_v24, %v254_v45  ;;  %v687_v48 = vpop.f32.mrb[8].mxu0 }
  0xec   :  { %294 = vst.msk [vmem:[#allocation2 + $0x38] sm:$0xff] %vm47_vm0, %v278_v46  ;;  %v257_v49 = vmul.f32 %v687_v48, %v887_v22  ;;  %v202_v50 = vpop.f32.mrb[9].mxu0 }
  0xed   :  { %293 = vst.msk [vmem:[#allocation2 + $0x30] sm:$0xff] %vm47_vm0, %v277_v47  ;;  %v256_v51 = vmul.f32 %v887_v22, %v202_v50  ;;  %710 = vmatprep.mubr.msk.f32.mxu1 %vm47_vm0, %v277_v47 }
  0xee   :  { %v280_v52 = vadd.f32 %v892_v24, %v257_v49  ;;  %711 = vmatmul.mubr.msk.f32.gmra.mrb[6].mxu1 %vm47_vm0, %v278_v46 }
  0xef   :  { %v279_v53 = vadd.f32 %v892_v24, %v256_v51  ;;  %v690_v54 = vpop.f32.mrb[10].mxu0 }
  0xf0   :  { %296 = vst.msk [vmem:[#allocation2 + $0x48] sm:$0xff] %vm47_vm0, %v280_v52  ;;  %v259_v55 = vmul.f32 %v690_v54, %v887_v22  ;;  %v212_v56 = vpop.f32.mrb[11].mxu0 }
  0xf1   :  { %295 = vst.msk [vmem:[#allocation2 + $0x40] sm:$0xff] %vm47_vm0, %v279_v53  ;;  %v258_v57 = vmul.f32 %v887_v22, %v212_v56  ;;  %713 = vmatprep.mubr.msk.f32.mxu1 %vm47_vm0, %v279_v53 }
  0xf2   :  { %v282_v58 = vadd.f32 %v892_v24, %v259_v55  ;;  %714 = vmatmul.mubr.msk.f32.gmra.mrb[8].mxu1 %vm47_vm0, %v280_v52 }
  0xf3   :  { %v281_v59 = vadd.f32 %v892_v24, %v258_v57  ;;  %v693_v60 = vpop.f32.mrb[12].mxu0 }
  0xf4   :  { %298 = vst.msk [vmem:[#allocation2 + $0x58] sm:$0xff] %vm47_vm0, %v282_v58  ;;  %v261_v61 = vmul.f32 %v693_v60, %v887_v22  ;;  %v222_v62 = vpop.f32.mrb[13].mxu0 }
  0xf5   :  { %297 = vst.msk [vmem:[#allocation2 + $0x50] sm:$0xff] %vm47_vm0, %v281_v59  ;;  %v260_v63 = vmul.f32 %v887_v22, %v222_v62  ;;  %716 = vmatprep.mubr.msk.f32.mxu1 %vm47_vm0, %v281_v59 }
  0xf6   :  { %v284_v0 = vadd.f32 %v892_v24, %v261_v61  ;;  %717 = vmatmul.mubr.msk.f32.gmra.mrb[10].mxu1 %vm47_vm0, %v282_v58 }
  0xf7   :  { %v283_v1 = vadd.f32 %v892_v24, %v260_v63  ;;  %v696_v2 = vpop.f32.mrb[14].mxu0 }
  0xf8   :  { %300 = vst.msk [vmem:[#allocation2 + $0x68] sm:$0xff] %vm47_vm0, %v284_v0  ;;  %v263_v3 = vmul.f32 %v696_v2, %v887_v22  ;;  %v232_v4 = vpop.f32.mrb[15].mxu0 }
  0xf9   :  { %299 = vst.msk [vmem:[#allocation2 + $0x60] sm:$0xff] %vm47_vm0, %v283_v1  ;;  %v262_v5 = vmul.f32 %v887_v22, %v232_v4  ;;  %719 = vmatprep.mubr.msk.f32.mxu1 %vm47_vm0, %v283_v1 }
  0xfa   :  { %v286_v6 = vadd.f32 %v892_v24, %v263_v3  ;;  %720 = vmatmul.mubr.msk.f32.gmra.mrb[12].mxu1 %vm47_vm0, %v284_v0 }
  0xfb   :  { %v285_v7 = vadd.f32 %v892_v24, %v262_v5 }
  0xfc   :  { %302 = vst.msk [vmem:[#allocation2 + $0x78] sm:$0xff] %vm47_vm0, %v286_v6 }
  0xfd   :  { %301 = vst.msk [vmem:[#allocation2 + $0x70] sm:$0xff] %vm47_vm0, %v285_v7  ;;  %722 = vmatprep.mubr.msk.f32.mxu1 %vm47_vm0, %v285_v7 }
  0xfe   :  { %723 = vmatmul.mubr.msk.f32.gmra.mrb[14].mxu1 %vm47_vm0, %v286_v6 }
  0xff   :  { %747 = shalt.err (!%p744_p4)
}
 0x100   :  { %s748_s26 = scalar_lea.hbm %s1083_s7, 2048 }
 0x101   :  { %p749_p5 = scmp.ne.s32.totalorder %s1083_s7, %s748_s26  ;;  %p752_p6 = scmp.lt.u32.totalorder %s748_s26, %s1083_s7 }
 0x103   :  { %p754_p7 = pnand %p752_p6, %p749_p5 }
 0x105   :  { %757 = shalt.err (!%p754_p7)
}
 0x106   :  { %s761_s9 = smov 128   ;;  %s762_s10 = smov 8   ;;  %v973_v8 = vld [vmem:[%s1081_s5] ss:$0 sm:$0xff]  ;;  %vm560_vm1 = vcmask 523264  }
 0x107   :  { %588 = dma.vmem_to_hbm [thread:$0]  %s583_s3, 2048, %s1083_s7, [#allocation3], %s761_s9, %s761_s9, %s762_s10  }
 0x108   :  { %v978_v10 = vld [vmem:[%s1082_s6] ss:$0 sm:$0xff] }
 0x1b5   :  { %v703_v9 = vpop.f32.mrb[0].mxu1 }
 0x1b6   :  { %v506_v11 = vmul.f32 %v703_v9, %v973_v8  ;;  %v419_v12 = vpop.f32.mrb[1].mxu1 }
 0x1b7   :  { %v505_v13 = vmul.f32 %v973_v8, %v419_v12 }
 0x1b8   :  { %v529_v14 = vadd.f32 %v978_v10, %v506_v11 }
 0x1b9   :  { %v528_v15 = vadd.f32 %v978_v10, %v505_v13  ;;  %v706_v16 = vpop.f32.mrb[2].mxu1 }
 0x1ba   :  { %v545_v17 = vmax.f32 %v529_v14, 0.0  ;;  %v508_v18 = vmul.f32 %v706_v16, %v973_v8  ;;  %v429_v19 = vpop.f32.mrb[3].mxu1 }
 0x1bb   :  { %v544_v20 = vmax.f32 %v528_v15, 0.0  ;;  %v507_v21 = vmul.f32 %v973_v8, %v429_v19 }
 0x1bc   :  { %562 = vst.msk [vmem:[%s1084_s8 + $0x8] sm:$0xff] %vm560_vm1, %v545_v17  ;;  %v531_v22 = vadd.f32 %v978_v10, %v508_v18 }
 0x1bd   :  { %561 = vst.msk [vmem:[%s1084_s8] sm:$0xff] %vm560_vm1, %v544_v20  ;;  %v530_v23 = vadd.f32 %v978_v10, %v507_v21  ;;  %v709_v24 = vpop.f32.mrb[4].mxu1 }
 0x1be   :  { %v547_v25 = vmax.f32 %v531_v22, 0.0  ;;  %v510_v26 = vmul.f32 %v709_v24, %v973_v8  ;;  %v439_v27 = vpop.f32.mrb[5].mxu1 }
 0x1bf   :  { %v546_v28 = vmax.f32 %v530_v23, 0.0  ;;  %v509_v29 = vmul.f32 %v973_v8, %v439_v27 }
 0x1c0   :  { %564 = vst.msk [vmem:[%s1084_s8 + $0x18] sm:$0xff] %vm560_vm1, %v547_v25  ;;  %v533_v30 = vadd.f32 %v978_v10, %v510_v26 }
 0x1c1   :  { %563 = vst.msk [vmem:[%s1084_s8 + $0x10] sm:$0xff] %vm560_vm1, %v546_v28  ;;  %v532_v31 = vadd.f32 %v978_v10, %v509_v29  ;;  %v712_v32 = vpop.f32.mrb[6].mxu1 }
 0x1c2   :  { %v549_v33 = vmax.f32 %v533_v30, 0.0  ;;  %v512_v34 = vmul.f32 %v712_v32, %v973_v8  ;;  %v449_v35 = vpop.f32.mrb[7].mxu1 }
 0x1c3   :  { %v548_v36 = vmax.f32 %v532_v31, 0.0  ;;  %v511_v37 = vmul.f32 %v973_v8, %v449_v35 }
 0x1c4   :  { %566 = vst.msk [vmem:[%s1084_s8 + $0x28] sm:$0xff] %vm560_vm1, %v549_v33  ;;  %v535_v38 = vadd.f32 %v978_v10, %v512_v34 }
 0x1c5   :  { %565 = vst.msk [vmem:[%s1084_s8 + $0x20] sm:$0xff] %vm560_vm1, %v548_v36  ;;  %v534_v39 = vadd.f32 %v978_v10, %v511_v37  ;;  %v715_v40 = vpop.f32.mrb[8].mxu1 }
 0x1c6   :  { %v551_v41 = vmax.f32 %v535_v38, 0.0  ;;  %v514_v42 = vmul.f32 %v715_v40, %v973_v8  ;;  %v459_v43 = vpop.f32.mrb[9].mxu1 }
 0x1c7   :  { %v550_v44 = vmax.f32 %v534_v39, 0.0  ;;  %v513_v45 = vmul.f32 %v973_v8, %v459_v43 }
 0x1c8   :  { %568 = vst.msk [vmem:[%s1084_s8 + $0x38] sm:$0xff] %vm560_vm1, %v551_v41  ;;  %v537_v46 = vadd.f32 %v978_v10, %v514_v42 }
 0x1c9   :  { %567 = vst.msk [vmem:[%s1084_s8 + $0x30] sm:$0xff] %vm560_vm1, %v550_v44  ;;  %v536_v47 = vadd.f32 %v978_v10, %v513_v45  ;;  %v718_v48 = vpop.f32.mrb[10].mxu1 }
 0x1ca   :  { %v553_v49 = vmax.f32 %v537_v46, 0.0  ;;  %v516_v50 = vmul.f32 %v718_v48, %v973_v8  ;;  %v469_v51 = vpop.f32.mrb[11].mxu1 }
 0x1cb   :  { %v552_v52 = vmax.f32 %v536_v47, 0.0  ;;  %v515_v53 = vmul.f32 %v973_v8, %v469_v51 }
 0x1cc   :  { %570 = vst.msk [vmem:[%s1084_s8 + $0x48] sm:$0xff] %vm560_vm1, %v553_v49  ;;  %v539_v54 = vadd.f32 %v978_v10, %v516_v50 }
 0x1cd   :  { %569 = vst.msk [vmem:[%s1084_s8 + $0x40] sm:$0xff] %vm560_vm1, %v552_v52  ;;  %v538_v55 = vadd.f32 %v978_v10, %v515_v53  ;;  %v721_v56 = vpop.f32.mrb[12].mxu1 }
 0x1ce   :  { %v555_v57 = vmax.f32 %v539_v54, 0.0  ;;  %v518_v58 = vmul.f32 %v721_v56, %v973_v8  ;;  %v479_v59 = vpop.f32.mrb[13].mxu1 }
 0x1cf   :  { %v554_v60 = vmax.f32 %v538_v55, 0.0  ;;  %v517_v61 = vmul.f32 %v973_v8, %v479_v59 }
 0x1d0   :  { %572 = vst.msk [vmem:[%s1084_s8 + $0x58] sm:$0xff] %vm560_vm1, %v555_v57  ;;  %v541_v62 = vadd.f32 %v978_v10, %v518_v58 }
 0x1d1   :  { %571 = vst.msk [vmem:[%s1084_s8 + $0x50] sm:$0xff] %vm560_vm1, %v554_v60  ;;  %v540_v63 = vadd.f32 %v978_v10, %v517_v61  ;;  %v724_v0 = vpop.f32.mrb[14].mxu1 }
 0x1d2   :  { %v557_v1 = vmax.f32 %v541_v62, 0.0  ;;  %v520_v2 = vmul.f32 %v724_v0, %v973_v8  ;;  %v489_v3 = vpop.f32.mrb[15].mxu1 }
 0x1d3   :  { %v556_v4 = vmax.f32 %v540_v63, 0.0  ;;  %v519_v5 = vmul.f32 %v973_v8, %v489_v3 }
 0x1d4   :  { %574 = vst.msk [vmem:[%s1084_s8 + $0x68] sm:$0xff] %vm560_vm1, %v557_v1  ;;  %v543_v6 = vadd.f32 %v978_v10, %v520_v2 }
 0x1d5   :  { %573 = vst.msk [vmem:[%s1084_s8 + $0x60] sm:$0xff] %vm560_vm1, %v556_v4  ;;  %v542_v7 = vadd.f32 %v978_v10, %v519_v5 }
 0x1d6   :  { %v559_v9 = vmax.f32 %v543_v6, 0.0 }
 0x1d7   :  { %v558_v11 = vmax.f32 %v542_v7, 0.0 }
 0x1d8   :  { %576 = vst.msk [vmem:[%s1084_s8 + $0x78] sm:$0xff] %vm560_vm1, %v559_v9 }
 0x1d9   :  { %575 = vst.msk [vmem:[%s1084_s8 + $0x70] sm:$0xff] %vm560_vm1, %v558_v11 }
 0x1da   :  { %758 = dma.done.wait [#allocation3], 2048  }
 0x1db   :  { %759 = vsyncadd [#allocation3], 4294965248 }
 0x1dc   :  { %596 = vsyncpa [#allocation3], 1 }

// kernel: mobilenetv3_features.12
= control target key start
LH: loop header
LB: loop body
LE: loop exit
PB: predicated region body
PF: predicated region fallthrough
CT: control target
= control target key end

     0   :  { %s570_s15 = smov 0   ;;  %s714_s0 = inlined_call_operand.vmem [shape: f32[8,5,5,64], index: 0, kind: input, shape index: {}]   ;;  %s715_s1 = inlined_call_operand.vmem [shape: f32[9,1,64], index: 1, kind: input, shape index: {}]   ;;  %s716_s2 = inlined_call_operand.vmem [shape: f32[1,64], index: 2, kind: input, shape index: {}]   ;;  %s717_s3 = inlined_call_operand.vmem [shape: f32[1,64], index: 3, kind: input, shape index: {}]   ;;  %s718_s4 = inlined_call_operand.vmem [shape: f32[2,4,4,64], index: 4, kind: output, shape index: {}]  }
   0x1 LB: > { %s576_s16 = sadd.s32 4294967295, %s543_s15   ;;  %p473_p0 = scmp.ge.s32.totalorder %s543_s15, 1  ;;  %s543_s15 = sphi %s570_s15, %s14_s15  }
   0x2   : > { %p164_p1 = scmp.lt.s32.totalorder %s543_s15, 3 }
   0x4   : > { %p165_p2 = pnand %p473_p0, %p164_p1 }
   0x5   : > { %s474_s17 = sshll.u32 (!%p165_p2), %s576_s16, 2  ;;  %v478_v0 = vld [vmem:[%s715_s1] ss:$0 sm:$0xff] (!%p165_p2)  ;;  %v484_v1 = vld [vmem:[%s715_s1 + $0x1] ss:$0 sm:$0xff] (!%p165_p2)  ;;  %p198_p4 = scmp.lt.s32.totalorder (!%p165_p2), %s576_s16, 1 }
   0x6   : > { %168 = sbr.rel (%p165_p2) target bundleno = 50 (0x32), region = 36  ;;  %p192_p3 = scmp.lt.s32.totalorder (!%p165_p2), %s474_s17, 7  ;;  %v590_v2 = vld [vmem:[%s715_s1 + $0x2] ss:$0 sm:$0xff] (!%p165_p2)  ;;  %v600_v3 = vld [vmem:[%s715_s1 + $0x3] ss:$0 sm:$0xff] (!%p165_p2) }
   0x7   : > { %v610_v11 = vld [vmem:[%s715_s1 + $0x4] ss:$0 sm:$0xff] (!%p165_p2)  ;;  %v617_v14 = vld [vmem:[%s715_s1 + $0x5] ss:$0 sm:$0xff] (!%p165_p2)  ;;  %v626_v20 = vld [vmem:[%s715_s1 + $0x6] ss:$0 sm:$0xff] (!%p165_p2) }
   0x8   : > { %v631_v21 = vld [vmem:[%s715_s1 + $0x7] ss:$0 sm:$0xff] (!%p165_p2)  ;;  %v651_v44 = vld [vmem:[%s715_s1 + $0x8] ss:$0 sm:$0xff] (!%p165_p2)  ;;  %vm409_vm0 = vcmask (!%p165_p2), 519168  }
   0xd   : > { %s720_s17 = smov (!%p192_p3, %s474_s17), 7  ;;  %s722_s16 = smov (!%p198_p4, %s576_s16), 1 }
   0xe   : > { %s528_s18 = smul.u32 40, %s720_s17  ;;  %s527_s20 = sshll.u32 %s722_s16, 4 }
   0xf   : > { %s202_s23 = scalar_lea.vmem %s718_s4, %s527_s20 }
  0x10   : > { %s595_s27 = scalar_lea.vmem %s714_s0, %s528_s18 }
  0x11   : > { %v203_v4 = vld [vmem:[%s595_s27] sm:$0xf]  ;;  %v479_v5 = vld [vmem:[%s595_s27 + $0x28] sm:$0xf]  ;;  %v487_v10 = vld [vmem:[%s595_s27 + $0x50] sm:$0xf] }
  0x12   : > { %v239_v6 = vld [vmem:[%s595_s27 + $0x1] sm:$0xf]  ;;  %v214_v7 = vmul.f32 %v478_v0, %v203_v4  ;;  %v231_v8 = vmul.f32 %v484_v1, %v479_v5  ;;  %v493_v12 = vld [vmem:[%s595_s27 + $0x78] sm:$0xf]  ;;  %v499_v13 = vld [vmem:[%s595_s27 + $0x51] sm:$0xf]  ;;  %v272_v16 = vmul.f32 %v600_v3, %v487_v10 }
  0x13   : > { %v251_v9 = vmul.f32 %v590_v2, %v239_v6  ;;  %v204_v17 = vld [vmem:[%s595_s27 + $0x8] sm:$0xf]  ;;  %v480_v18 = vld [vmem:[%s595_s27 + $0x30] sm:$0xf]  ;;  %v488_v25 = vld [vmem:[%s595_s27 + $0x58] sm:$0xf]  ;;  %v293_v27 = vmul.f32 %v610_v11, %v493_v12  ;;  %v313_v31 = vmul.f32 %v617_v14, %v499_v13 }
  0x14   : > { %v235_v15 = vadd.f32 %v231_v8, %v214_v7  ;;  %v240_v19 = vld [vmem:[%s595_s27 + $0x9] sm:$0xf]  ;;  %v215_v22 = vmul.f32 %v478_v0, %v204_v17  ;;  %v232_v23 = vmul.f32 %v484_v1, %v480_v18  ;;  %v511_v29 = vld [vmem:[%s595_s27 + $0x30] sm:$0xf]  ;;  %v494_v30 = vld [vmem:[%s595_s27 + $0x80] sm:$0xf]  ;;  %v273_v33 = vmul.f32 %v600_v3, %v488_v25 }
  0x15   : > { %v252_v24 = vmul.f32 %v590_v2, %v240_v19  ;;  %v505_v28 = vld [vmem:[%s595_s27 + $0x8] sm:$0xf]  ;;  %v205_v34 = vld [vmem:[%s595_s27 + $0x10] sm:$0xf]  ;;  %v481_v35 = vld [vmem:[%s595_s27 + $0x38] sm:$0xf]  ;;  %v294_v46 = vmul.f32 %v610_v11, %v494_v30  ;;  %v355_v50 = vmul.f32 %v631_v21, %v511_v29 }
  0x16   : > { %v255_v26 = vadd.f32 %v251_v9, %v235_v15  ;;  %v236_v32 = vadd.f32 %v232_v23, %v215_v22  ;;  %v241_v36 = vld [vmem:[%s595_s27 + $0x11] sm:$0xf]  ;;  %v500_v38 = vld [vmem:[%s595_s27 + $0x59] sm:$0xf]  ;;  %v216_v39 = vmul.f32 %v478_v0, %v205_v34  ;;  %v233_v40 = vmul.f32 %v484_v1, %v481_v35  ;;  %v489_v42 = vld [vmem:[%s595_s27 + $0x60] sm:$0xf] }
  0x17   : > { %v253_v41 = vmul.f32 %v590_v2, %v241_v36  ;;  %v334_v43 = vmul.f32 %v626_v20, %v505_v28  ;;  %v506_v47 = vld [vmem:[%s595_s27 + $0x10] sm:$0xf]  ;;  %v495_v48 = vld [vmem:[%s595_s27 + $0x88] sm:$0xf]  ;;  %v274_v52 = vmul.f32 %v600_v3, %v489_v42  ;;  %v206_v53 = vld [vmem:[%s595_s27 + $0x18] sm:$0xf]  ;;  %v314_v58 = vmul.f32 %v617_v14, %v500_v38 }
  0x18   : > { %v276_v37 = vadd.f32 %v272_v16, %v255_v26  ;;  %v256_v45 = vadd.f32 %v252_v24, %v236_v32  ;;  %v237_v51 = vadd.f32 %v233_v40, %v216_v39  ;;  %v482_v54 = vld [vmem:[%s595_s27 + $0x40] sm:$0xf]  ;;  %v242_v55 = vld [vmem:[%s595_s27 + $0x19] sm:$0xf]  ;;  %v517_v56 = vld [vmem:[%s595_s27 + $0x9] sm:$0xf]  ;;  %v217_v60 = vmul.f32 %v478_v0, %v206_v53 }
  0x19   : > { %v501_v59 = vld [vmem:[%s595_s27 + $0x61] sm:$0xf]  ;;  %v234_v61 = vmul.f32 %v484_v1, %v482_v54  ;;  %v490_v62 = vld [vmem:[%s595_s27 + $0x68] sm:$0xf]  ;;  %v512_v4 = vld [vmem:[%s595_s27 + $0x38] sm:$0xf]  ;;  %v295_v6 = vmul.f32 %v610_v11, %v495_v48  ;;  %v254_v7 = vmul.f32 %v590_v2, %v242_v55  ;;  %v335_v10 = vmul.f32 %v626_v20, %v506_v47 }
  0x1a   : > { %v297_v49 = vadd.f32 %v293_v27, %v276_v37  ;;  %v277_v57 = vadd.f32 %v273_v33, %v256_v45  ;;  %v257_v5 = vadd.f32 %v253_v41, %v237_v51  ;;  %v496_v8 = vld [vmem:[%s595_s27 + $0x90] sm:$0xf]  ;;  %v507_v0 = vld [vmem:[%s595_s27 + $0x18] sm:$0xf]  ;;  %v275_v12 = vmul.f32 %v600_v3, %v490_v62  ;;  %v502_v2 = vld [vmem:[%s595_s27 + $0x69] sm:$0xf] }
  0x1b   : > { %v238_v1 = vadd.f32 %v234_v61, %v217_v60  ;;  %v375_v15 = vmul.f32 %v651_v44, %v517_v56  ;;  %v518_v16 = vld [vmem:[%s595_s27 + $0x11] sm:$0xf]  ;;  %v315_v18 = vmul.f32 %v617_v14, %v501_v59  ;;  %v356_v22 = vmul.f32 %v631_v21, %v512_v4  ;;  %v513_v23 = vld [vmem:[%s595_s27 + $0x40] sm:$0xf]  ;;  %v519_v32 = vld [vmem:[%s595_s27 + $0x19] sm:$0xf] }
  0x1c   : > { %v317_v63 = vadd.f32 %v313_v31, %v297_v49  ;;  %v298_v9 = vadd.f32 %v294_v46, %v277_v57  ;;  %v278_v17 = vadd.f32 %v274_v52, %v257_v5  ;;  %v296_v25 = vmul.f32 %v610_v11, %v496_v8  ;;  %v508_v28 = vld [vmem:[%s595_s27 + $0x20] sm:$0xf]  ;;  %v514_v37 = vld [vmem:[%s595_s27 + $0x48] sm:$0xf] }
  0x1d   : > { %v258_v24 = vadd.f32 %v254_v7, %v238_v1  ;;  %v336_v27 = vmul.f32 %v626_v20, %v507_v0  ;;  %v523_v29 = vld [vmem:[%s716_s2] ss:$0 sm:$0xff]  ;;  %v376_v31 = vmul.f32 %v651_v44, %v518_v16  ;;  %v316_v11 = vmul.f32 %v617_v14, %v502_v2  ;;  %v520_v46 = vld [vmem:[%s595_s27 + $0x21] sm:$0xf] }
  0x1e   : > { %v338_v13 = vadd.f32 %v334_v43, %v317_v63  ;;  %v318_v19 = vadd.f32 %v314_v58, %v298_v9  ;;  %v299_v26 = vadd.f32 %v295_v6, %v278_v17  ;;  %v357_v36 = vmul.f32 %v631_v21, %v513_v23  ;;  %v524_v38 = vld [vmem:[%s717_s3] ss:$0 sm:$0xff] }
  0x1f   : > { %v279_v33 = vadd.f32 %v275_v12, %v258_v24  ;;  %v337_v41 = vmul.f32 %v626_v20, %v508_v28  ;;  %v377_v45 = vmul.f32 %v651_v44, %v519_v32  ;;  %v358_v48 = vmul.f32 %v631_v21, %v514_v37 }
  0x20   : > { %v359_v3 = vadd.f32 %v355_v50, %v338_v13  ;;  %v339_v30 = vadd.f32 %v335_v10, %v318_v19  ;;  %v319_v35 = vadd.f32 %v315_v18, %v299_v26  ;;  %v378_v20 = vmul.f32 %v651_v44, %v520_v46 }
  0x21   : > { %v300_v40 = vadd.f32 %v296_v25, %v279_v33 }
  0x22   : > { %v379_v34 = vadd.f32 %v375_v15, %v359_v3  ;;  %v360_v39 = vadd.f32 %v356_v22, %v339_v30  ;;  %v340_v43 = vadd.f32 %v336_v27, %v319_v35 }
  0x23   : > { %v320_v47 = vadd.f32 %v316_v11, %v300_v40 }
  0x24   : > { %v390_v42 = vmul.f32 %v523_v29, %v379_v34  ;;  %v380_v14 = vadd.f32 %v376_v31, %v360_v39  ;;  %v361_v50 = vadd.f32 %v357_v36, %v340_v43 }
  0x25   : > { %v341_v52 = vadd.f32 %v337_v41, %v320_v47 }
  0x26   : > { %v401_v49 = vadd.f32 %v524_v38, %v390_v42  ;;  %v391_v51 = vmul.f32 %v523_v29, %v380_v14  ;;  %v381_v54 = vadd.f32 %v377_v45, %v361_v50 }
  0x27   : > { %v362_v56 = vadd.f32 %v358_v48, %v341_v52 }
  0x28   : > { %v405_v53 = vmax.f32 %v401_v49, 0.0  ;;  %v402_v55 = vadd.f32 %v524_v38, %v391_v51  ;;  %v392_v57 = vmul.f32 %v523_v29, %v381_v54 }
  0x29   : > { %v382_v21 = vadd.f32 %v378_v20, %v362_v56 }
  0x2a   : > { %410 = vst.msk [vmem:[%s202_s23] sm:$0xf] %vm409_vm0, %v405_v53  ;;  %v406_v58 = vmax.f32 %v402_v55, 0.0  ;;  %v403_v59 = vadd.f32 %v524_v38, %v392_v57 }
  0x2b   : > { %v393_v60 = vmul.f32 %v523_v29, %v382_v21 }
  0x2c   : > { %411 = vst.msk [vmem:[%s202_s23 + $0x4] sm:$0xf] %vm409_vm0, %v406_v58  ;;  %v407_v61 = vmax.f32 %v403_v59, 0.0 }
  0x2d   : > { %v404_v62 = vadd.f32 %v524_v38, %v393_v60 }
  0x2e   : > { %412 = vst.msk [vmem:[%s202_s23 + $0x8] sm:$0xf] %vm409_vm0, %v407_v61 }
  0x2f   : > { %v408_v63 = vmax.f32 %v404_v62, 0.0 }
  0x31   : > { %413 = vst.msk [vmem:[%s202_s23 + $0xc] sm:$0xf] %vm409_vm0, %v408_v63 }
  0x32 PF: > { %s14_s15 = sadd.s32 1, %s543_s15  }
  0x33   : > { %p11_p5 = scmp.ge.s32.totalorder %s14_s15, 4  }
  0x35   :  { %13 = sbr.rel (!%p11_p5) target bundleno = 1 (0x1), region = 79 }

// kernel: mobilenetv3_features.13
= control target key start
LH: loop header
LB: loop body
LE: loop exit
PB: predicated region body
PF: predicated region fallthrough
CT: control target
= control target key end

     0   :  { %vm41_vm0 = vcmask 523264   ;;  %s570_s0 = inlined_call_operand.vmem [shape: f32[32,64], index: 0, kind: input, shape index: {}]   ;;  %s571_s1 = inlined_call_operand.vmem [shape: f32[64,24], index: 1, kind: input, shape index: {}]   ;;  %s572_s2 = inlined_call_operand.vmem [shape: f32[1,24], index: 2, kind: input, shape index: {}]   ;;  %s573_s3 = inlined_call_operand.vmem [shape: f32[1,24], index: 3, kind: input, shape index: {}]   ;;  %s574_s4 = inlined_call_operand.vmem [shape: f32[24,72], index: 4, kind: input, shape index: {}]   ;;  %s575_s5 = inlined_call_operand.vmem [shape: f32[1,72], index: 5, kind: input, shape index: {}]   ;;  %s576_s6 = inlined_call_operand.vmem [shape: f32[1,72], index: 6, kind: input, shape index: {}]   ;;  %s577_s7 = inlined_call_operand.hbm [shape: f32[32,24], index: 7, kind: output, shape index: {0}]   ;;  %s578_s8 = inlined_call_operand.vmem [shape: f32[32,72], index: 8, kind: output, shape index: {1}]  }
   0x1   :  { %v33_v0 = vld [vmem:[%s571_s1] sm:$0xff]  ;;  %v34_v1 = vld [vmem:[%s571_s1 + $0x8] sm:$0xff]  ;;  %v35_v2 = vld [vmem:[%s571_s1 + $0x10] sm:$0xff] }
   0x2   :  { %v382_v3 = vpack.c.bf16 %v34_v1, %v33_v0  ;;  %v36_v4 = vld [vmem:[%s571_s1 + $0x18] sm:$0xff]  ;;  %v37_v6 = vld [vmem:[%s571_s1 + $0x20] sm:$0xff]  ;;  %v38_v7 = vld [vmem:[%s571_s1 + $0x28] sm:$0xff] }
   0x3   :  { %v386_v5 = vpack.c.bf16 %v36_v4, %v35_v2  ;;  %v29_v8 = vld [vmem:[%s570_s0] sm:$0xff] }
   0x4   :  { %383 = vmatprep.subr.bf16.mxu0 %v382_v3  ;;  %364 = vmatprep.mubr.msk.f32.mxu0 %vm41_vm0, %v29_v8 }
   0x5   :  { %385 = vmatpush3.bf16.msra.mxu0 %v382_v3 }
   0x6   :  { %14 = vsyncpa [#allocation3], 0  ;;  %387 = vmatprep.subr.bf16.mxu0 %v386_v5  ;;  %v390_v9 = vpack.c.bf16 %v38_v7, %v37_v6  ;;  %v39_v10 = vld [vmem:[%s571_s1 + $0x30] sm:$0xff]  ;;  %v40_v11 = vld [vmem:[%s571_s1 + $0x38] sm:$0xff]  ;;  %vm161_vm1 = vcmask 195584  }
   0x7   :  { %v394_v12 = vpack.c.bf16 %v40_v11, %v39_v10  ;;  %v30_v13 = vld [vmem:[%s570_s0 + $0x8] sm:$0xff]  ;;  %v31_v14 = vld [vmem:[%s570_s0 + $0x10] sm:$0xff]  ;;  %v32_v15 = vld [vmem:[%s570_s0 + $0x18] sm:$0xff] }
   0x8   :  { %v166_v16 = vld [vmem:[%s574_s4] sm:$0xff]  ;;  %v167_v17 = vld [vmem:[%s574_s4 + $0x8] sm:$0xff]  ;;  %v168_v19 = vld [vmem:[%s574_s4 + $0x10] sm:$0xff] }
   0x9   :  { %389 = vmatpush3.bf16.msra.mxu0 %v386_v5  ;;  %v398_v18 = vpack.c.bf16 %v167_v17, %v166_v16  ;;  %v321_v20 = vld [vmem:[%s572_s2] ss:$0 sm:$0xff]  ;;  %s429_s2 = smov [#allocation2]  }
   0xa   :  { %391 = vmatprep.subr.bf16.mxu0 %v390_v9  ;;  %v322_v22 = vld [vmem:[%s573_s3] ss:$0 sm:$0xff]  ;;  %s302_s3 = sshll.u32 %s429_s2, 4  ;;  %s303_s3 = int_to_ptr.vmem [resolvable:$true] %s302_s3 }
   0xb   :  { %399 = vmatprep.subr.bf16.mxu1 %v398_v18  ;;  %s405_s4 = scalar_lea.vmem %s303_s3, 512  ;;  %p410_p1 = scmp.lt.s32.totalorder %s303_s3, %s303_s3 }
   0xc   :  { %401 = vmatpush3.bf16.msra.mxu1 %v398_v18  ;;  %p406_p0 = scmp.ne.s32.totalorder %s303_s3, %s405_s4  ;;  %p411_p2 = scmp.lt.s32.totalorder %s405_s4, %s405_s4 }
   0xd   :  { %393 = vmatpush3.bf16.msra.mxu0 %v390_v9  ;;  %374 = vmatprep.subr.mxu1 %v168_v19 }
   0xe   :  { %395 = vmatprep.subr.bf16.mxu0 %v394_v12  ;;  %p412_p3 = por %p411_p2, %p410_p1 }
  0x10   :  { %375 = vmatpush3.msra.mxu1 %v168_v19  ;;  %p413_p4 = pnand %p412_p3, %p406_p0 }
  0x11   :  { %397 = vmatpush3.bf16.msra.mxu0 %v394_v12 }
  0x14   :  { %365 = vmatmul.mubr.msk.f32.vlgmr.msra.gmra.mrb[0].mxu0 %vm41_vm0, %v30_v13 }
  0x15   :  { %367 = vmatprep.mubr.msk.f32.mxu0 %vm41_vm0, %v31_v14 }
  0x18   :  { %368 = vmatmul.mubr.msk.f32.gmra.mrb[2].mxu0 %vm41_vm0, %v32_v15 }
  0xe7   :  { %v366_v21 = vpop.f32.mrb[0].mxu0 }
  0xe8   :  { %v147_v23 = vmul.f32 %v366_v21, %v321_v20  ;;  %v120_v24 = vpop.f32.mrb[1].mxu0 }
  0xe9   :  { %v146_v25 = vmul.f32 %v321_v20, %v120_v24 }
  0xea   :  { %v158_v26 = vadd.f32 %v322_v22, %v147_v23 }
  0xeb   :  { %v369_v27 = vpop.f32.mrb[2].mxu0  ;;  %v157_v28 = vadd.f32 %v322_v22, %v146_v25 }
  0xec   :  { %163 = vst.msk [vmem:[#allocation2 + $0x8] sm:$0xff] %vm161_vm1, %v158_v26  ;;  %v149_v29 = vmul.f32 %v369_v27, %v321_v20  ;;  %v130_v30 = vpop.f32.mrb[3].mxu0 }
  0xed   :  { %v148_v31 = vmul.f32 %v321_v20, %v130_v30  ;;  %162 = vst.msk [vmem:[#allocation2] sm:$0xff] %vm161_vm1, %v157_v28  ;;  %376 = vmatprep.mubr.msk.f32.mxu1 %vm161_vm1, %v157_v28 }
  0xee   :  { %v160_v32 = vadd.f32 %v322_v22, %v149_v29  ;;  %377 = vmatmul.mubr.msk.f32.vlgmr.msra.gmra.mrb[0].mxu1 %vm161_vm1, %v158_v26 }
  0xef   :  { %v159_v33 = vadd.f32 %v322_v22, %v148_v31 }
  0xf0   :  { %165 = vst.msk [vmem:[#allocation2 + $0x18] sm:$0xff] %vm161_vm1, %v160_v32 }
  0xf1   :  { %164 = vst.msk [vmem:[#allocation2 + $0x10] sm:$0xff] %vm161_vm1, %v159_v33  ;;  %379 = vmatprep.mubr.msk.f32.mxu1 %vm161_vm1, %v159_v33 }
  0xf2   :  { %380 = vmatmul.mubr.msk.f32.gmra.mrb[2].mxu1 %vm161_vm1, %v160_v32 }
  0xf3   :  { %416 = shalt.err (!%p413_p4)
}
  0xf4   :  { %s417_s17 = scalar_lea.hbm %s577_s7, 512 }
  0xf5   :  { %p418_p5 = scmp.ne.s32.totalorder %s577_s7, %s417_s17  ;;  %p421_p6 = scmp.lt.u32.totalorder %s417_s17, %s577_s7 }
  0xf7   :  { %p423_p7 = pnand %p421_p6, %p418_p5 }
  0xf9   :  { %426 = shalt.err (!%p423_p7)
}
  0xfa   :  { %s430_s22 = smov 128   ;;  %s431_s23 = smov 8   ;;  %v327_v34 = vld [vmem:[%s575_s5] ss:$0 sm:$0xff]  ;;  %vm292_vm2 = vcmask 588800  }
  0xfb   :  { %308 = dma.vmem_to_hbm [thread:$0]  %s303_s3, 512, %s577_s7, [#allocation3], %s430_s22, %s430_s22, %s431_s23  }
  0xfc   :  { %v328_v36 = vld [vmem:[%s576_s6] ss:$0 sm:$0xff] }
 0x1c1   :  { %v378_v35 = vpop.f32.mrb[0].mxu1 }
 0x1c2   :  { %v274_v37 = vmul.f32 %v378_v35, %v327_v34  ;;  %v247_v38 = vpop.f32.mrb[1].mxu1 }
 0x1c3   :  { %v273_v39 = vmul.f32 %v327_v34, %v247_v38 }
 0x1c4   :  { %v285_v40 = vadd.f32 %v328_v36, %v274_v37 }
 0x1c5   :  { %v284_v41 = vadd.f32 %v328_v36, %v273_v39  ;;  %v381_v42 = vpop.f32.mrb[2].mxu1 }
 0x1c6   :  { %v289_v43 = vmax.f32 %v285_v40, 0.0  ;;  %v276_v44 = vmul.f32 %v381_v42, %v327_v34  ;;  %v257_v45 = vpop.f32.mrb[3].mxu1 }
 0x1c7   :  { %v288_v46 = vmax.f32 %v284_v41, 0.0  ;;  %v275_v47 = vmul.f32 %v327_v34, %v257_v45 }
 0x1c8   :  { %294 = vst.msk [vmem:[%s578_s8 + $0x8] sm:$0xff] %vm292_vm2, %v289_v43  ;;  %v287_v48 = vadd.f32 %v328_v36, %v276_v44 }
 0x1c9   :  { %293 = vst.msk [vmem:[%s578_s8] sm:$0xff] %vm292_vm2, %v288_v46  ;;  %v286_v49 = vadd.f32 %v328_v36, %v275_v47 }
 0x1ca   :  { %v291_v50 = vmax.f32 %v287_v48, 0.0 }
 0x1cb   :  { %v290_v51 = vmax.f32 %v286_v49, 0.0 }
 0x1cc   :  { %296 = vst.msk [vmem:[%s578_s8 + $0x18] sm:$0xff] %vm292_vm2, %v291_v50 }
 0x1cd   :  { %295 = vst.msk [vmem:[%s578_s8 + $0x10] sm:$0xff] %vm292_vm2, %v290_v51 }
 0x1ce   :  { %427 = dma.done.wait [#allocation3], 512  }
 0x1cf   :  { %428 = vsyncadd [#allocation3], 4294966784 }
 0x1d0   :  { %316 = vsyncpa [#allocation3], 1 }

// kernel: mobilenetv3_features.14
= control target key start
LH: loop header
LB: loop body
LE: loop exit
PB: predicated region body
PF: predicated region fallthrough
CT: control target
= control target key end

     0   :  { %s878_s27 = smov 0   ;;  %s997_s0 = inlined_call_operand.vmem [shape: f32[8,3,3,72], index: 0, kind: input, shape index: {}]   ;;  %s998_s1 = inlined_call_operand.vmem [shape: f32[9,1,72], index: 1, kind: input, shape index: {}]   ;;  %s999_s2 = inlined_call_operand.vmem [shape: f32[1,72], index: 2, kind: input, shape index: {}]   ;;  %s1000_s3 = inlined_call_operand.vmem [shape: f32[1,72], index: 3, kind: input, shape index: {}]   ;;  %s1001_s4 = inlined_call_operand.vmem [shape: f32[72,16], index: 4, kind: input, shape index: {}]   ;;  %s1002_s5 = inlined_call_operand.vmem [shape: f32[1,16], index: 5, kind: input, shape index: {}]   ;;  %s1003_s6 = inlined_call_operand.vmem [shape: f32[16,72], index: 6, kind: input, shape index: {}]   ;;  %s1004_s7 = inlined_call_operand.vmem [shape: f32[1,72], index: 7, kind: input, shape index: {}]   ;;  %s1005_s8 = inlined_call_operand.vmem [shape: f32[2,2,2,72], index: 8, kind: output, shape index: {}]  }
   0x1 LB: > { %s884_s28 = sadd.s32 4294967295, %s828_s27   ;;  %p706_p0 = scmp.ge.s32.totalorder %s828_s27, 1  ;;  %s828_s27 = sphi %s878_s27, %s18_s27  }
   0x2   : > { %p264_p1 = scmp.lt.s32.totalorder %s828_s27, 3 }
   0x4   : > { %p265_p2 = pnand %p706_p0, %p264_p1 }
   0x5   : > { %v471_v0 = vld [vmem:[%s1001_s4] sm:$0xff] (!%p265_p2)  ;;  %v472_v1 = vld [vmem:[%s1001_s4 + $0x8] sm:$0xff] (!%p265_p2)  ;;  %v473_v2 = vld [vmem:[%s1001_s4 + $0x10] sm:$0xff] (!%p265_p2)  ;;  %v830_v3 = vmov (!%p265_p2), 0.0|0.0   ;;  %vm831_vm0 = vmmov (!%p265_p2), 0   ;;  %v832_v6 = vmov (!%p265_p2), 0.0  }
   0x6   : > { %268 = sbr.rel (%p265_p2) target bundleno = 522 (0x20a), region = 52  ;;  %791 = vmatprep.subr.bf16.mxu0 (!%p265_p2), %v830_v3  ;;  %v792_v4 = vpack.c.bf16 (!%p265_p2), %v472_v1, %v471_v0  ;;  %v474_v5 = vld [vmem:[%s1001_s4 + $0x18] sm:$0xff] (!%p265_p2)  ;;  %781 = vmatprep.mubr.msk.f32.mxu0 (!%p265_p2), %vm831_vm0, %v832_v6  ;;  %s707_s15 = sshll.u32 (!%p265_p2), %s884_s28, 2  ;;  %v475_v8 = vld [vmem:[%s1001_s4 + $0x20] sm:$0xff] (!%p265_p2)  ;;  %v476_v9 = vld [vmem:[%s1001_s4 + $0x28] sm:$0xff] (!%p265_p2)  ;;  %vm459_vm1 = vcmask (!%p265_p2), 582656  }
   0x7   : > { %p300_p3 = scmp.lt.s32.totalorder (!%p265_p2), %s707_s15, 7  ;;  %803 = vmatprep.subr.bf16.mxu1 (!%p265_p2), %v830_v3  ;;  %788 = vmatprep.mubr.msk.f32.mxu1 (!%p265_p2), %vm831_vm0, %v832_v6  ;;  %v795_v7 = vpack.c.bf16 (!%p265_p2), %v474_v5, %v473_v2  ;;  %v798_v10 = vpack.c.bf16 (!%p265_p2), %v476_v9, %v475_v8  ;;  %v477_v11 = vld [vmem:[%s1001_s4 + $0x30] sm:$0xff] (!%p265_p2)  ;;  %v711_v12 = vld [vmem:[%s998_s1] ss:$0 sm:$0xff] (!%p265_p2)  ;;  %v715_v13 = vld [vmem:[%s998_s1 + $0x1] ss:$0 sm:$0xff] (!%p265_p2) }
   0x8   : > { %793 = vmatpush3.bf16.msra.mxu0 (!%p265_p2), %v792_v4  ;;  %v478_v14 = vld [vmem:[%s1001_s4 + $0x38] sm:$0xff] (!%p265_p2)  ;;  %v717_v15 = vld [vmem:[%s998_s1 + $0x2] ss:$0 sm:$0xff] (!%p265_p2)  ;;  %v721_v16 = vld [vmem:[%s998_s1 + $0x3] ss:$0 sm:$0xff] (!%p265_p2)  ;;  %vm481_vm2 = vcmask (!%p265_p2), 588800  }
   0x9   : > { %794 = vmatprep.subr.bf16.mxu0 (!%p265_p2), %v830_v3  ;;  %v725_v20 = vld [vmem:[%s998_s1 + $0x4] ss:$0 sm:$0xff] (!%p265_p2)  ;;  %v801_v27 = vpack.c.bf16 (!%p265_p2), %v478_v14, %v477_v11  ;;  %v729_v40 = vld [vmem:[%s998_s1 + $0x5] ss:$0 sm:$0xff] (!%p265_p2)  ;;  %v733_v47 = vld [vmem:[%s998_s1 + $0x6] ss:$0 sm:$0xff] (!%p265_p2) }
   0xa   : > { %v479_v48 = vld [vmem:[%s1001_s4 + $0x40] sm:$0xff] (!%p265_p2)  ;;  %v741_v62 = vld [vmem:[%s998_s1 + $0x8] ss:$0 sm:$0xff] (!%p265_p2)  ;;  %vm559_vm3 = vcmask (!%p265_p2), 130048   ;;  %p306_p4 = scmp.lt.s32.totalorder (!%p265_p2), %s884_s28, 1 }
   0xb   : > { %v737_v55 = vld [vmem:[%s998_s1 + $0x7] ss:$0 sm:$0xff] (!%p265_p2) }
   0xc   : > { %796 = vmatpush3.bf16.msra.mxu0 (!%p265_p2), %v795_v7 }
   0xd   : > { %s1007_s15 = smov (!%p300_p3, %s707_s15), 7  ;;  %797 = vmatprep.subr.bf16.mxu0 %v830_v3  ;;  %s1009_s28 = smov (!%p306_p4, %s884_s28), 1 }
   0xe   : > { %s806_s20 = smul.u32 12, %s1007_s15 }
  0x10   : > { %s922_s11 = scalar_lea.vmem %s997_s0, %s806_s20  ;;  %799 = vmatpush3.bf16.msra.mxu0 %v798_v10  ;;  %v742_v10 = vld [vmem:[%s999_s2] ss:$0 sm:$0xff]  ;;  %s749_s20 = sshll.u32 %s1009_s28, 2 }
  0x11   : > { %v311_v17 = vld [vmem:[%s922_s11] sm:$0x3]  ;;  %v312_v18 = vld [vmem:[%s922_s11 + $0x4] sm:$0x3]  ;;  %v712_v19 = vld [vmem:[%s922_s11 + $0xc] sm:$0x3]  ;;  %800 = vmatprep.subr.bf16.mxu0 %v830_v3  ;;  %s310_s23 = scalar_lea.vmem %s1005_s8, %s749_s20 }
  0x12   : > { %v320_v21 = vmul.f32 %v711_v12, %v311_v17  ;;  %v321_v22 = vmul.f32 %v711_v12, %v312_v18  ;;  %v713_v23 = vld [vmem:[%s922_s11 + $0x10] sm:$0x3]  ;;  %v333_v24 = vmul.f32 %v715_v13, %v712_v19  ;;  %v337_v25 = vld [vmem:[%s922_s11 + $0x1] sm:$0x3]  ;;  %v338_v26 = vld [vmem:[%s922_s11 + $0x5] sm:$0x3] }
  0x13   : > { %v334_v28 = vmul.f32 %v715_v13, %v713_v23  ;;  %v347_v29 = vmul.f32 %v717_v15, %v337_v25  ;;  %v348_v30 = vmul.f32 %v717_v15, %v338_v26  ;;  %v718_v31 = vld [vmem:[%s922_s11 + $0x18] sm:$0x3]  ;;  %v719_v32 = vld [vmem:[%s922_s11 + $0x1c] sm:$0x3]  ;;  %v722_v33 = vld [vmem:[%s922_s11 + $0x24] sm:$0x3] }
  0x14   : > { %v335_v34 = vadd.f32 %v333_v24, %v320_v21  ;;  %v362_v35 = vmul.f32 %v721_v16, %v718_v31  ;;  %v723_v36 = vld [vmem:[%s922_s11 + $0x28] sm:$0x3]  ;;  %v363_v38 = vmul.f32 %v721_v16, %v719_v32  ;;  %v726_v39 = vld [vmem:[%s922_s11 + $0x19] sm:$0x3]  ;;  %v377_v42 = vmul.f32 %v725_v20, %v722_v33  ;;  %v727_v43 = vld [vmem:[%s922_s11 + $0x1d] sm:$0x3]  ;;  %802 = vmatpush3.bf16.msra.mxu0 %v801_v27 }
  0x15   : > { %v336_v37 = vadd.f32 %v334_v28, %v321_v22  ;;  %v378_v45 = vmul.f32 %v725_v20, %v723_v36  ;;  %v730_v46 = vld [vmem:[%s922_s11 + $0x4] sm:$0x3]  ;;  %779 = vmatprep.subr.mxu0 %v832_v6  ;;  %v391_v50 = vmul.f32 %v729_v40, %v726_v39  ;;  %v731_v51 = vld [vmem:[%s922_s11 + $0x8] sm:$0x3]  ;;  %v392_v53 = vmul.f32 %v729_v40, %v727_v43  ;;  %v734_v54 = vld [vmem:[%s922_s11 + $0x10] sm:$0x3] }
  0x16   : > { %v349_v41 = vadd.f32 %v347_v29, %v335_v34  ;;  %v406_v57 = vmul.f32 %v733_v47, %v730_v46  ;;  %v735_v58 = vld [vmem:[%s922_s11 + $0x14] sm:$0x3]  ;;  %v407_v60 = vmul.f32 %v733_v47, %v731_v51  ;;  %v738_v61 = vld [vmem:[%s922_s11 + $0x5] sm:$0x3]  ;;  %v421_v0 = vmul.f32 %v737_v55, %v734_v54  ;;  %v739_v1 = vld [vmem:[%s922_s11 + $0x9] sm:$0x3] }
  0x17   : > { %v350_v44 = vadd.f32 %v348_v30, %v336_v37  ;;  %v422_v3 = vmul.f32 %v737_v55, %v735_v58  ;;  %v435_v5 = vmul.f32 %v741_v62, %v738_v61  ;;  %v436_v7 = vmul.f32 %v741_v62, %v739_v1  ;;  %v743_v13 = vld [vmem:[%s1000_s3] ss:$0 sm:$0xff]  ;;  %v557_v32 = vld [vmem:[%s1003_s6 + $0x8] sm:$0xff] }
  0x18   : > { %v364_v49 = vadd.f32 %v362_v35, %v349_v41  ;;  %780 = vmatpush3.msra.mxu0 %v479_v48  ;;  %v556_v31 = vld [vmem:[%s1003_s6] sm:$0xff]  ;;  %v639_v46 = vlaneseq }
  0x19   : > { %v365_v52 = vadd.f32 %v363_v38, %v350_v44  ;;  %v804_v33 = vpack.c.bf16 %v557_v32, %v556_v31  ;;  %v480_v34 = vld [vmem:[%s1002_s5] sm:$0x1] }
  0x1a   : > { %v379_v56 = vadd.f32 %v377_v42, %v364_v49  ;;  %v558_v39 = vld [vmem:[%s1004_s7] sm:$0x1]  ;;  %v640_v47 = vshrl.u32 %v639_v46, 7 }
  0x1b   : > { %v380_v59 = vadd.f32 %v378_v45, %v365_v52  ;;  %805 = vmatpush3.bf16.msra.mxu1 %v804_v33 }
  0x1c   : > { %v393_v63 = vadd.f32 %v391_v50, %v379_v56  ;;  %v641_v48 = vsub.s32 0, %v640_v47 }
  0x1d   : > { %v394_v2 = vadd.f32 %v392_v53, %v380_v59 }
  0x1e   : > { %v408_v4 = vadd.f32 %v406_v57, %v393_v63 }
  0x1f   : > { %v409_v6 = vadd.f32 %v407_v60, %v394_v2 }
  0x20   : > { %v423_v8 = vadd.f32 %v421_v0, %v408_v4 }
  0x21   : > { %v424_v9 = vadd.f32 %v422_v3, %v409_v6 }
  0x22   : > { %v437_v11 = vadd.f32 %v435_v5, %v423_v8 }
  0x23   : > { %v438_v12 = vadd.f32 %v436_v7, %v424_v9 }
  0x24   : > { %v446_v14 = vmul.f32 %v742_v10, %v437_v11 }
  0x25   : > { %v447_v15 = vmul.f32 %v742_v10, %v438_v12 }
  0x26   : > { %v455_v16 = vadd.f32 %v743_v13, %v446_v14 }
  0x27   : > { %v456_v17 = vadd.f32 %v743_v13, %v447_v15 }
  0x28   : > { %v457_v18 = vmax.f32 %v455_v16, 0.0 }
  0x29   : > { %v458_v19 = vmax.f32 %v456_v17, 0.0 }
  0x2a   : > { %v460_v20 = vsel %vm459_vm1, %v457_v18, 0.0 }
  0x2b   : > { %v461_v21 = vsel %vm459_vm1, %v458_v19, 0.0 }
  0x2c   : > { %v462_v22 = vadd.f32 %v461_v21, %v460_v20 }
  0x2e   : > { %v463_v23 = vsel %vm459_vm1, %v462_v22, 0.0 }
  0x2f   : > { %v464_v24 = vrot.slane %v463_v23, 4 }
  0x31   : > { %v465_v25 = vadd.f32 %v464_v24, %v463_v23 }
  0x33   : > { %v466_v26 = vrot.slane %v465_v25, 2 }
  0x35   : > { %v467_v27 = vadd.f32 %v466_v26, %v465_v25 }
  0x37   : > { %v468_v28 = vrot.slane %v467_v27, 1 }
  0x39   : > { %v469_v29 = vadd.f32 %v468_v28, %v467_v27 }
  0x3b   : > { %v470_v30 = vmul.f32 0.25, %v469_v29 }
  0x3d   : > { %782 = vmatmul.mubr.msk.f32.vlgmr.msra.gmra.mrb[0].mxu0 %vm481_vm2, %v470_v30 }
 0x110   : > { %v551_v35 = vpop.f32.mrb[0].mxu0 }
 0x111   : > { %v552_v36 = vadd.f32 %v551_v35, %v480_v34  ;;  %v783_v37 = vpop.f32.mrb[1].mxu0 }
 0x113   : > { %v555_v38 = vmax.f32 %v552_v36, 0.0 }
 0x115   : > { %789 = vmatmul.mubr.msk.f32.vlgmr.msra.gmra.mrb[0].mxu1 %vm559_vm3, %v555_v38 }
 0x1e8   : > { %v629_v40 = vpop.f32.mrb[0].mxu1 }
 0x1e9   : > { %v630_v41 = vadd.f32 %v629_v40, %v558_v39  ;;  %v790_v42 = vpop.f32.mrb[1].mxu1 }
 0x1eb   : > { %v746_v43 = vmul.f32 -1.442695, %v630_v41 }
 0x1ed   : > { %818 = vpow2.f32 %v746_v43 }
 0x1f7   : > { %v819_v44 = vpop.eup %818 }
 0x1f8   : > { %v636_v45 = vadd.f32 1.0, %v819_v44 }
 0x1fa   : > { %820 = vrcp.f32 %v636_v45 }
 0x204   : > { %v821_v49 = vpop.eup %820 }
 0x205   : > { %v642_v50 = vrot.slane %v821_v49, %v641_v48 }
 0x207   : > { %v643_v51 = vmul.f32 %v642_v50, %v457_v18  ;;  %v644_v52 = vmul.f32 %v642_v50, %v458_v19 }
 0x209   : > { %645 = vst.msk [vmem:[%s310_s23] sm:$0x3] %vm459_vm1, %v643_v51  ;;  %646 = vst.msk [vmem:[%s310_s23 + $0x2] sm:$0x3] %vm459_vm1, %v644_v52 }
 0x20a PF: > { %s18_s27 = sadd.s32 1, %s828_s27  }
 0x20b   : > { %p15_p5 = scmp.ge.s32.totalorder %s18_s27, 4  }
 0x20d   :  { %17 = sbr.rel (!%p15_p5) target bundleno = 1 (0x1), region = 95 }

// kernel: mobilenetv3_features.15
= control target key start
LH: loop header
LB: loop body
LE: loop exit
PB: predicated region body
PF: predicated region fallthrough
CT: control target
= control target key end

     0   :  { %v312_v0 = vmov 0.0|0.0   ;;  %vm313_vm0 = vmmov 0   ;;  %v314_v4 = vmov 0.0   ;;  %vm38_vm1 = vcmask 588800   ;;  %s423_s1 = inlined_call_operand.vmem [shape: f32[72,40], index: 1, kind: input, shape index: {}]   ;;  %s424_s4 = inlined_call_operand.vmem [shape: f32[40,120], index: 4, kind: input, shape index: {}]   ;;  %s425_s0 = inlined_call_operand.vmem [shape: f32[8,72], index: 0, kind: input, shape index: {}]   ;;  %s426_s2 = inlined_call_operand.vmem [shape: f32[1,40], index: 2, kind: input, shape index: {}]   ;;  %s427_s3 = inlined_call_operand.vmem [shape: f32[1,40], index: 3, kind: input, shape index: {}]   ;;  %s428_s7 = inlined_call_operand.vmem [shape: f32[8,40], index: 7, kind: output, shape index: {0}]   ;;  %s429_s5 = inlined_call_operand.vmem [shape: f32[1,120], index: 5, kind: input, shape index: {}]   ;;  %s430_s6 = inlined_call_operand.vmem [shape: f32[1,120], index: 6, kind: input, shape index: {}]   ;;  %s431_s8 = inlined_call_operand.vmem [shape: f32[8,120], index: 8, kind: output, shape index: {1}]  }
   0x1   :  { %291 = vmatprep.subr.bf16.mxu0 %v312_v0  ;;  %v29_v1 = vld [vmem:[%s423_s1] sm:$0xff]  ;;  %v30_v2 = vld [vmem:[%s423_s1 + $0x8] sm:$0xff]  ;;  %v31_v3 = vld [vmem:[%s423_s1 + $0x10] sm:$0xff]  ;;  %275 = vmatprep.mubr.msk.f32.mxu0 %vm313_vm0, %v314_v4  ;;  %vm128_vm2 = vcmask 326656   ;;  %vm225_vm3 = vcmask 982016  }
   0x2   :  { %v292_v5 = vpack.c.bf16 %v30_v2, %v29_v1  ;;  %v32_v6 = vld [vmem:[%s423_s1 + $0x18] sm:$0xff]  ;;  %303 = vmatprep.subr.bf16.mxu1 %v312_v0  ;;  %288 = vmatprep.mubr.msk.f32.mxu1 %vm313_vm0, %v314_v4  ;;  %v130_v8 = vld [vmem:[%s424_s4] sm:$0xff]  ;;  %v131_v9 = vld [vmem:[%s424_s4 + $0x8] sm:$0xff] }
   0x3   :  { %v295_v7 = vpack.c.bf16 %v32_v6, %v31_v3  ;;  %v33_v10 = vld [vmem:[%s423_s1 + $0x20] sm:$0xff]  ;;  %v34_v11 = vld [vmem:[%s423_s1 + $0x28] sm:$0xff]  ;;  %v304_v12 = vpack.c.bf16 %v131_v9, %v130_v8  ;;  %v35_v14 = vld [vmem:[%s423_s1 + $0x30] sm:$0xff] }
   0x4   :  { %293 = vmatpush3.bf16.msra.mxu0 %v292_v5  ;;  %v298_v13 = vpack.c.bf16 %v34_v11, %v33_v10  ;;  %v36_v15 = vld [vmem:[%s423_s1 + $0x38] sm:$0xff]  ;;  %v37_v17 = vld [vmem:[%s423_s1 + $0x40] sm:$0xff]  ;;  %v132_v19 = vld [vmem:[%s424_s4 + $0x10] sm:$0xff] }
   0x5   :  { %294 = vmatprep.subr.bf16.mxu0 %v312_v0  ;;  %305 = vmatpush3.bf16.msra.mxu1 %v304_v12  ;;  %v301_v16 = vpack.c.bf16 %v36_v15, %v35_v14  ;;  %v28_v18 = vld [vmem:[%s425_s0] sm:$0xff]  ;;  %v133_v20 = vld [vmem:[%s424_s4 + $0x18] sm:$0xff] }
   0x6   :  { %306 = vmatprep.subr.bf16.mxu1 %v312_v0  ;;  %v307_v21 = vpack.c.bf16 %v133_v20, %v132_v19  ;;  %v134_v22 = vld [vmem:[%s424_s4 + $0x20] sm:$0xff] }
   0x7   :  { %v236_v23 = vld [vmem:[%s426_s2] ss:$0 sm:$0xff] }
   0x8   :  { %296 = vmatpush3.bf16.msra.mxu0 %v295_v7  ;;  %v237_v25 = vld [vmem:[%s427_s3] ss:$0 sm:$0xff] }
   0x9   :  { %297 = vmatprep.subr.bf16.mxu0 %v312_v0  ;;  %308 = vmatpush3.bf16.msra.mxu1 %v307_v21  ;;  %v239_v29 = vld [vmem:[%s429_s5] ss:$0 sm:$0xff] }
   0xa   :  { %286 = vmatprep.subr.mxu1 %v314_v4  ;;  %v240_v31 = vld [vmem:[%s430_s6] ss:$0 sm:$0xff] }
   0xc   :  { %299 = vmatpush3.bf16.msra.mxu0 %v298_v13 }
   0xd   :  { %300 = vmatprep.subr.bf16.mxu0 %v312_v0  ;;  %287 = vmatpush3.msra.mxu1 %v134_v22 }
  0x10   :  { %302 = vmatpush3.bf16.msra.mxu0 %v301_v16 }
  0x11   :  { %273 = vmatprep.subr.mxu0 %v314_v4 }
  0x14   :  { %274 = vmatpush3.msra.mxu0 %v37_v17 }
  0x15   :  { %276 = vmatmul.mubr.msk.f32.vlgmr.msra.gmra.mrb[0].mxu0 %vm38_vm1, %v28_v18 }
  0xe8   :  { %v108_v24 = vpop.f32.mrb[0].mxu0 }
  0xe9   :  { %v119_v26 = vmul.f32 %v236_v23, %v108_v24  ;;  %v277_v27 = vpop.f32.mrb[1].mxu0 }
  0xeb   :  { %v127_v28 = vadd.f32 %v237_v25, %v119_v26 }
  0xed   :  { %129 = vst.msk [vmem:[%s428_s7] sm:$0xff] %vm128_vm2, %v127_v28  ;;  %289 = vmatmul.mubr.msk.f32.vlgmr.msra.gmra.mrb[0].mxu1 %vm128_vm2, %v127_v28 }
 0x1c0   :  { %v204_v30 = vpop.f32.mrb[0].mxu1 }
 0x1c1   :  { %v215_v32 = vmul.f32 %v239_v29, %v204_v30  ;;  %v290_v33 = vpop.f32.mrb[1].mxu1 }
 0x1c3   :  { %v223_v34 = vadd.f32 %v240_v31, %v215_v32 }
 0x1c5   :  { %v224_v35 = vmax.f32 %v223_v34, 0.0 }
 0x1c7   :  { %226 = vst.msk [vmem:[%s431_s8] sm:$0xff] %vm225_vm3, %v224_v35 }

// kernel: mobilenetv3_features.17
= control target key start
LH: loop header
LB: loop body
LE: loop exit
PB: predicated region body
PF: predicated region fallthrough
CT: control target
= control target key end

     0   :  { %v246_v3 = vmov 0.0|0.0   ;;  %vm247_vm0 = vmmov 0   ;;  %v248_v6 = vmov 0.0   ;;  %s349_s0 = inlined_call_operand.vmem [shape: f32[8,120], index: 0, kind: input, shape index: {}]   ;;  %s350_s1 = inlined_call_operand.vmem [shape: f32[120,40], index: 1, kind: input, shape index: {}]   ;;  %s351_s2 = inlined_call_operand.vmem [shape: f32[1,40], index: 2, kind: input, shape index: {}]   ;;  %s352_s3 = inlined_call_operand.vmem [shape: f32[1,40], index: 3, kind: input, shape index: {}]   ;;  %s353_s4 = inlined_call_operand.vmem [shape: f32[8,40], index: 4, kind: input, shape index: {}]   ;;  %s354_s5 = inlined_call_operand.hbm [shape: f32[8,40], index: 5, kind: output, shape index: {}]  }
   0x1   :  { %v22_v0 = vld [vmem:[%s350_s1] sm:$0xff]  ;;  %v23_v1 = vld [vmem:[%s350_s1 + $0x8] sm:$0xff]  ;;  %v24_v2 = vld [vmem:[%s350_s1 + $0x10] sm:$0xff]  ;;  %197 = vmatprep.subr.bf16.mxu0 %v246_v3  ;;  %194 = vmatprep.mubr.msk.f32.mxu0 %vm247_vm0, %v248_v6 }
   0x2   :  { %v198_v4 = vpack.c.bf16 %v23_v1, %v22_v0  ;;  %v25_v5 = vld [vmem:[%s350_s1 + $0x18] sm:$0xff]  ;;  %v26_v8 = vld [vmem:[%s350_s1 + $0x20] sm:$0xff]  ;;  %v27_v9 = vld [vmem:[%s350_s1 + $0x28] sm:$0xff] }
   0x3   :  { %v201_v7 = vpack.c.bf16 %v25_v5, %v24_v2 }
   0x4   :  { %199 = vmatpush3.bf16.msra.mxu0 %v198_v4 }
   0x5   :  { %200 = vmatprep.subr.bf16.mxu0 %v246_v3 }
   0x6   :  { %10 = vsyncpa [#allocation3], 0  ;;  %v204_v10 = vpack.c.bf16 %v27_v9, %v26_v8  ;;  %v28_v11 = vld [vmem:[%s350_s1 + $0x30] sm:$0xff]  ;;  %v29_v12 = vld [vmem:[%s350_s1 + $0x38] sm:$0xff]  ;;  %vm37_vm1 = vcmask 982016   ;;  %s249_s30 = smov [#allocation2]  }
   0x7   :  { %v207_v13 = vpack.c.bf16 %v29_v12, %v28_v11  ;;  %v30_v14 = vld [vmem:[%s350_s1 + $0x40] sm:$0xff]  ;;  %v31_v15 = vld [vmem:[%s350_s1 + $0x48] sm:$0xff]  ;;  %v32_v17 = vld [vmem:[%s350_s1 + $0x50] sm:$0xff]  ;;  %vm129_vm2 = vcmask 326656  }
   0x8   :  { %202 = vmatpush3.bf16.msra.mxu0 %v201_v7  ;;  %v210_v16 = vpack.c.bf16 %v31_v15, %v30_v14  ;;  %v33_v18 = vld [vmem:[%s350_s1 + $0x58] sm:$0xff]  ;;  %v34_v20 = vld [vmem:[%s350_s1 + $0x60] sm:$0xff]  ;;  %v35_v21 = vld [vmem:[%s350_s1 + $0x68] sm:$0xff] }
   0x9   :  { %203 = vmatprep.subr.bf16.mxu0 %v246_v3  ;;  %v213_v19 = vpack.c.bf16 %v33_v18, %v32_v17  ;;  %v216_v22 = vpack.c.bf16 %v35_v21, %v34_v20  ;;  %v36_v23 = vld [vmem:[%s350_s1 + $0x70] sm:$0xff]  ;;  %v21_v24 = vld [vmem:[%s349_s0] sm:$0xff]  ;;  %s137_s0 = sshll.u32 %s249_s30, 4  ;;  %s138_s0 = int_to_ptr.vmem [resolvable:$true] %s137_s0 }
   0xa   :  { %v146_v25 = vld [vmem:[%s351_s2] ss:$0 sm:$0xff]  ;;  %s222_s6 = scalar_lea.vmem %s138_s0, 128  ;;  %p227_p1 = scmp.lt.s32.totalorder %s138_s0, %s138_s0 }
   0xb   :  { %v147_v27 = vld [vmem:[%s352_s3] ss:$0 sm:$0xff]  ;;  %p223_p0 = scmp.ne.s32.totalorder %s138_s0, %s222_s6  ;;  %p228_p2 = scmp.lt.s32.totalorder %s222_s6, %s222_s6 }
   0xc   :  { %205 = vmatpush3.bf16.msra.mxu0 %v204_v10  ;;  %v127_v30 = vld [vmem:[%s353_s4] sm:$0xff] }
   0xd   :  { %206 = vmatprep.subr.bf16.mxu0 %v246_v3  ;;  %p229_p3 = por %p228_p2, %p227_p1 }
   0xf   :  { %p230_p4 = pnand %p229_p3, %p223_p0 }
  0x10   :  { %208 = vmatpush3.bf16.msra.mxu0 %v207_v13 }
  0x11   :  { %209 = vmatprep.subr.bf16.mxu0 %v246_v3 }
  0x14   :  { %211 = vmatpush3.bf16.msra.mxu0 %v210_v16 }
  0x15   :  { %212 = vmatprep.subr.bf16.mxu0 %v246_v3 }
  0x18   :  { %214 = vmatpush3.bf16.msra.mxu0 %v213_v19 }
  0x19   :  { %215 = vmatprep.subr.bf16.mxu0 %v246_v3 }
  0x1c   :  { %217 = vmatpush3.bf16.msra.mxu0 %v216_v22 }
  0x1d   :  { %192 = vmatprep.subr.mxu0 %v248_v6 }
  0x20   :  { %193 = vmatpush3.msra.mxu0 %v36_v23 }
  0x21   :  { %195 = vmatmul.mubr.msk.f32.vlgmr.msra.gmra.mrb[0].mxu0 %vm37_vm1, %v21_v24 }
  0xf4   :  { %v107_v26 = vpop.f32.mrb[0].mxu0 }
  0xf5   :  { %v118_v28 = vmul.f32 %v146_v25, %v107_v26  ;;  %v196_v29 = vpop.f32.mrb[1].mxu0 }
  0xf7   :  { %v126_v31 = vadd.f32 %v147_v27, %v118_v28 }
  0xf9   :  { %v128_v32 = vadd.f32 %v127_v30, %v126_v31 }
  0xfb   :  { %130 = vst.msk [vmem:[#allocation2] sm:$0xff] %vm129_vm2, %v128_v32 }
  0xfc   :  { %233 = shalt.err (!%p230_p4)
}
  0xfd   :  { %s234_s7 = scalar_lea.hbm %s354_s5, 128 }
  0xfe   :  { %p235_p5 = scmp.ne.s32.totalorder %s354_s5, %s234_s7  ;;  %p238_p6 = scmp.lt.u32.totalorder %s234_s7, %s354_s5 }
 0x100   :  { %p240_p7 = pnand %p238_p6, %p235_p5 }
 0x102   :  { %243 = shalt.err (!%p240_p7)
}
 0x103   :  { %140 = dma.vmem_to_hbm [thread:$0]  %s138_s0, 128, %s354_s5, [#allocation3]  }
 0x104   :  { %244 = dma.done.wait [#allocation3], 128  }
 0x105   :  { %245 = vsyncadd [#allocation3], 4294967168 }
 0x106   :  { %144 = vsyncpa [#allocation3], 1 }

// kernel: mobilenetv3_features.16
= control target key start
LH: loop header
LB: loop body
LE: loop exit
PB: predicated region body
PF: predicated region fallthrough
CT: control target
= control target key end

     0   :  { %s912_s27 = smov 0   ;;  %s1066_s0 = inlined_call_operand.vmem [shape: f32[2,4,4,120], index: 0, kind: input, shape index: {}]   ;;  %s1067_s1 = inlined_call_operand.vmem [shape: f32[9,1,120], index: 1, kind: input, shape index: {}]   ;;  %s1068_s2 = inlined_call_operand.vmem [shape: f32[1,120], index: 2, kind: input, shape index: {}]   ;;  %s1069_s3 = inlined_call_operand.vmem [shape: f32[1,120], index: 3, kind: input, shape index: {}]   ;;  %s1070_s4 = inlined_call_operand.vmem [shape: f32[120,32], index: 4, kind: input, shape index: {}]   ;;  %s1071_s5 = inlined_call_operand.vmem [shape: f32[1,32], index: 5, kind: input, shape index: {}]   ;;  %s1072_s6 = inlined_call_operand.vmem [shape: f32[32,120], index: 6, kind: input, shape index: {}]   ;;  %s1073_s7 = inlined_call_operand.vmem [shape: f32[1,120], index: 7, kind: input, shape index: {}]   ;;  %s1074_s8 = inlined_call_operand.vmem [shape: f32[2,2,2,120], index: 8, kind: output, shape index: {}]  }
   0x1 LB: > { %s702_s28 = sadd.s32 4294967295, %s862_s27   ;;  %p706_p0 = scmp.ge.s32.totalorder %s862_s27, 1  ;;  %s862_s27 = sphi %s912_s27, %s18_s27  }
   0x2   : > { %p262_p1 = scmp.lt.s32.totalorder %s862_s27, 3 }
   0x4   : > { %p263_p2 = pnand %p706_p0, %p262_p1 }
   0x5   : > { %v463_v0 = vld [vmem:[%s1070_s4] sm:$0xff] (!%p263_p2)  ;;  %v464_v1 = vld [vmem:[%s1070_s4 + $0x8] sm:$0xff] (!%p263_p2)  ;;  %v465_v2 = vld [vmem:[%s1070_s4 + $0x10] sm:$0xff] (!%p263_p2)  ;;  %v864_v3 = vmov (!%p263_p2), 0.0|0.0   ;;  %vm865_vm0 = vmmov (!%p263_p2), 0   ;;  %v866_v6 = vmov (!%p263_p2), 0.0  }
   0x6   : > { %266 = sbr.rel (%p263_p2) target bundleno = 521 (0x209), region = 52  ;;  %814 = vmatprep.subr.bf16.mxu0 (!%p263_p2), %v864_v3  ;;  %v815_v4 = vpack.c.bf16 (!%p263_p2), %v464_v1, %v463_v0  ;;  %v466_v5 = vld [vmem:[%s1070_s4 + $0x18] sm:$0xff] (!%p263_p2)  ;;  %800 = vmatprep.mubr.msk.f32.mxu0 (!%p263_p2), %vm865_vm0, %v866_v6  ;;  %p296_p3 = scmp.lt.s32.totalorder (!%p263_p2), %s702_s28, 1  ;;  %v467_v8 = vld [vmem:[%s1070_s4 + $0x20] sm:$0xff] (!%p263_p2)  ;;  %v468_v9 = vld [vmem:[%s1070_s4 + $0x28] sm:$0xff] (!%p263_p2)  ;;  %vm451_vm1 = vcmask (!%p263_p2), 975872  }
   0x7   : > { %835 = vmatprep.subr.bf16.mxu1 (!%p263_p2), %v864_v3  ;;  %811 = vmatprep.mubr.msk.f32.mxu1 (!%p263_p2), %vm865_vm0, %v866_v6  ;;  %v818_v7 = vpack.c.bf16 (!%p263_p2), %v466_v5, %v465_v2  ;;  %v711_v10 = vld [vmem:[%s1067_s1] ss:$0 sm:$0xff] (!%p263_p2)  ;;  %v713_v11 = vld [vmem:[%s1067_s1 + $0x1] ss:$0 sm:$0xff] (!%p263_p2)  ;;  %v469_v12 = vld [vmem:[%s1070_s4 + $0x30] sm:$0xff] (!%p263_p2)  ;;  %v821_v16 = vpack.c.bf16 (!%p263_p2), %v468_v9, %v467_v8  ;;  %vm479_vm2 = vcmask (!%p263_p2), 982016  }
   0x8   : > { %816 = vmatpush3.bf16.msra.mxu0 (!%p263_p2), %v815_v4  ;;  %v470_v13 = vld [vmem:[%s1070_s4 + $0x38] sm:$0xff] (!%p263_p2)  ;;  %v715_v14 = vld [vmem:[%s1067_s1 + $0x2] ss:$0 sm:$0xff] (!%p263_p2)  ;;  %v719_v15 = vld [vmem:[%s1067_s1 + $0x3] ss:$0 sm:$0xff] (!%p263_p2)  ;;  %vm559_vm3 = vcmask (!%p263_p2), 261120  }
   0x9   : > { %817 = vmatprep.subr.bf16.mxu0 (!%p263_p2), %v864_v3  ;;  %v723_v20 = vld [vmem:[%s1067_s1 + $0x4] ss:$0 sm:$0xff] (!%p263_p2)  ;;  %v824_v36 = vpack.c.bf16 (!%p263_p2), %v470_v13, %v469_v12  ;;  %v727_v40 = vld [vmem:[%s1067_s1 + $0x5] ss:$0 sm:$0xff] (!%p263_p2)  ;;  %v472_v42 = vld [vmem:[%s1070_s4 + $0x48] sm:$0xff] (!%p263_p2) }
   0xa   : > { %v471_v41 = vld [vmem:[%s1070_s4 + $0x40] sm:$0xff] (!%p263_p2)  ;;  %v555_v59 = vld [vmem:[%s1072_s6 + $0x8] sm:$0xff] (!%p263_p2)  ;;  %v473_v60 = vld [vmem:[%s1070_s4 + $0x50] sm:$0xff] (!%p263_p2) }
   0xb   : > { %v731_v49 = vld [vmem:[%s1067_s1 + $0x6] ss:$0 sm:$0xff] (!%p263_p2)  ;;  %v827_v54 = vpack.c.bf16 (!%p263_p2), %v472_v42, %v471_v41  ;;  %v735_v58 = vld [vmem:[%s1067_s1 + $0x7] ss:$0 sm:$0xff] (!%p263_p2)  ;;  %v474_v61 = vld [vmem:[%s1070_s4 + $0x58] sm:$0xff] (!%p263_p2) }
   0xc   : > { %819 = vmatpush3.bf16.msra.mxu0 (!%p263_p2), %v818_v7  ;;  %v554_v50 = vld [vmem:[%s1072_s6] sm:$0xff] (!%p263_p2)  ;;  %v739_v7 = vld [vmem:[%s1067_s1 + $0x8] ss:$0 sm:$0xff] (!%p263_p2) }
   0xd   : > { %s1076_s28 = smov (!%p296_p3, %s702_s28), 1  ;;  %820 = vmatprep.subr.bf16.mxu0 %v864_v3  ;;  %v836_v1 = vpack.c.bf16 %v555_v59, %v554_v50 }
   0xe   : > { %s747_s19 = sshll.u32 %s1076_s28, 4  ;;  %s748_s16 = sshll.u32 %s1076_s28, 2 }
   0xf   : > { %s961_s10 = scalar_lea.vmem %s1066_s0, %s747_s19  ;;  %837 = vmatpush3.bf16.msra.mxu1 %v836_v1  ;;  %s305_s19 = scalar_lea.vmem %s1074_s8, %s748_s16 }
  0x10   : > { %v306_v17 = vld [vmem:[%s961_s10] sm:$0x3]  ;;  %v307_v18 = vld [vmem:[%s961_s10 + $0x4] sm:$0x3]  ;;  %v331_v25 = vld [vmem:[%s961_s10 + $0x2] sm:$0x3]  ;;  %822 = vmatpush3.bf16.msra.mxu0 %v821_v16  ;;  %838 = vmatprep.subr.bf16.mxu1 %v864_v3 }
  0x11   : > { %v317_v19 = vld [vmem:[%s961_s10 + $0x1] sm:$0x3]  ;;  %v315_v21 = vmul.f32 %v711_v10, %v306_v17  ;;  %v316_v22 = vmul.f32 %v711_v10, %v307_v18  ;;  %v318_v23 = vld [vmem:[%s961_s10 + $0x5] sm:$0x3]  ;;  %v341_v28 = vmul.f32 %v715_v14, %v331_v25  ;;  %v717_v31 = vld [vmem:[%s961_s10 + $0x8] sm:$0x3]  ;;  %823 = vmatprep.subr.bf16.mxu0 %v864_v3 }
  0x12   : > { %v327_v24 = vmul.f32 %v713_v11, %v317_v19  ;;  %v332_v26 = vld [vmem:[%s961_s10 + $0x6] sm:$0x3]  ;;  %v328_v27 = vmul.f32 %v713_v11, %v318_v23  ;;  %v716_v30 = vld [vmem:[%s961_s10 + $0x4] sm:$0x3]  ;;  %v721_v35 = vld [vmem:[%s961_s10 + $0x9] sm:$0x3]  ;;  %v357_v38 = vmul.f32 %v719_v15, %v717_v31  ;;  %v830_v11 = vpack.c.bf16 %v474_v61, %v473_v60 }
  0x13   : > { %v342_v29 = vmul.f32 %v715_v14, %v332_v26  ;;  %v720_v32 = vld [vmem:[%s961_s10 + $0x5] sm:$0x3]  ;;  %v356_v34 = vmul.f32 %v719_v15, %v716_v30  ;;  %v725_v45 = vld [vmem:[%s961_s10 + $0xa] sm:$0x3]  ;;  %v371_v47 = vmul.f32 %v723_v20, %v721_v35  ;;  %v728_v48 = vld [vmem:[%s961_s10 + $0x8] sm:$0x3] }
  0x14   : > { %v329_v33 = vadd.f32 %v327_v24, %v315_v21  ;;  %v330_v37 = vadd.f32 %v328_v27, %v316_v22  ;;  %v724_v39 = vld [vmem:[%s961_s10 + $0x6] sm:$0x3]  ;;  %v370_v44 = vmul.f32 %v723_v20, %v720_v32  ;;  %v729_v53 = vld [vmem:[%s961_s10 + $0xc] sm:$0x3]  ;;  %825 = vmatpush3.bf16.msra.mxu0 %v824_v36  ;;  %v385_v56 = vmul.f32 %v727_v40, %v725_v45  ;;  %v732_v57 = vld [vmem:[%s961_s10 + $0x9] sm:$0x3] }
  0x15   : > { %v384_v52 = vmul.f32 %v727_v40, %v724_v39  ;;  %826 = vmatprep.subr.bf16.mxu0 %v864_v3  ;;  %v399_v63 = vmul.f32 %v731_v49, %v728_v48  ;;  %v733_v0 = vld [vmem:[%s961_s10 + $0xd] sm:$0x3]  ;;  %v400_v4 = vmul.f32 %v731_v49, %v729_v53  ;;  %v736_v5 = vld [vmem:[%s961_s10 + $0xa] sm:$0x3]  ;;  %v413_v9 = vmul.f32 %v735_v58, %v732_v57  ;;  %v475_v14 = vld [vmem:[%s1070_s4 + $0x60] sm:$0xff] }
  0x16   : > { %v343_v43 = vadd.f32 %v341_v28, %v329_v33  ;;  %v344_v46 = vadd.f32 %v342_v29, %v330_v37  ;;  %v737_v10 = vld [vmem:[%s961_s10 + $0xe] sm:$0x3]  ;;  %v414_v13 = vmul.f32 %v735_v58, %v733_v0  ;;  %v427_v17 = vmul.f32 %v739_v7, %v736_v5  ;;  %v740_v23 = vld [vmem:[%s1068_s2] ss:$0 sm:$0xff]  ;;  %v477_v29 = vld [vmem:[%s1070_s4 + $0x70] sm:$0xff] }
  0x17   : > { %v476_v15 = vld [vmem:[%s1070_s4 + $0x68] sm:$0xff]  ;;  %v428_v19 = vmul.f32 %v739_v7, %v737_v10  ;;  %v741_v26 = vld [vmem:[%s1069_s3] ss:$0 sm:$0xff]  ;;  %v639_v58 = vlaneseq }
  0x18   : > { %v358_v51 = vadd.f32 %v356_v34, %v343_v43  ;;  %v359_v55 = vadd.f32 %v357_v38, %v344_v46  ;;  %828 = vmatpush3.bf16.msra.mxu0 %v827_v54  ;;  %v833_v21 = vpack.c.bf16 %v476_v15, %v475_v14  ;;  %v556_v43 = vld [vmem:[%s1072_s6 + $0x10] sm:$0xff]  ;;  %v478_v46 = vld [vmem:[%s1071_s5] sm:$0x1] }
  0x19   : > { %829 = vmatprep.subr.bf16.mxu0 %v864_v3  ;;  %v640_v59 = vshrl.u32 %v639_v58, 7 }
  0x1a   : > { %v372_v62 = vadd.f32 %v370_v44, %v358_v51  ;;  %v373_v2 = vadd.f32 %v371_v47, %v359_v55  ;;  %v557_v44 = vld [vmem:[%s1072_s6 + $0x18] sm:$0xff]  ;;  %v558_v51 = vld [vmem:[%s1073_s7] sm:$0x1] }
  0x1b   : > { %v839_v45 = vpack.c.bf16 %v557_v44, %v556_v43  ;;  %v641_v60 = vsub.s32 0, %v640_v59 }
  0x1c   : > { %v386_v8 = vadd.f32 %v384_v52, %v372_v62  ;;  %v387_v12 = vadd.f32 %v385_v56, %v373_v2  ;;  %831 = vmatpush3.bf16.msra.mxu0 %v830_v11 }
  0x1d   : > { %832 = vmatprep.subr.bf16.mxu0 %v864_v3  ;;  %840 = vmatpush3.bf16.msra.mxu1 %v839_v45 }
  0x1e   : > { %v401_v16 = vadd.f32 %v399_v63, %v386_v8  ;;  %v402_v18 = vadd.f32 %v400_v4, %v387_v12 }
  0x20   : > { %v415_v20 = vadd.f32 %v413_v9, %v401_v16  ;;  %v416_v22 = vadd.f32 %v414_v13, %v402_v18  ;;  %834 = vmatpush3.bf16.msra.mxu0 %v833_v21 }
  0x21   : > { %798 = vmatprep.subr.mxu0 %v866_v6 }
  0x22   : > { %v429_v24 = vadd.f32 %v427_v17, %v415_v20  ;;  %v430_v25 = vadd.f32 %v428_v19, %v416_v22 }
  0x24   : > { %v438_v27 = vmul.f32 %v740_v23, %v429_v24  ;;  %v439_v28 = vmul.f32 %v740_v23, %v430_v25  ;;  %799 = vmatpush3.msra.mxu0 %v477_v29 }
  0x26   : > { %v447_v30 = vadd.f32 %v741_v26, %v438_v27  ;;  %v448_v31 = vadd.f32 %v741_v26, %v439_v28 }
  0x28   : > { %v449_v32 = vmax.f32 %v447_v30, 0.0  ;;  %v450_v3 = vmax.f32 %v448_v31, 0.0 }
  0x2a   : > { %v452_v33 = vsel %vm451_vm1, %v449_v32, 0.0  ;;  %v453_v34 = vsel %vm451_vm1, %v450_v3, 0.0 }
  0x2b   : > { %v454_v35 = vadd.f32 %v453_v34, %v452_v33 }
  0x2d   : > { %v455_v36 = vsel %vm451_vm1, %v454_v35, 0.0 }
  0x2e   : > { %v456_v37 = vrot.slane %v455_v36, 4 }
  0x30   : > { %v457_v38 = vadd.f32 %v456_v37, %v455_v36 }
  0x32   : > { %v458_v6 = vrot.slane %v457_v38, 2 }
  0x34   : > { %v459_v39 = vadd.f32 %v458_v6, %v457_v38 }
  0x36   : > { %v460_v40 = vrot.slane %v459_v39, 1 }
  0x38   : > { %v461_v41 = vadd.f32 %v460_v40, %v459_v39 }
  0x3a   : > { %v462_v42 = vmul.f32 0.25, %v461_v41 }
  0x3c   : > { %801 = vmatmul.mubr.msk.f32.vlgmr.msra.gmra.mrb[0].mxu0 %vm479_vm2, %v462_v42 }
 0x10f   : > { %v549_v47 = vpop.f32.mrb[0].mxu0 }
 0x110   : > { %v550_v48 = vadd.f32 %v549_v47, %v478_v46  ;;  %v802_v49 = vpop.f32.mrb[1].mxu0 }
 0x112   : > { %v553_v50 = vmax.f32 %v550_v48, 0.0 }
 0x114   : > { %812 = vmatmul.mubr.msk.f32.vlgmr.msra.gmra.mrb[0].mxu1 %vm559_vm3, %v553_v50 }
 0x1e7   : > { %v629_v52 = vpop.f32.mrb[0].mxu1 }
 0x1e8   : > { %v630_v53 = vadd.f32 %v629_v52, %v558_v51  ;;  %v813_v54 = vpop.f32.mrb[1].mxu1 }
 0x1ea   : > { %v744_v55 = vmul.f32 -1.442695, %v630_v53 }
 0x1ec   : > { %852 = vpow2.f32 %v744_v55 }
 0x1f6   : > { %v853_v56 = vpop.eup %852 }
 0x1f7   : > { %v636_v57 = vadd.f32 1.0, %v853_v56 }
 0x1f9   : > { %854 = vrcp.f32 %v636_v57 }
 0x203   : > { %v855_v61 = vpop.eup %854 }
 0x204   : > { %v642_v62 = vrot.slane %v855_v61, %v641_v60 }
 0x206   : > { %v643_v63 = vmul.f32 %v642_v62, %v449_v32  ;;  %v644_v0 = vmul.f32 %v642_v62, %v450_v3 }
 0x208   : > { %645 = vst.msk [vmem:[%s305_s19] sm:$0x3] %vm451_vm1, %v643_v63  ;;  %646 = vst.msk [vmem:[%s305_s19 + $0x2] sm:$0x3] %vm451_vm1, %v644_v0 }
 0x209 PF: > { %s18_s27 = sadd.s32 1, %s862_s27  }
 0x20a   : > { %p15_p4 = scmp.ge.s32.totalorder %s18_s27, 4  }
 0x20c   :  { %17 = sbr.rel (!%p15_p4) target bundleno = 1 (0x1), region = 92 }

</bundles_post_ra>
